<compile_context>
chip_gen: v6e
topology: v6e:2x2x1
jax: 0.10.0
libtpu: 0.0.40
codegen_flags: <defaults>
</compile_context>

<pallas_src>
import math

import jax
import jax.numpy as jnp
from jax.experimental import pallas as pl
from jax.experimental.pallas import tpu as pltpu

EPS = 1e-5
NEG_INF = -1e9


def _layernorm(h, w_row, b_row):
    # h: (M, D) f32, w_row/b_row: (1, D) f32
    mean = jnp.mean(h, axis=-1, keepdims=True)
    var = jnp.mean((h - mean) ** 2, axis=-1, keepdims=True)
    return (h - mean) * jax.lax.rsqrt(var + EPS) * w_row + b_row


def _softmax_biased(scores):
    # scores already include the additive key-mask bias (f32).
    s = scores - jnp.max(scores, axis=-1, keepdims=True)
    e = jnp.exp(s)
    return e * pl.reciprocal(jnp.sum(e, axis=-1, keepdims=True), approx=True)


def attending_layer_kernel(
    x_ref, ed_ref, gd_ref, mask_ref,
    ln_w_ref, ln_b_ref,
    e_wv_ref, e_wo_ref,
    g_wv_ref, g_wo_ref,
    s_wq_ref, s_wk_ref, s_wv_ref, s_wo_ref,
    ff_w1_ref, ff_b1_ref, ff_w2_ref, ff_b2_ref,
    o_ref,
):
    TB, N, _ = ed_ref.shape          # (TB, N, N) block
    D = x_ref.shape[-1]
    inv_sqrt_d = 1.0 / math.sqrt(float(D))

    x = x_ref[...].astype(jnp.float32)        # (TB*N, D) residual stream, f32
    mask = mask_ref[...].astype(jnp.float32)  # (TB, 1, N)
    ln_w = ln_w_ref[...]                      # (4, D) f32
    ln_b = ln_b_ref[...]                      # (4, D) f32

    # Hoisted key mask: one compare+select, reused as an additive bias.
    mask_bias = jnp.where(mask > 0.0, 0.0, NEG_INF)      # (TB, 1, N)

    # TODO(synk): for very small N, pack ceil(128/N) molecules into one
    # block-diagonal attention tile so each MXU call is filled.
    def dist_sublayer(x, dists, wv, wo, idx):
        # Softmax computed here (not hoisted): only one (TB, N, N) f32
        # attention map is live at any time -> lower VMEM / spill pressure.
        attn = _softmax_biased(-dists.astype(jnp.float32) + mask_bias)
        h = _layernorm(x, ln_w[idx:idx + 1, :], ln_b[idx:idx + 1, :])
        v = jnp.dot(h.astype(jnp.bfloat16), wv,
                    preferred_element_type=jnp.float32)            # (TB*N, D)
        # Reshape in f32 (layout no-op since N % 8 == 0), then one bf16 cast.
        v = v.reshape(TB, N, D).astype(jnp.bfloat16)
        ctx = jnp.einsum('bqk,bkd->bqd',
                         attn.astype(jnp.bfloat16), v,
                         preferred_element_type=jnp.float32).reshape(TB * N, D)
        return x + jnp.dot(ctx.astype(jnp.bfloat16), wo,
                           preferred_element_type=jnp.float32)

    # ---- sublayer 0: euclidean-distance attention -----------------------
    x = dist_sublayer(x, ed_ref[...], e_wv_ref[...], e_wo_ref[...], 0)
    # ---- sublayer 1: graph-distance attention ----------------------------
    x = dist_sublayer(x, gd_ref[...], g_wv_ref[...], g_wo_ref[...], 1)

    # ---- sublayer 2: self-attention ---------------------------------------
    h = _layernorm(x, ln_w[2:3, :], ln_b[2:3, :]).astype(jnp.bfloat16)
    # Separate Q/K/V projections keep every operand/output lane-dense even
    # when D % 128 != 0 (no non-aligned lane slices of a fused qkv tensor).
    # TODO(synk): fuse into one (D, 3D) matmul when D % 128 == 0.
    q = jnp.dot(h, s_wq_ref[...], preferred_element_type=jnp.float32)
    k = jnp.dot(h, s_wk_ref[...], preferred_element_type=jnp.float32)
    v = jnp.dot(h, s_wv_ref[...], preferred_element_type=jnp.float32)
    # Fold 1/sqrt(D) into q (one (M, D) pass instead of a (TB, N, N) pass).
    q = (q * inv_sqrt_d).reshape(TB, N, D).astype(jnp.bfloat16)
    k = k.reshape(TB, N, D).astype(jnp.bfloat16)
    v = v.reshape(TB, N, D).astype(jnp.bfloat16)
    # NT contraction on the shared D axis -- no explicit k transpose.
    scores = jnp.einsum('bqd,bkd->bqk', q, k,
                        preferred_element_type=jnp.float32)
    attn = _softmax_biased(scores + mask_bias)
    ctx = jnp.einsum('bqk,bkd->bqd', attn.astype(jnp.bfloat16), v,
                     preferred_element_type=jnp.float32).reshape(TB * N, D)
    x = x + jnp.dot(ctx.astype(jnp.bfloat16), s_wo_ref[...],
                    preferred_element_type=jnp.float32)

    # ---- sublayer 3: position-wise feed-forward ---------------------------
    h = _layernorm(x, ln_w[3:4, :], ln_b[3:4, :])
    ff = jnp.dot(h.astype(jnp.bfloat16), ff_w1_ref[...],
                 preferred_element_type=jnp.float32) + ff_b1_ref[...]
    ff = jnp.maximum(ff, 0.0)
    ff = jnp.dot(ff.astype(jnp.bfloat16), ff_w2_ref[...],
                 preferred_element_type=jnp.float32) + ff_b2_ref[...]
    x = x + ff

    o_ref[...] = x.astype(o_ref.dtype)


def _vmem_capacity_bytes():
    try:
        return int(pltpu.get_tpu_info().vmem_capacity_bytes)
    except Exception:
        return 64 * 1024 * 1024       # conservative: v7x per-TC VMEM


def _choose_tb(B, N, D, vmem_limit_bytes):
    """Molecules per grid step."""
    g = 8 // math.gcd(N, 8)           # tb*N must be a multiple of 8
    # Flattened rows per step: fill the MXU M dim several times over; allow
    # bigger tiles when the VMEM budget is large (v5e/v6e 128 MiB).
    target_rows = 1024 if vmem_limit_bytes >= (96 << 20) else 512
    tb = max(1, target_rows // max(N, 1))
    # Per-molecule, per-buffer DMA bytes: x(in) + out + both dists + mask.
    per_mol = (2 * N * D + 2 * N * N + N) * 4
    budget = max(per_mol, vmem_limit_bytes // 4)   # headroom for weights/temps
    tb = min(tb, max(1, budget // (2 * per_mol)))  # x2: double buffering
    # Keep >= 2 grid steps so the "parallel" axis can shard across v7x's two
    # TensorCores and the BlockSpec pipeline has something to overlap.
    if B >= 2:
        tb = min(tb, max(1, B // 2))
    tb = max(1, tb)
    if tb % g != 0:
        tb = max(g, (tb // g) * g)
    # Prefer a tb that divides B: avoids wrapper-side padded HBM copies.
    if B % tb != 0:
        for cand in range(tb, 0, -1):
            if cand % g == 0 and B % cand == 0:
                tb = cand
                break
    return tb


def attending_layer(x, eucl_dists, graph_dists, mask, params, *, tb=None,
                    dists_in_bf16=False):
    B, N0, D = x.shape
    Dff = params["ff_w1"].shape[1]

    # Pad N to a multiple of 8 so in-kernel (TB*N, D) <-> (TB, N, D) reshapes
    # never cross the (8, 128) sublane tile boundary (no relayout copies).
    N = ((N0 + 7) // 8) * 8
    if N != N0:
        pn = N - N0
        x = jnp.pad(x, ((0, 0), (0, pn), (0, 0)))
        eucl_dists = jnp.pad(eucl_dists, ((0, 0), (0, pn), (0, pn)))
        graph_dists = jnp.pad(graph_dists, ((0, 0), (0, pn), (0, pn)))
        mask = jnp.pad(mask, ((0, 0), (0, 0), (0, pn)))  # padded atoms masked

    # Per-generation VMEM budget: ~48 MiB on v7x (64 MiB), ~96 MiB on v5e/v6e.
    vmem_limit = min(int(_vmem_capacity_bytes() * 3 // 4), 100 * 1024 * 1024)

    if tb is None:
        tb = _choose_tb(B, N, D, vmem_limit)

    Bp = ((B + tb - 1) // tb) * tb
    if Bp != B:
        # Fallback only (tb normally divides B): pad with inert molecules.
        pad = Bp - B
        x = jnp.pad(x, ((0, pad), (0, 0), (0, 0)))
        eucl_dists = jnp.pad(eucl_dists, ((0, pad), (0, 0), (0, 0)))
        graph_dists = jnp.pad(graph_dists, ((0, pad), (0, 0), (0, 0)))
        mask = jnp.pad(mask, ((0, pad), (0, 0), (0, 0)))

    mask = mask.astype(jnp.float32)
    if dists_in_bf16:
        # Halves the dominant HBM traffic (useful on v5e); f32 stats in-kernel.
        eucl_dists = eucl_dists.astype(jnp.bfloat16)
        graph_dists = graph_dists.astype(jnp.bfloat16)
    else:
        eucl_dists = eucl_dists.astype(jnp.float32)
        graph_dists = graph_dists.astype(jnp.float32)

    x_flat = x.reshape(Bp * N, D).astype(jnp.float32)

    # Weights feeding the MXU go bf16 (f32 accumulation in-kernel); layernorm
    # params and biases stay f32 (VPU path, v5e has no bf16 VALU).
    bf16 = lambda w: w.astype(jnp.bfloat16)
    weight_args = (
        params["ln_w"].astype(jnp.float32), params["ln_b"].astype(jnp.float32),
        bf16(params["e_wv"]), bf16(params["e_wo"]),
        bf16(params["g_wv"]), bf16(params["g_wo"]),
        bf16(params["s_wq"]), bf16(params["s_wk"]),
        bf16(params["s_wv"]), bf16(params["s_wo"]),
        bf16(params["ff_w1"]), params["ff_b1"].astype(jnp.float32),
        bf16(params["ff_w2"]), params["ff_b2"].astype(jnp.float32),
    )

    def run(weight_mode):
        def full(shape):
            # Grid-invariant weights: constant index_map (DMA'd once).
            if weight_mode is None:
                return pl.BlockSpec(shape, lambda b: (0,) * len(shape))
            return pl.BlockSpec(shape, lambda b: (0,) * len(shape),
                                pipeline_mode=weight_mode)

        grid_spec = pltpu.PrefetchScalarGridSpec(
            num_scalar_prefetch=0,
            grid=(Bp // tb,),
            in_specs=[
                pl.BlockSpec((tb * N, D), lambda b: (b, 0)),     # x (flattened)
                pl.BlockSpec((tb, N, N), lambda b: (b, 0, 0)),   # eucl_dists
                pl.BlockSpec((tb, N, N), lambda b: (b, 0, 0)),   # graph_dists
                pl.BlockSpec((tb, 1, N), lambda b: (b, 0, 0)),   # mask
                full((4, D)), full((4, D)),                      # ln_w, ln_b
                full((D, D)), full((D, D)),                      # e_wv, e_wo
                full((D, D)), full((D, D)),                      # g_wv, g_wo
                full((D, D)), full((D, D)),                      # s_wq, s_wk
                full((D, D)), full((D, D)),                      # s_wv, s_wo
                full((D, Dff)), full((1, Dff)),                  # ff_w1, ff_b1
                full((Dff, D)), full((1, D)),                    # ff_w2, ff_b2
            ],
            out_specs=pl.BlockSpec((tb * N, D), lambda b: (b, 0)),
        )
        return pl.pallas_call(
            attending_layer_kernel,
            out_shape=jax.ShapeDtypeStruct((Bp * N, D), jnp.float32),
            grid_spec=grid_spec,
            compiler_params=pltpu.CompilerParams(
                dimension_semantics=("parallel",),
                vmem_limit_bytes=vmem_limit,
            ),
        )(x_flat, eucl_dists, graph_dists, mask, *weight_args)

    try:
        # Single-buffer the grid-invariant weights (the second double-buffer
        # copy is pure VMEM waste -- critical under v7x's 64 MiB VMEM).
        out_flat = run(pl.Buffered(1))
    except Exception:
        # Fallback if this jax/libtpu build rejects 1-deep buffering.
        out_flat = run(None)

    return out_flat.reshape(Bp, N, D)[:B, :N0]


def init_params(key, D, Dff):
    ks = jax.random.split(key, 16)
    lin = lambda k, shape: (jax.random.normal(k, shape, jnp.float32)
                            / (shape[0] ** 0.5))
    return {
        # LayerNorm: weight ~ U[0,1) (per overridden reset_parameters), bias=0
        "ln_w": jax.random.uniform(ks[0], (4, D), jnp.float32),
        "ln_b": jnp.zeros((4, D), jnp.float32),
        "e_wv": lin(ks[1], (D, D)),
        "e_wo": lin(ks[2], (D, D)),
        "g_wv": lin(ks[3], (D, D)),
        "g_wo": lin(ks[4], (D, D)),
        "s_wq": lin(ks[5], (D, D)),
        "s_wk": lin(ks[6], (D, D)),
        "s_wv": lin(ks[7], (D, D)),
        "s_wo": lin(ks[8], (D, D)),
        "ff_w1": lin(ks[9], (D, Dff)),
        "ff_b1": jnp.zeros((1, Dff), jnp.float32),
        "ff_w2": lin(ks[10], (Dff, D)),
        "ff_b2": jnp.zeros((1, D), jnp.float32),
    }


if __name__ == "__main__":
    B, N, D, Dff = 2, 8, 32, 64

    key = jax.random.PRNGKey(0)
    k_x, k_e, k_g, k_p = jax.random.split(key, 4)

    x = jax.random.normal(k_x, (B, N, D), jnp.float32)
    # symmetric, non-negative pairwise "distances"
    e_raw = jnp.abs(jax.random.normal(k_e, (B, N, N), jnp.float32))
    eucl_dists = 0.5 * (e_raw + jnp.swapaxes(e_raw, 1, 2))
    g_raw = jnp.abs(jax.random.normal(k_g, (B, N, N), jnp.float32))
    graph_dists = 0.5 * (g_raw + jnp.swapaxes(g_raw, 1, 2))
    # last atom of second molecule is padding
    mask = jnp.ones((B, 1, N), jnp.float32).at[1, 0, N - 1].set(0.0)

    params = init_params(k_p, D, Dff)

    out = attending_layer(x, eucl_dists, graph_dists, mask, params)
    jax.block_until_ready(out)
    assert out.shape == (B, N, D)
    assert bool(jnp.all(jnp.isfinite(out)))
    print("KERNEL_OK")
</pallas_src>

<mosaic_0001>
module attributes {stable_mosaic.version = 11 : i64} {
  func.func @attending_layer_kernel(%arg0: i32, %arg1: memref<8x32xf32, #tpu.memory_space<vmem>>, %arg2: memref<1x8x8xf32, #tpu.memory_space<vmem>>, %arg3: memref<1x8x8xf32, #tpu.memory_space<vmem>>, %arg4: memref<1x1x8xf32, #tpu.memory_space<vmem>>, %arg5: memref<4x32xf32, #tpu.memory_space<vmem>>, %arg6: memref<4x32xf32, #tpu.memory_space<vmem>>, %arg7: memref<32x32xbf16, #tpu.memory_space<vmem>>, %arg8: memref<32x32xbf16, #tpu.memory_space<vmem>>, %arg9: memref<32x32xbf16, #tpu.memory_space<vmem>>, %arg10: memref<32x32xbf16, #tpu.memory_space<vmem>>, %arg11: memref<32x32xbf16, #tpu.memory_space<vmem>>, %arg12: memref<32x32xbf16, #tpu.memory_space<vmem>>, %arg13: memref<32x32xbf16, #tpu.memory_space<vmem>>, %arg14: memref<32x32xbf16, #tpu.memory_space<vmem>>, %arg15: memref<32x64xbf16, #tpu.memory_space<vmem>>, %arg16: memref<1x64xf32, #tpu.memory_space<vmem>>, %arg17: memref<64x32xbf16, #tpu.memory_space<vmem>>, %arg18: memref<1x32xf32, #tpu.memory_space<vmem>>, %arg19: memref<8x32xf32, #tpu.memory_space<vmem>>) attributes {dimension_semantics = [#tpu.dimension_semantics<parallel>], iteration_bounds = array<i64: 2>, scalar_prefetch = 0 : i64, scratch_operands = 0 : i64, tpu.core_type = #tpu.core_type<tc>, window_params = [{transform_indices = @transform_0, window_bounds = array<i64: 8, 32>}, {transform_indices = @transform_1, window_bounds = array<i64: 1, 8, 8>}, {transform_indices = @transform_2, window_bounds = array<i64: 1, 8, 8>}, {transform_indices = @transform_3, window_bounds = array<i64: 1, 1, 8>}, {pipeline_mode = #tpu.pipeline_mode<synchronous>, transform_indices = @transform_4, window_bounds = array<i64: 4, 32>}, {pipeline_mode = #tpu.pipeline_mode<synchronous>, transform_indices = @transform_5, window_bounds = array<i64: 4, 32>}, {pipeline_mode = #tpu.pipeline_mode<synchronous>, transform_indices = @transform_6, window_bounds = array<i64: 32, 32>}, {pipeline_mode = #tpu.pipeline_mode<synchronous>, transform_indices = @transform_7, window_bounds = array<i64: 32, 32>}, {pipeline_mode = #tpu.pipeline_mode<synchronous>, transform_indices = @transform_8, window_bounds = array<i64: 32, 32>}, {pipeline_mode = #tpu.pipeline_mode<synchronous>, transform_indices = @transform_9, window_bounds = array<i64: 32, 32>}, {pipeline_mode = #tpu.pipeline_mode<synchronous>, transform_indices = @transform_10, window_bounds = array<i64: 32, 32>}, {pipeline_mode = #tpu.pipeline_mode<synchronous>, transform_indices = @transform_11, window_bounds = array<i64: 32, 32>}, {pipeline_mode = #tpu.pipeline_mode<synchronous>, transform_indices = @transform_12, window_bounds = array<i64: 32, 32>}, {pipeline_mode = #tpu.pipeline_mode<synchronous>, transform_indices = @transform_13, window_bounds = array<i64: 32, 32>}, {pipeline_mode = #tpu.pipeline_mode<synchronous>, transform_indices = @transform_14, window_bounds = array<i64: 32, 64>}, {pipeline_mode = #tpu.pipeline_mode<synchronous>, transform_indices = @transform_15, window_bounds = array<i64: 1, 64>}, {pipeline_mode = #tpu.pipeline_mode<synchronous>, transform_indices = @transform_16, window_bounds = array<i64: 64, 32>}, {pipeline_mode = #tpu.pipeline_mode<synchronous>, transform_indices = @transform_17, window_bounds = array<i64: 1, 32>}, {transform_indices = @transform_18, window_bounds = array<i64: 8, 32>}]} {
    %c0 = arith.constant 0 : index
    %c0_0 = arith.constant 0 : index
    %0 = vector.load %arg1[%c0, %c0_0] : memref<8x32xf32, #tpu.memory_space<vmem>>, vector<8x32xf32>
    %c0_1 = arith.constant 0 : index
    %c0_2 = arith.constant 0 : index
    %c0_3 = arith.constant 0 : index
    %1 = vector.load %arg4[%c0_1, %c0_2, %c0_3] : memref<1x1x8xf32, #tpu.memory_space<vmem>>, vector<1x1x8xf32>
    %c0_4 = arith.constant 0 : index
    %c0_5 = arith.constant 0 : index
    %2 = vector.load %arg5[%c0_4, %c0_5] : memref<4x32xf32, #tpu.memory_space<vmem>>, vector<4x32xf32>
    %c0_6 = arith.constant 0 : index
    %c0_7 = arith.constant 0 : index
    %3 = vector.load %arg6[%c0_6, %c0_7] : memref<4x32xf32, #tpu.memory_space<vmem>>, vector<4x32xf32>
    %cst = arith.constant 0.000000e+00 : f32
    %4 = vector.broadcast %cst : f32 to vector<1x1x8xf32>
    %5 = arith.cmpf ogt, %1, %4 : vector<1x1x8xf32>
    %cst_8 = arith.constant 0.000000e+00 : f32
    %cst_9 = arith.constant -1.000000e+09 : f32
    %6 = vector.broadcast %cst_8 : f32 to vector<1x1x8xf32>
    %7 = vector.broadcast %cst_9 : f32 to vector<1x1x8xf32>
    %8 = arith.select %5, %6, %7 : vector<1x1x8xi1>, vector<1x1x8xf32>
    %c0_10 = arith.constant 0 : index
    %c0_11 = arith.constant 0 : index
    %c0_12 = arith.constant 0 : index
    %9 = vector.load %arg2[%c0_10, %c0_11, %c0_12] : memref<1x8x8xf32, #tpu.memory_space<vmem>>, vector<1x8x8xf32>
    %c0_13 = arith.constant 0 : index
    %c0_14 = arith.constant 0 : index
    %10 = vector.load %arg7[%c0_13, %c0_14] : memref<32x32xbf16, #tpu.memory_space<vmem>>, vector<32x32xbf16>
    %c0_15 = arith.constant 0 : index
    %c0_16 = arith.constant 0 : index
    %11 = vector.load %arg8[%c0_15, %c0_16] : memref<32x32xbf16, #tpu.memory_space<vmem>>, vector<32x32xbf16>
    %cst_17 = arith.constant 0.000000e+00 : f32
    %12 = vector.broadcast %cst_17 : f32 to vector<1x8x8xf32>
    %13 = arith.subf %12, %9 : vector<1x8x8xf32>
    %14 = vector.broadcast %8 : vector<1x1x8xf32> to vector<1x8x8xf32>
    %15 = arith.addf %13, %14 : vector<1x8x8xf32>
    %cst_18 = arith.constant dense<0xFF800000> : vector<1x8xf32>
    %16 = vector.multi_reduction <maximumf>, %15, %cst_18 [2] : vector<1x8x8xf32> to vector<1x8xf32>
    %17 = vector.shape_cast %16 : vector<1x8xf32> to vector<1x8x1xf32>
    %18 = vector.broadcast %17 : vector<1x8x1xf32> to vector<1x8x8xf32>
    %19 = arith.subf %15, %18 : vector<1x8x8xf32>
    %20 = math.exp %19 : vector<1x8x8xf32>
    %cst_19 = arith.constant dense<0.000000e+00> : vector<1x8xf32>
    %21 = vector.multi_reduction <add>, %20, %cst_19 [2] : vector<1x8x8xf32> to vector<1x8xf32>
    %22 = vector.shape_cast %21 : vector<1x8xf32> to vector<1x8x1xf32>
    %23 = tpu.reciprocal %22 {approx = true} : vector<1x8x1xf32> -> vector<1x8x1xf32>
    %24 = vector.broadcast %23 : vector<1x8x1xf32> to vector<1x8x8xf32>
    %25 = arith.mulf %20, %24 : vector<1x8x8xf32>
    %26 = vector.extract_strided_slice %2 {offsets = [0, 0], sizes = [1, 32], strides = [1, 1]} : vector<4x32xf32> to vector<1x32xf32>
    %27 = vector.extract_strided_slice %3 {offsets = [0, 0], sizes = [1, 32], strides = [1, 1]} : vector<4x32xf32> to vector<1x32xf32>
    %cst_20 = arith.constant dense<0.000000e+00> : vector<8xf32>
    %28 = vector.multi_reduction <add>, %0, %cst_20 [1] : vector<8x32xf32> to vector<8xf32>
    %29 = vector.shape_cast %28 : vector<8xf32> to vector<8x1xf32>
    %cst_21 = arith.constant 3.200000e+01 : f32
    %30 = vector.broadcast %cst_21 : f32 to vector<8x1xf32>
    %31 = arith.divf %29, %30 : vector<8x1xf32>
    %32 = vector.broadcast %31 : vector<8x1xf32> to vector<8x32xf32>
    %33 = arith.subf %0, %32 : vector<8x32xf32>
    %34 = arith.mulf %33, %33 : vector<8x32xf32>
    %cst_22 = arith.constant dense<0.000000e+00> : vector<8xf32>
    %35 = vector.multi_reduction <add>, %34, %cst_22 [1] : vector<8x32xf32> to vector<8xf32>
    %36 = vector.shape_cast %35 : vector<8xf32> to vector<8x1xf32>
    %cst_23 = arith.constant 3.200000e+01 : f32
    %37 = vector.broadcast %cst_23 : f32 to vector<8x1xf32>
    %38 = arith.divf %36, %37 : vector<8x1xf32>
    %39 = vector.broadcast %31 : vector<8x1xf32> to vector<8x32xf32>
    %40 = arith.subf %0, %39 : vector<8x32xf32>
    %cst_24 = arith.constant 9.99999974E-6 : f32
    %41 = vector.broadcast %cst_24 : f32 to vector<8x1xf32>
    %42 = arith.addf %38, %41 : vector<8x1xf32>
    %43 = math.rsqrt %42 : vector<8x1xf32>
    %44 = vector.broadcast %43 : vector<8x1xf32> to vector<8x32xf32>
    %45 = arith.mulf %40, %44 : vector<8x32xf32>
    %46 = vector.broadcast %26 : vector<1x32xf32> to vector<8x32xf32>
    %47 = arith.mulf %45, %46 : vector<8x32xf32>
    %48 = vector.broadcast %27 : vector<1x32xf32> to vector<8x32xf32>
    %49 = arith.addf %47, %48 : vector<8x32xf32>
    %50 = arith.truncf %49 : vector<8x32xf32> to vector<8x32xbf16>
    %cst_25 = arith.constant dense<0.000000e+00> : vector<8x32xf32>
    %51 = tpu.matmul %50, %10, %cst_25 {dimension_numbers = #tpu.dot_dimension_numbers<[1], [0], [0], [1], [0, 0, 1, 1], [], []>} : vector<8x32xbf16>, vector<32x32xbf16>, vector<8x32xf32> -> vector<8x32xf32>
    %52 = vector.shape_cast %51 : vector<8x32xf32> to vector<1x8x32xf32>
    %53 = arith.truncf %52 : vector<1x8x32xf32> to vector<1x8x32xbf16>
    %54 = arith.truncf %25 : vector<1x8x8xf32> to vector<1x8x8xbf16>
    "tpu.trace_start"() <{level = 10 : i32, message = "bqk,bkd->bqd"}> : () -> ()
    %cst_26 = arith.constant dense<0.000000e+00> : vector<1x8x32xf32>
    %55 = tpu.matmul %54, %53, %cst_26 {dimension_numbers = #tpu.dot_dimension_numbers<[2], [1], [1], [2], [0, 0, 0, 1, 1, 2], [0], [0]>} : vector<1x8x8xbf16>, vector<1x8x32xbf16>, vector<1x8x32xf32> -> vector<1x8x32xf32>
    "tpu.trace_stop"() : () -> ()
    %56 = vector.shape_cast %55 : vector<1x8x32xf32> to vector<8x32xf32>
    %57 = arith.truncf %56 : vector<8x32xf32> to vector<8x32xbf16>
    %cst_27 = arith.constant dense<0.000000e+00> : vector<8x32xf32>
    %58 = tpu.matmul %57, %11, %cst_27 {dimension_numbers = #tpu.dot_dimension_numbers<[1], [0], [0], [1], [0, 0, 1, 1], [], []>} : vector<8x32xbf16>, vector<32x32xbf16>, vector<8x32xf32> -> vector<8x32xf32>
    %59 = arith.addf %0, %58 : vector<8x32xf32>
    %c0_28 = arith.constant 0 : index
    %c0_29 = arith.constant 0 : index
    %c0_30 = arith.constant 0 : index
    %60 = vector.load %arg3[%c0_28, %c0_29, %c0_30] : memref<1x8x8xf32, #tpu.memory_space<vmem>>, vector<1x8x8xf32>
    %c0_31 = arith.constant 0 : index
    %c0_32 = arith.constant 0 : index
    %61 = vector.load %arg9[%c0_31, %c0_32] : memref<32x32xbf16, #tpu.memory_space<vmem>>, vector<32x32xbf16>
    %c0_33 = arith.constant 0 : index
    %c0_34 = arith.constant 0 : index
    %62 = vector.load %arg10[%c0_33, %c0_34] : memref<32x32xbf16, #tpu.memory_space<vmem>>, vector<32x32xbf16>
    %cst_35 = arith.constant 0.000000e+00 : f32
    %63 = vector.broadcast %cst_35 : f32 to vector<1x8x8xf32>
    %64 = arith.subf %63, %60 : vector<1x8x8xf32>
    %65 = vector.broadcast %8 : vector<1x1x8xf32> to vector<1x8x8xf32>
    %66 = arith.addf %64, %65 : vector<1x8x8xf32>
    %cst_36 = arith.constant dense<0xFF800000> : vector<1x8xf32>
    %67 = vector.multi_reduction <maximumf>, %66, %cst_36 [2] : vector<1x8x8xf32> to vector<1x8xf32>
    %68 = vector.shape_cast %67 : vector<1x8xf32> to vector<1x8x1xf32>
    %69 = vector.broadcast %68 : vector<1x8x1xf32> to vector<1x8x8xf32>
    %70 = arith.subf %66, %69 : vector<1x8x8xf32>
    %71 = math.exp %70 : vector<1x8x8xf32>
    %cst_37 = arith.constant dense<0.000000e+00> : vector<1x8xf32>
    %72 = vector.multi_reduction <add>, %71, %cst_37 [2] : vector<1x8x8xf32> to vector<1x8xf32>
    %73 = vector.shape_cast %72 : vector<1x8xf32> to vector<1x8x1xf32>
    %74 = tpu.reciprocal %73 {approx = true} : vector<1x8x1xf32> -> vector<1x8x1xf32>
    %75 = vector.broadcast %74 : vector<1x8x1xf32> to vector<1x8x8xf32>
    %76 = arith.mulf %71, %75 : vector<1x8x8xf32>
    %77 = vector.extract_strided_slice %2 {offsets = [1, 0], sizes = [1, 32], strides = [1, 1]} : vector<4x32xf32> to vector<1x32xf32>
    %78 = vector.extract_strided_slice %3 {offsets = [1, 0], sizes = [1, 32], strides = [1, 1]} : vector<4x32xf32> to vector<1x32xf32>
    %cst_38 = arith.constant dense<0.000000e+00> : vector<8xf32>
    %79 = vector.multi_reduction <add>, %59, %cst_38 [1] : vector<8x32xf32> to vector<8xf32>
    %80 = vector.shape_cast %79 : vector<8xf32> to vector<8x1xf32>
    %cst_39 = arith.constant 3.200000e+01 : f32
    %81 = vector.broadcast %cst_39 : f32 to vector<8x1xf32>
    %82 = arith.divf %80, %81 : vector<8x1xf32>
    %83 = vector.broadcast %82 : vector<8x1xf32> to vector<8x32xf32>
    %84 = arith.subf %59, %83 : vector<8x32xf32>
    %85 = arith.mulf %84, %84 : vector<8x32xf32>
    %cst_40 = arith.constant dense<0.000000e+00> : vector<8xf32>
    %86 = vector.multi_reduction <add>, %85, %cst_40 [1] : vector<8x32xf32> to vector<8xf32>
    %87 = vector.shape_cast %86 : vector<8xf32> to vector<8x1xf32>
    %cst_41 = arith.constant 3.200000e+01 : f32
    %88 = vector.broadcast %cst_41 : f32 to vector<8x1xf32>
    %89 = arith.divf %87, %88 : vector<8x1xf32>
    %90 = vector.broadcast %82 : vector<8x1xf32> to vector<8x32xf32>
    %91 = arith.subf %59, %90 : vector<8x32xf32>
    %cst_42 = arith.constant 9.99999974E-6 : f32
    %92 = vector.broadcast %cst_42 : f32 to vector<8x1xf32>
    %93 = arith.addf %89, %92 : vector<8x1xf32>
    %94 = math.rsqrt %93 : vector<8x1xf32>
    %95 = vector.broadcast %94 : vector<8x1xf32> to vector<8x32xf32>
    %96 = arith.mulf %91, %95 : vector<8x32xf32>
    %97 = vector.broadcast %77 : vector<1x32xf32> to vector<8x32xf32>
    %98 = arith.mulf %96, %97 : vector<8x32xf32>
    %99 = vector.broadcast %78 : vector<1x32xf32> to vector<8x32xf32>
    %100 = arith.addf %98, %99 : vector<8x32xf32>
    %101 = arith.truncf %100 : vector<8x32xf32> to vector<8x32xbf16>
    %cst_43 = arith.constant dense<0.000000e+00> : vector<8x32xf32>
    %102 = tpu.matmul %101, %61, %cst_43 {dimension_numbers = #tpu.dot_dimension_numbers<[1], [0], [0], [1], [0, 0, 1, 1], [], []>} : vector<8x32xbf16>, vector<32x32xbf16>, vector<8x32xf32> -> vector<8x32xf32>
    %103 = vector.shape_cast %102 : vector<8x32xf32> to vector<1x8x32xf32>
    %104 = arith.truncf %103 : vector<1x8x32xf32> to vector<1x8x32xbf16>
    %105 = arith.truncf %76 : vector<1x8x8xf32> to vector<1x8x8xbf16>
    "tpu.trace_start"() <{level = 10 : i32, message = "bqk,bkd->bqd"}> : () -> ()
    %cst_44 = arith.constant dense<0.000000e+00> : vector<1x8x32xf32>
    %106 = tpu.matmul %105, %104, %cst_44 {dimension_numbers = #tpu.dot_dimension_numbers<[2], [1], [1], [2], [0, 0, 0, 1, 1, 2], [0], [0]>} : vector<1x8x8xbf16>, vector<1x8x32xbf16>, vector<1x8x32xf32> -> vector<1x8x32xf32>
    "tpu.trace_stop"() : () -> ()
    %107 = vector.shape_cast %106 : vector<1x8x32xf32> to vector<8x32xf32>
    %108 = arith.truncf %107 : vector<8x32xf32> to vector<8x32xbf16>
    %cst_45 = arith.constant dense<0.000000e+00> : vector<8x32xf32>
    %109 = tpu.matmul %108, %62, %cst_45 {dimension_numbers = #tpu.dot_dimension_numbers<[1], [0], [0], [1], [0, 0, 1, 1], [], []>} : vector<8x32xbf16>, vector<32x32xbf16>, vector<8x32xf32> -> vector<8x32xf32>
    %110 = arith.addf %59, %109 : vector<8x32xf32>
    %111 = vector.extract_strided_slice %2 {offsets = [2, 0], sizes = [1, 32], strides = [1, 1]} : vector<4x32xf32> to vector<1x32xf32>
    %112 = vector.extract_strided_slice %3 {offsets = [2, 0], sizes = [1, 32], strides = [1, 1]} : vector<4x32xf32> to vector<1x32xf32>
    %cst_46 = arith.constant dense<0.000000e+00> : vector<8xf32>
    %113 = vector.multi_reduction <add>, %110, %cst_46 [1] : vector<8x32xf32> to vector<8xf32>
    %114 = vector.shape_cast %113 : vector<8xf32> to vector<8x1xf32>
    %cst_47 = arith.constant 3.200000e+01 : f32
    %115 = vector.broadcast %cst_47 : f32 to vector<8x1xf32>
    %116 = arith.divf %114, %115 : vector<8x1xf32>
    %117 = vector.broadcast %116 : vector<8x1xf32> to vector<8x32xf32>
    %118 = arith.subf %110, %117 : vector<8x32xf32>
    %119 = arith.mulf %118, %118 : vector<8x32xf32>
    %cst_48 = arith.constant dense<0.000000e+00> : vector<8xf32>
    %120 = vector.multi_reduction <add>, %119, %cst_48 [1] : vector<8x32xf32> to vector<8xf32>
    %121 = vector.shape_cast %120 : vector<8xf32> to vector<8x1xf32>
    %cst_49 = arith.constant 3.200000e+01 : f32
    %122 = vector.broadcast %cst_49 : f32 to vector<8x1xf32>
    %123 = arith.divf %121, %122 : vector<8x1xf32>
    %124 = vector.broadcast %116 : vector<8x1xf32> to vector<8x32xf32>
    %125 = arith.subf %110, %124 : vector<8x32xf32>
    %cst_50 = arith.constant 9.99999974E-6 : f32
    %126 = vector.broadcast %cst_50 : f32 to vector<8x1xf32>
    %127 = arith.addf %123, %126 : vector<8x1xf32>
    %128 = math.rsqrt %127 : vector<8x1xf32>
    %129 = vector.broadcast %128 : vector<8x1xf32> to vector<8x32xf32>
    %130 = arith.mulf %125, %129 : vector<8x32xf32>
    %131 = vector.broadcast %111 : vector<1x32xf32> to vector<8x32xf32>
    %132 = arith.mulf %130, %131 : vector<8x32xf32>
    %133 = vector.broadcast %112 : vector<1x32xf32> to vector<8x32xf32>
    %134 = arith.addf %132, %133 : vector<8x32xf32>
    %135 = arith.truncf %134 : vector<8x32xf32> to vector<8x32xbf16>
    %c0_51 = arith.constant 0 : index
    %c0_52 = arith.constant 0 : index
    %136 = vector.load %arg11[%c0_51, %c0_52] : memref<32x32xbf16, #tpu.memory_space<vmem>>, vector<32x32xbf16>
    %cst_53 = arith.constant dense<0.000000e+00> : vector<8x32xf32>
    %137 = tpu.matmul %135, %136, %cst_53 {dimension_numbers = #tpu.dot_dimension_numbers<[1], [0], [0], [1], [0, 0, 1, 1], [], []>} : vector<8x32xbf16>, vector<32x32xbf16>, vector<8x32xf32> -> vector<8x32xf32>
    %c0_54 = arith.constant 0 : index
    %c0_55 = arith.constant 0 : index
    %138 = vector.load %arg12[%c0_54, %c0_55] : memref<32x32xbf16, #tpu.memory_space<vmem>>, vector<32x32xbf16>
    %cst_56 = arith.constant dense<0.000000e+00> : vector<8x32xf32>
    %139 = tpu.matmul %135, %138, %cst_56 {dimension_numbers = #tpu.dot_dimension_numbers<[1], [0], [0], [1], [0, 0, 1, 1], [], []>} : vector<8x32xbf16>, vector<32x32xbf16>, vector<8x32xf32> -> vector<8x32xf32>
    %c0_57 = arith.constant 0 : index
    %c0_58 = arith.constant 0 : index
    %140 = vector.load %arg13[%c0_57, %c0_58] : memref<32x32xbf16, #tpu.memory_space<vmem>>, vector<32x32xbf16>
    %cst_59 = arith.constant dense<0.000000e+00> : vector<8x32xf32>
    %141 = tpu.matmul %135, %140, %cst_59 {dimension_numbers = #tpu.dot_dimension_numbers<[1], [0], [0], [1], [0, 0, 1, 1], [], []>} : vector<8x32xbf16>, vector<32x32xbf16>, vector<8x32xf32> -> vector<8x32xf32>
    %cst_60 = arith.constant 0.176776692 : f32
    %142 = vector.broadcast %cst_60 : f32 to vector<8x32xf32>
    %143 = arith.mulf %137, %142 : vector<8x32xf32>
    %144 = vector.shape_cast %143 : vector<8x32xf32> to vector<1x8x32xf32>
    %145 = arith.truncf %144 : vector<1x8x32xf32> to vector<1x8x32xbf16>
    %146 = vector.shape_cast %139 : vector<8x32xf32> to vector<1x8x32xf32>
    %147 = arith.truncf %146 : vector<1x8x32xf32> to vector<1x8x32xbf16>
    %148 = vector.shape_cast %141 : vector<8x32xf32> to vector<1x8x32xf32>
    %149 = arith.truncf %148 : vector<1x8x32xf32> to vector<1x8x32xbf16>
    "tpu.trace_start"() <{level = 10 : i32, message = "bqd,bkd->bqk"}> : () -> ()
    %cst_61 = arith.constant dense<0.000000e+00> : vector<1x8x8xf32>
    %150 = tpu.matmul %145, %147, %cst_61 {dimension_numbers = #tpu.dot_dimension_numbers<[2], [2], [1], [1], [0, 0, 0, 1, 1, 1], [0], [0]>} : vector<1x8x32xbf16>, vector<1x8x32xbf16>, vector<1x8x8xf32> -> vector<1x8x8xf32>
    "tpu.trace_stop"() : () -> ()
    %151 = vector.broadcast %8 : vector<1x1x8xf32> to vector<1x8x8xf32>
    %152 = arith.addf %150, %151 : vector<1x8x8xf32>
    %cst_62 = arith.constant dense<0xFF800000> : vector<1x8xf32>
    %153 = vector.multi_reduction <maximumf>, %152, %cst_62 [2] : vector<1x8x8xf32> to vector<1x8xf32>
    %154 = vector.shape_cast %153 : vector<1x8xf32> to vector<1x8x1xf32>
    %155 = vector.broadcast %154 : vector<1x8x1xf32> to vector<1x8x8xf32>
    %156 = arith.subf %152, %155 : vector<1x8x8xf32>
    %157 = math.exp %156 : vector<1x8x8xf32>
    %cst_63 = arith.constant dense<0.000000e+00> : vector<1x8xf32>
    %158 = vector.multi_reduction <add>, %157, %cst_63 [2] : vector<1x8x8xf32> to vector<1x8xf32>
    %159 = vector.shape_cast %158 : vector<1x8xf32> to vector<1x8x1xf32>
    %160 = tpu.reciprocal %159 {approx = true} : vector<1x8x1xf32> -> vector<1x8x1xf32>
    %161 = vector.broadcast %160 : vector<1x8x1xf32> to vector<1x8x8xf32>
    %162 = arith.mulf %157, %161 : vector<1x8x8xf32>
    %163 = arith.truncf %162 : vector<1x8x8xf32> to vector<1x8x8xbf16>
    "tpu.trace_start"() <{level = 10 : i32, message = "bqk,bkd->bqd"}> : () -> ()
    %cst_64 = arith.constant dense<0.000000e+00> : vector<1x8x32xf32>
    %164 = tpu.matmul %163, %149, %cst_64 {dimension_numbers = #tpu.dot_dimension_numbers<[2], [1], [1], [2], [0, 0, 0, 1, 1, 2], [0], [0]>} : vector<1x8x8xbf16>, vector<1x8x32xbf16>, vector<1x8x32xf32> -> vector<1x8x32xf32>
    "tpu.trace_stop"() : () -> ()
    %165 = vector.shape_cast %164 : vector<1x8x32xf32> to vector<8x32xf32>
    %166 = arith.truncf %165 : vector<8x32xf32> to vector<8x32xbf16>
    %c0_65 = arith.constant 0 : index
    %c0_66 = arith.constant 0 : index
    %167 = vector.load %arg14[%c0_65, %c0_66] : memref<32x32xbf16, #tpu.memory_space<vmem>>, vector<32x32xbf16>
    %cst_67 = arith.constant dense<0.000000e+00> : vector<8x32xf32>
    %168 = tpu.matmul %166, %167, %cst_67 {dimension_numbers = #tpu.dot_dimension_numbers<[1], [0], [0], [1], [0, 0, 1, 1], [], []>} : vector<8x32xbf16>, vector<32x32xbf16>, vector<8x32xf32> -> vector<8x32xf32>
    %169 = arith.addf %110, %168 : vector<8x32xf32>
    %170 = vector.extract_strided_slice %2 {offsets = [3, 0], sizes = [1, 32], strides = [1, 1]} : vector<4x32xf32> to vector<1x32xf32>
    %171 = vector.extract_strided_slice %3 {offsets = [3, 0], sizes = [1, 32], strides = [1, 1]} : vector<4x32xf32> to vector<1x32xf32>
    %cst_68 = arith.constant dense<0.000000e+00> : vector<8xf32>
    %172 = vector.multi_reduction <add>, %169, %cst_68 [1] : vector<8x32xf32> to vector<8xf32>
    %173 = vector.shape_cast %172 : vector<8xf32> to vector<8x1xf32>
    %cst_69 = arith.constant 3.200000e+01 : f32
    %174 = vector.broadcast %cst_69 : f32 to vector<8x1xf32>
    %175 = arith.divf %173, %174 : vector<8x1xf32>
    %176 = vector.broadcast %175 : vector<8x1xf32> to vector<8x32xf32>
    %177 = arith.subf %169, %176 : vector<8x32xf32>
    %178 = arith.mulf %177, %177 : vector<8x32xf32>
    %cst_70 = arith.constant dense<0.000000e+00> : vector<8xf32>
    %179 = vector.multi_reduction <add>, %178, %cst_70 [1] : vector<8x32xf32> to vector<8xf32>
    %180 = vector.shape_cast %179 : vector<8xf32> to vector<8x1xf32>
    %cst_71 = arith.constant 3.200000e+01 : f32
    %181 = vector.broadcast %cst_71 : f32 to vector<8x1xf32>
    %182 = arith.divf %180, %181 : vector<8x1xf32>
    %183 = vector.broadcast %175 : vector<8x1xf32> to vector<8x32xf32>
    %184 = arith.subf %169, %183 : vector<8x32xf32>
    %cst_72 = arith.constant 9.99999974E-6 : f32
    %185 = vector.broadcast %cst_72 : f32 to vector<8x1xf32>
    %186 = arith.addf %182, %185 : vector<8x1xf32>
    %187 = math.rsqrt %186 : vector<8x1xf32>
    %188 = vector.broadcast %187 : vector<8x1xf32> to vector<8x32xf32>
    %189 = arith.mulf %184, %188 : vector<8x32xf32>
    %190 = vector.broadcast %170 : vector<1x32xf32> to vector<8x32xf32>
    %191 = arith.mulf %189, %190 : vector<8x32xf32>
    %192 = vector.broadcast %171 : vector<1x32xf32> to vector<8x32xf32>
    %193 = arith.addf %191, %192 : vector<8x32xf32>
    %194 = arith.truncf %193 : vector<8x32xf32> to vector<8x32xbf16>
    %c0_73 = arith.constant 0 : index
    %c0_74 = arith.constant 0 : index
    %195 = vector.load %arg15[%c0_73, %c0_74] : memref<32x64xbf16, #tpu.memory_space<vmem>>, vector<32x64xbf16>
    %cst_75 = arith.constant dense<0.000000e+00> : vector<8x64xf32>
    %196 = tpu.matmul %194, %195, %cst_75 {dimension_numbers = #tpu.dot_dimension_numbers<[1], [0], [0], [1], [0, 0, 1, 1], [], []>} : vector<8x32xbf16>, vector<32x64xbf16>, vector<8x64xf32> -> vector<8x64xf32>
    %c0_76 = arith.constant 0 : index
    %c0_77 = arith.constant 0 : index
    %197 = vector.load %arg16[%c0_76, %c0_77] : memref<1x64xf32, #tpu.memory_space<vmem>>, vector<1x64xf32>
    %198 = vector.broadcast %197 : vector<1x64xf32> to vector<8x64xf32>
    %199 = arith.addf %196, %198 : vector<8x64xf32>
    %cst_78 = arith.constant 0.000000e+00 : f32
    %200 = vector.broadcast %cst_78 : f32 to vector<8x64xf32>
    %201 = arith.maximumf %199, %200 : vector<8x64xf32>
    %202 = arith.truncf %201 : vector<8x64xf32> to vector<8x64xbf16>
    %c0_79 = arith.constant 0 : index
    %c0_80 = arith.constant 0 : index
    %203 = vector.load %arg17[%c0_79, %c0_80] : memref<64x32xbf16, #tpu.memory_space<vmem>>, vector<64x32xbf16>
    %cst_81 = arith.constant dense<0.000000e+00> : vector<8x32xf32>
    %204 = tpu.matmul %202, %203, %cst_81 {dimension_numbers = #tpu.dot_dimension_numbers<[1], [0], [0], [1], [0, 0, 1, 1], [], []>} : vector<8x64xbf16>, vector<64x32xbf16>, vector<8x32xf32> -> vector<8x32xf32>
    %c0_82 = arith.constant 0 : index
    %c0_83 = arith.constant 0 : index
    %205 = vector.load %arg18[%c0_82, %c0_83] : memref<1x32xf32, #tpu.memory_space<vmem>>, vector<1x32xf32>
    %206 = vector.broadcast %205 : vector<1x32xf32> to vector<8x32xf32>
    %207 = arith.addf %204, %206 : vector<8x32xf32>
    %208 = arith.addf %169, %207 : vector<8x32xf32>
    %c0_84 = arith.constant 0 : index
    %c0_85 = arith.constant 0 : index
    %209 = vector.load %arg19[%c0_84, %c0_85] : memref<8x32xf32, #tpu.memory_space<vmem>>, vector<8x32xf32>
    tpu.vector_store %arg19[%c0_84, %c0_85], %208 {strides = array<i32>} : memref<8x32xf32, #tpu.memory_space<vmem>>, vector<8x32xf32>,
    return
  }
  func.func @transform_0(%arg0: i32) -> (i32, i32) {
    %c0_i32 = arith.constant 0 : i32
    %c0_i32_0 = arith.constant 0 : i32
    return %arg0, %c0_i32 : i32, i32
  }
  func.func @transform_1(%arg0: i32) -> (i32, i32, i32) {
    %c0_i32 = arith.constant 0 : i32
    %c0_i32_0 = arith.constant 0 : i32
    %c0_i32_1 = arith.constant 0 : i32
    return %arg0, %c0_i32, %c0_i32_0 : i32, i32, i32
  }
  func.func @transform_2(%arg0: i32) -> (i32, i32, i32) {
    %c0_i32 = arith.constant 0 : i32
    %c0_i32_0 = arith.constant 0 : i32
    %c0_i32_1 = arith.constant 0 : i32
    return %arg0, %c0_i32, %c0_i32_0 : i32, i32, i32
  }
  func.func @transform_3(%arg0: i32) -> (i32, i32, i32) {
    %c0_i32 = arith.constant 0 : i32
    %c0_i32_0 = arith.constant 0 : i32
    %c0_i32_1 = arith.constant 0 : i32
    return %arg0, %c0_i32, %c0_i32_0 : i32, i32, i32
  }
  func.func @transform_4(%arg0: i32) -> (i32, i32) {
    %c0_i32 = arith.constant 0 : i32
    %c0_i32_0 = arith.constant 0 : i32
    %c0_i32_1 = arith.constant 0 : i32
    return %c0_i32, %c0_i32_0 : i32, i32
  }
  func.func @transform_5(%arg0: i32) -> (i32, i32) {
    %c0_i32 = arith.constant 0 : i32
    %c0_i32_0 = arith.constant 0 : i32
    %c0_i32_1 = arith.constant 0 : i32
    return %c0_i32, %c0_i32_0 : i32, i32
  }
  func.func @transform_6(%arg0: i32) -> (i32, i32) {
    %c0_i32 = arith.constant 0 : i32
    %c0_i32_0 = arith.constant 0 : i32
    %c0_i32_1 = arith.constant 0 : i32
    return %c0_i32, %c0_i32_0 : i32, i32
  }
  func.func @transform_7(%arg0: i32) -> (i32, i32) {
    %c0_i32 = arith.constant 0 : i32
    %c0_i32_0 = arith.constant 0 : i32
    %c0_i32_1 = arith.constant 0 : i32
    return %c0_i32, %c0_i32_0 : i32, i32
  }
  func.func @transform_8(%arg0: i32) -> (i32, i32) {
    %c0_i32 = arith.constant 0 : i32
    %c0_i32_0 = arith.constant 0 : i32
    %c0_i32_1 = arith.constant 0 : i32
    return %c0_i32, %c0_i32_0 : i32, i32
  }
  func.func @transform_9(%arg0: i32) -> (i32, i32) {
    %c0_i32 = arith.constant 0 : i32
    %c0_i32_0 = arith.constant 0 : i32
    %c0_i32_1 = arith.constant 0 : i32
    return %c0_i32, %c0_i32_0 : i32, i32
  }
  func.func @transform_10(%arg0: i32) -> (i32, i32) {
    %c0_i32 = arith.constant 0 : i32
    %c0_i32_0 = arith.constant 0 : i32
    %c0_i32_1 = arith.constant 0 : i32
    return %c0_i32, %c0_i32_0 : i32, i32
  }
  func.func @transform_11(%arg0: i32) -> (i32, i32) {
    %c0_i32 = arith.constant 0 : i32
    %c0_i32_0 = arith.constant 0 : i32
    %c0_i32_1 = arith.constant 0 : i32
    return %c0_i32, %c0_i32_0 : i32, i32
  }
  func.func @transform_12(%arg0: i32) -> (i32, i32) {
    %c0_i32 = arith.constant 0 : i32
    %c0_i32_0 = arith.constant 0 : i32
    %c0_i32_1 = arith.constant 0 : i32
    return %c0_i32, %c0_i32_0 : i32, i32
  }
  func.func @transform_13(%arg0: i32) -> (i32, i32) {
    %c0_i32 = arith.constant 0 : i32
    %c0_i32_0 = arith.constant 0 : i32
    %c0_i32_1 = arith.constant 0 : i32
    return %c0_i32, %c0_i32_0 : i32, i32
  }
  func.func @transform_14(%arg0: i32) -> (i32, i32) {
    %c0_i32 = arith.constant 0 : i32
    %c0_i32_0 = arith.constant 0 : i32
    %c0_i32_1 = arith.constant 0 : i32
    return %c0_i32, %c0_i32_0 : i32, i32
  }
  func.func @transform_15(%arg0: i32) -> (i32, i32) {
    %c0_i32 = arith.constant 0 : i32
    %c0_i32_0 = arith.constant 0 : i32
    %c0_i32_1 = arith.constant 0 : i32
    return %c0_i32, %c0_i32_0 : i32, i32
  }
  func.func @transform_16(%arg0: i32) -> (i32, i32) {
    %c0_i32 = arith.constant 0 : i32
    %c0_i32_0 = arith.constant 0 : i32
    %c0_i32_1 = arith.constant 0 : i32
    return %c0_i32, %c0_i32_0 : i32, i32
  }
  func.func @transform_17(%arg0: i32) -> (i32, i32) {
    %c0_i32 = arith.constant 0 : i32
    %c0_i32_0 = arith.constant 0 : i32
    %c0_i32_1 = arith.constant 0 : i32
    return %c0_i32, %c0_i32_0 : i32, i32
  }
  func.func @transform_18(%arg0: i32) -> (i32, i32) {
    %c0_i32 = arith.constant 0 : i32
    %c0_i32_0 = arith.constant 0 : i32
    return %arg0, %c0_i32 : i32, i32
  }
}

module attributes {stable_mosaic.version = 11 : i64} {
  func.func @attending_layer_kernel(%arg0: i32, %arg1: memref<8x32xf32, #tpu.memory_space<vmem>>, %arg2: memref<1x8x8xf32, #tpu.memory_space<vmem>>, %arg3: memref<1x8x8xf32, #tpu.memory_space<vmem>>, %arg4: memref<1x1x8xf32, #tpu.memory_space<vmem>>, %arg5: memref<4x32xf32, #tpu.memory_space<vmem>>, %arg6: memref<4x32xf32, #tpu.memory_space<vmem>>, %arg7: memref<32x32xbf16, #tpu.memory_space<vmem>>, %arg8: memref<32x32xbf16, #tpu.memory_space<vmem>>, %arg9: memref<32x32xbf16, #tpu.memory_space<vmem>>, %arg10: memref<32x32xbf16, #tpu.memory_space<vmem>>, %arg11: memref<32x32xbf16, #tpu.memory_space<vmem>>, %arg12: memref<32x32xbf16, #tpu.memory_space<vmem>>, %arg13: memref<32x32xbf16, #tpu.memory_space<vmem>>, %arg14: memref<32x32xbf16, #tpu.memory_space<vmem>>, %arg15: memref<32x64xbf16, #tpu.memory_space<vmem>>, %arg16: memref<1x64xf32, #tpu.memory_space<vmem>>, %arg17: memref<64x32xbf16, #tpu.memory_space<vmem>>, %arg18: memref<1x32xf32, #tpu.memory_space<vmem>>, %arg19: memref<8x32xf32, #tpu.memory_space<vmem>>) attributes {dimension_semantics = [#tpu.dimension_semantics<parallel>], iteration_bounds = array<i64: 2>, scalar_prefetch = 0 : i64, scratch_operands = 0 : i64, tpu.core_type = #tpu.core_type<tc>, window_params = [{transform_indices = @transform_0, window_bounds = array<i64: 8, 32>}, {transform_indices = @transform_1, window_bounds = array<i64: 1, 8, 8>}, {transform_indices = @transform_2, window_bounds = array<i64: 1, 8, 8>}, {transform_indices = @transform_3, window_bounds = array<i64: 1, 1, 8>}, {pipeline_mode = #tpu.pipeline_mode<synchronous>, transform_indices = @transform_4, window_bounds = array<i64: 4, 32>}, {pipeline_mode = #tpu.pipeline_mode<synchronous>, transform_indices = @transform_5, window_bounds = array<i64: 4, 32>}, {pipeline_mode = #tpu.pipeline_mode<synchronous>, transform_indices = @transform_6, window_bounds = array<i64: 32, 32>}, {pipeline_mode = #tpu.pipeline_mode<synchronous>, transform_indices = @transform_7, window_bounds = array<i64: 32, 32>}, {pipeline_mode = #tpu.pipeline_mode<synchronous>, transform_indices = @transform_8, window_bounds = array<i64: 32, 32>}, {pipeline_mode = #tpu.pipeline_mode<synchronous>, transform_indices = @transform_9, window_bounds = array<i64: 32, 32>}, {pipeline_mode = #tpu.pipeline_mode<synchronous>, transform_indices = @transform_10, window_bounds = array<i64: 32, 32>}, {pipeline_mode = #tpu.pipeline_mode<synchronous>, transform_indices = @transform_11, window_bounds = array<i64: 32, 32>}, {pipeline_mode = #tpu.pipeline_mode<synchronous>, transform_indices = @transform_12, window_bounds = array<i64: 32, 32>}, {pipeline_mode = #tpu.pipeline_mode<synchronous>, transform_indices = @transform_13, window_bounds = array<i64: 32, 32>}, {pipeline_mode = #tpu.pipeline_mode<synchronous>, transform_indices = @transform_14, window_bounds = array<i64: 32, 64>}, {pipeline_mode = #tpu.pipeline_mode<synchronous>, transform_indices = @transform_15, window_bounds = array<i64: 1, 64>}, {pipeline_mode = #tpu.pipeline_mode<synchronous>, transform_indices = @transform_16, window_bounds = array<i64: 64, 32>}, {pipeline_mode = #tpu.pipeline_mode<synchronous>, transform_indices = @transform_17, window_bounds = array<i64: 1, 32>}, {transform_indices = @transform_18, window_bounds = array<i64: 8, 32>}]} {
    %c0 = arith.constant 0 : index
    %c0_0 = arith.constant 0 : index
    %0 = vector.load %arg1[%c0, %c0_0] : memref<8x32xf32, #tpu.memory_space<vmem>>, vector<8x32xf32>
    %c0_1 = arith.constant 0 : index
    %c0_2 = arith.constant 0 : index
    %c0_3 = arith.constant 0 : index
    %1 = vector.load %arg4[%c0_1, %c0_2, %c0_3] : memref<1x1x8xf32, #tpu.memory_space<vmem>>, vector<1x1x8xf32>
    %c0_4 = arith.constant 0 : index
    %c0_5 = arith.constant 0 : index
    %2 = vector.load %arg5[%c0_4, %c0_5] : memref<4x32xf32, #tpu.memory_space<vmem>>, vector<4x32xf32>
    %c0_6 = arith.constant 0 : index
    %c0_7 = arith.constant 0 : index
    %3 = vector.load %arg6[%c0_6, %c0_7] : memref<4x32xf32, #tpu.memory_space<vmem>>, vector<4x32xf32>
    %cst = arith.constant 0.000000e+00 : f32
    %4 = vector.broadcast %cst : f32 to vector<1x1x8xf32>
    %5 = arith.cmpf ogt, %1, %4 : vector<1x1x8xf32>
    %cst_8 = arith.constant 0.000000e+00 : f32
    %cst_9 = arith.constant -1.000000e+09 : f32
    %6 = vector.broadcast %cst_8 : f32 to vector<1x1x8xf32>
    %7 = vector.broadcast %cst_9 : f32 to vector<1x1x8xf32>
    %8 = arith.select %5, %6, %7 : vector<1x1x8xi1>, vector<1x1x8xf32>
    %c0_10 = arith.constant 0 : index
    %c0_11 = arith.constant 0 : index
    %c0_12 = arith.constant 0 : index
    %9 = vector.load %arg2[%c0_10, %c0_11, %c0_12] : memref<1x8x8xf32, #tpu.memory_space<vmem>>, vector<1x8x8xf32>
    %c0_13 = arith.constant 0 : index
    %c0_14 = arith.constant 0 : index
    %10 = vector.load %arg7[%c0_13, %c0_14] : memref<32x32xbf16, #tpu.memory_space<vmem>>, vector<32x32xbf16>
    %c0_15 = arith.constant 0 : index
    %c0_16 = arith.constant 0 : index
    %11 = vector.load %arg8[%c0_15, %c0_16] : memref<32x32xbf16, #tpu.memory_space<vmem>>, vector<32x32xbf16>
    %cst_17 = arith.constant 0.000000e+00 : f32
    %12 = vector.broadcast %cst_17 : f32 to vector<1x8x8xf32>
    %13 = arith.subf %12, %9 : vector<1x8x8xf32>
    %14 = vector.broadcast %8 : vector<1x1x8xf32> to vector<1x8x8xf32>
    %15 = arith.addf %13, %14 : vector<1x8x8xf32>
    %cst_18 = arith.constant dense<0xFF800000> : vector<1x8xf32>
    %16 = vector.multi_reduction <maximumf>, %15, %cst_18 [2] : vector<1x8x8xf32> to vector<1x8xf32>
    %17 = vector.shape_cast %16 : vector<1x8xf32> to vector<1x8x1xf32>
    %18 = vector.broadcast %17 : vector<1x8x1xf32> to vector<1x8x8xf32>
    %19 = arith.subf %15, %18 : vector<1x8x8xf32>
    %20 = math.exp %19 : vector<1x8x8xf32>
    %cst_19 = arith.constant dense<0.000000e+00> : vector<1x8xf32>
    %21 = vector.multi_reduction <add>, %20, %cst_19 [2] : vector<1x8x8xf32> to vector<1x8xf32>
    %22 = vector.shape_cast %21 : vector<1x8xf32> to vector<1x8x1xf32>
    %23 = tpu.reciprocal %22 {approx = true} : vector<1x8x1xf32> -> vector<1x8x1xf32>
    %24 = vector.broadcast %23 : vector<1x8x1xf32> to vector<1x8x8xf32>
    %25 = arith.mulf %20, %24 : vector<1x8x8xf32>
    %26 = vector.extract_strided_slice %2 {offsets = [0, 0], sizes = [1, 32], strides = [1, 1]} : vector<4x32xf32> to vector<1x32xf32>
    %27 = vector.extract_strided_slice %3 {offsets = [0, 0], sizes = [1, 32], strides = [1, 1]} : vector<4x32xf32> to vector<1x32xf32>
    %cst_20 = arith.constant dense<0.000000e+00> : vector<8xf32>
    %28 = vector.multi_reduction <add>, %0, %cst_20 [1] : vector<8x32xf32> to vector<8xf32>
    %29 = vector.shape_cast %28 : vector<8xf32> to vector<8x1xf32>
    %cst_21 = arith.constant 3.200000e+01 : f32
    %30 = vector.broadcast %cst_21 : f32 to vector<8x1xf32>
    %31 = arith.divf %29, %30 : vector<8x1xf32>
    %32 = vector.broadcast %31 : vector<8x1xf32> to vector<8x32xf32>
    %33 = arith.subf %0, %32 : vector<8x32xf32>
    %34 = arith.mulf %33, %33 : vector<8x32xf32>
    %cst_22 = arith.constant dense<0.000000e+00> : vector<8xf32>
    %35 = vector.multi_reduction <add>, %34, %cst_22 [1] : vector<8x32xf32> to vector<8xf32>
    %36 = vector.shape_cast %35 : vector<8xf32> to vector<8x1xf32>
    %cst_23 = arith.constant 3.200000e+01 : f32
    %37 = vector.broadcast %cst_23 : f32 to vector<8x1xf32>
    %38 = arith.divf %36, %37 : vector<8x1xf32>
    %39 = vector.broadcast %31 : vector<8x1xf32> to vector<8x32xf32>
    %40 = arith.subf %0, %39 : vector<8x32xf32>
    %cst_24 = arith.constant 9.99999974E-6 : f32
    %41 = vector.broadcast %cst_24 : f32 to vector<8x1xf32>
    %42 = arith.addf %38, %41 : vector<8x1xf32>
    %43 = math.rsqrt %42 : vector<8x1xf32>
    %44 = vector.broadcast %43 : vector<8x1xf32> to vector<8x32xf32>
    %45 = arith.mulf %40, %44 : vector<8x32xf32>
    %46 = vector.broadcast %26 : vector<1x32xf32> to vector<8x32xf32>
    %47 = arith.mulf %45, %46 : vector<8x32xf32>
    %48 = vector.broadcast %27 : vector<1x32xf32> to vector<8x32xf32>
    %49 = arith.addf %47, %48 : vector<8x32xf32>
    %50 = arith.truncf %49 : vector<8x32xf32> to vector<8x32xbf16>
    %cst_25 = arith.constant dense<0.000000e+00> : vector<8x32xf32>
    %51 = tpu.matmul %50, %10, %cst_25 {dimension_numbers = #tpu.dot_dimension_numbers<[1], [0], [0], [1], [0, 0, 1, 1], [], []>} : vector<8x32xbf16>, vector<32x32xbf16>, vector<8x32xf32> -> vector<8x32xf32>
    %52 = vector.shape_cast %51 : vector<8x32xf32> to vector<1x8x32xf32>
    %53 = arith.truncf %52 : vector<1x8x32xf32> to vector<1x8x32xbf16>
    %54 = arith.truncf %25 : vector<1x8x8xf32> to vector<1x8x8xbf16>
    "tpu.trace_start"() <{level = 10 : i32, message = "bqk,bkd->bqd"}> : () -> ()
    %cst_26 = arith.constant dense<0.000000e+00> : vector<1x8x32xf32>
    %55 = tpu.matmul %54, %53, %cst_26 {dimension_numbers = #tpu.dot_dimension_numbers<[2], [1], [1], [2], [0, 0, 0, 1, 1, 2], [0], [0]>} : vector<1x8x8xbf16>, vector<1x8x32xbf16>, vector<1x8x32xf32> -> vector<1x8x32xf32>
    "tpu.trace_stop"() : () -> ()
    %56 = vector.shape_cast %55 : vector<1x8x32xf32> to vector<8x32xf32>
    %57 = arith.truncf %56 : vector<8x32xf32> to vector<8x32xbf16>
    %cst_27 = arith.constant dense<0.000000e+00> : vector<8x32xf32>
    %58 = tpu.matmul %57, %11, %cst_27 {dimension_numbers = #tpu.dot_dimension_numbers<[1], [0], [0], [1], [0, 0, 1, 1], [], []>} : vector<8x32xbf16>, vector<32x32xbf16>, vector<8x32xf32> -> vector<8x32xf32>
    %59 = arith.addf %0, %58 : vector<8x32xf32>
    %c0_28 = arith.constant 0 : index
    %c0_29 = arith.constant 0 : index
    %c0_30 = arith.constant 0 : index
    %60 = vector.load %arg3[%c0_28, %c0_29, %c0_30] : memref<1x8x8xf32, #tpu.memory_space<vmem>>, vector<1x8x8xf32>
    %c0_31 = arith.constant 0 : index
    %c0_32 = arith.constant 0 : index
    %61 = vector.load %arg9[%c0_31, %c0_32] : memref<32x32xbf16, #tpu.memory_space<vmem>>, vector<32x32xbf16>
    %c0_33 = arith.constant 0 : index
    %c0_34 = arith.constant 0 : index
    %62 = vector.load %arg10[%c0_33, %c0_34] : memref<32x32xbf16, #tpu.memory_space<vmem>>, vector<32x32xbf16>
    %cst_35 = arith.constant 0.000000e+00 : f32
    %63 = vector.broadcast %cst_35 : f32 to vector<1x8x8xf32>
    %64 = arith.subf %63, %60 : vector<1x8x8xf32>
    %65 = vector.broadcast %8 : vector<1x1x8xf32> to vector<1x8x8xf32>
    %66 = arith.addf %64, %65 : vector<1x8x8xf32>
    %cst_36 = arith.constant dense<0xFF800000> : vector<1x8xf32>
    %67 = vector.multi_reduction <maximumf>, %66, %cst_36 [2] : vector<1x8x8xf32> to vector<1x8xf32>
    %68 = vector.shape_cast %67 : vector<1x8xf32> to vector<1x8x1xf32>
    %69 = vector.broadcast %68 : vector<1x8x1xf32> to vector<1x8x8xf32>
    %70 = arith.subf %66, %69 : vector<1x8x8xf32>
    %71 = math.exp %70 : vector<1x8x8xf32>
    %cst_37 = arith.constant dense<0.000000e+00> : vector<1x8xf32>
    %72 = vector.multi_reduction <add>, %71, %cst_37 [2] : vector<1x8x8xf32> to vector<1x8xf32>
    %73 = vector.shape_cast %72 : vector<1x8xf32> to vector<1x8x1xf32>
    %74 = tpu.reciprocal %73 {approx = true} : vector<1x8x1xf32> -> vector<1x8x1xf32>
    %75 = vector.broadcast %74 : vector<1x8x1xf32> to vector<1x8x8xf32>
    %76 = arith.mulf %71, %75 : vector<1x8x8xf32>
    %77 = vector.extract_strided_slice %2 {offsets = [1, 0], sizes = [1, 32], strides = [1, 1]} : vector<4x32xf32> to vector<1x32xf32>
    %78 = vector.extract_strided_slice %3 {offsets = [1, 0], sizes = [1, 32], strides = [1, 1]} : vector<4x32xf32> to vector<1x32xf32>
    %cst_38 = arith.constant dense<0.000000e+00> : vector<8xf32>
    %79 = vector.multi_reduction <add>, %59, %cst_38 [1] : vector<8x32xf32> to vector<8xf32>
    %80 = vector.shape_cast %79 : vector<8xf32> to vector<8x1xf32>
    %cst_39 = arith.constant 3.200000e+01 : f32
    %81 = vector.broadcast %cst_39 : f32 to vector<8x1xf32>
    %82 = arith.divf %80, %81 : vector<8x1xf32>
    %83 = vector.broadcast %82 : vector<8x1xf32> to vector<8x32xf32>
    %84 = arith.subf %59, %83 : vector<8x32xf32>
    %85 = arith.mulf %84, %84 : vector<8x32xf32>
    %cst_40 = arith.constant dense<0.000000e+00> : vector<8xf32>
    %86 = vector.multi_reduction <add>, %85, %cst_40 [1] : vector<8x32xf32> to vector<8xf32>
    %87 = vector.shape_cast %86 : vector<8xf32> to vector<8x1xf32>
    %cst_41 = arith.constant 3.200000e+01 : f32
    %88 = vector.broadcast %cst_41 : f32 to vector<8x1xf32>
    %89 = arith.divf %87, %88 : vector<8x1xf32>
    %90 = vector.broadcast %82 : vector<8x1xf32> to vector<8x32xf32>
    %91 = arith.subf %59, %90 : vector<8x32xf32>
    %cst_42 = arith.constant 9.99999974E-6 : f32
    %92 = vector.broadcast %cst_42 : f32 to vector<8x1xf32>
    %93 = arith.addf %89, %92 : vector<8x1xf32>
    %94 = math.rsqrt %93 : vector<8x1xf32>
    %95 = vector.broadcast %94 : vector<8x1xf32> to vector<8x32xf32>
    %96 = arith.mulf %91, %95 : vector<8x32xf32>
    %97 = vector.broadcast %77 : vector<1x32xf32> to vector<8x32xf32>
    %98 = arith.mulf %96, %97 : vector<8x32xf32>
    %99 = vector.broadcast %78 : vector<1x32xf32> to vector<8x32xf32>
    %100 = arith.addf %98, %99 : vector<8x32xf32>
    %101 = arith.truncf %100 : vector<8x32xf32> to vector<8x32xbf16>
    %cst_43 = arith.constant dense<0.000000e+00> : vector<8x32xf32>
    %102 = tpu.matmul %101, %61, %cst_43 {dimension_numbers = #tpu.dot_dimension_numbers<[1], [0], [0], [1], [0, 0, 1, 1], [], []>} : vector<8x32xbf16>, vector<32x32xbf16>, vector<8x32xf32> -> vector<8x32xf32>
    %103 = vector.shape_cast %102 : vector<8x32xf32> to vector<1x8x32xf32>
    %104 = arith.truncf %103 : vector<1x8x32xf32> to vector<1x8x32xbf16>
    %105 = arith.truncf %76 : vector<1x8x8xf32> to vector<1x8x8xbf16>
    "tpu.trace_start"() <{level = 10 : i32, message = "bqk,bkd->bqd"}> : () -> ()
    %cst_44 = arith.constant dense<0.000000e+00> : vector<1x8x32xf32>
    %106 = tpu.matmul %105, %104, %cst_44 {dimension_numbers = #tpu.dot_dimension_numbers<[2], [1], [1], [2], [0, 0, 0, 1, 1, 2], [0], [0]>} : vector<1x8x8xbf16>, vector<1x8x32xbf16>, vector<1x8x32xf32> -> vector<1x8x32xf32>
    "tpu.trace_stop"() : () -> ()
    %107 = vector.shape_cast %106 : vector<1x8x32xf32> to vector<8x32xf32>
    %108 = arith.truncf %107 : vector<8x32xf32> to vector<8x32xbf16>
    %cst_45 = arith.constant dense<0.000000e+00> : vector<8x32xf32>
    %109 = tpu.matmul %108, %62, %cst_45 {dimension_numbers = #tpu.dot_dimension_numbers<[1], [0], [0], [1], [0, 0, 1, 1], [], []>} : vector<8x32xbf16>, vector<32x32xbf16>, vector<8x32xf32> -> vector<8x32xf32>
    %110 = arith.addf %59, %109 : vector<8x32xf32>
    %111 = vector.extract_strided_slice %2 {offsets = [2, 0], sizes = [1, 32], strides = [1, 1]} : vector<4x32xf32> to vector<1x32xf32>
    %112 = vector.extract_strided_slice %3 {offsets = [2, 0], sizes = [1, 32], strides = [1, 1]} : vector<4x32xf32> to vector<1x32xf32>
    %cst_46 = arith.constant dense<0.000000e+00> : vector<8xf32>
    %113 = vector.multi_reduction <add>, %110, %cst_46 [1] : vector<8x32xf32> to vector<8xf32>
    %114 = vector.shape_cast %113 : vector<8xf32> to vector<8x1xf32>
    %cst_47 = arith.constant 3.200000e+01 : f32
    %115 = vector.broadcast %cst_47 : f32 to vector<8x1xf32>
    %116 = arith.divf %114, %115 : vector<8x1xf32>
    %117 = vector.broadcast %116 : vector<8x1xf32> to vector<8x32xf32>
    %118 = arith.subf %110, %117 : vector<8x32xf32>
    %119 = arith.mulf %118, %118 : vector<8x32xf32>
    %cst_48 = arith.constant dense<0.000000e+00> : vector<8xf32>
    %120 = vector.multi_reduction <add>, %119, %cst_48 [1] : vector<8x32xf32> to vector<8xf32>
    %121 = vector.shape_cast %120 : vector<8xf32> to vector<8x1xf32>
    %cst_49 = arith.constant 3.200000e+01 : f32
    %122 = vector.broadcast %cst_49 : f32 to vector<8x1xf32>
    %123 = arith.divf %121, %122 : vector<8x1xf32>
    %124 = vector.broadcast %116 : vector<8x1xf32> to vector<8x32xf32>
    %125 = arith.subf %110, %124 : vector<8x32xf32>
    %cst_50 = arith.constant 9.99999974E-6 : f32
    %126 = vector.broadcast %cst_50 : f32 to vector<8x1xf32>
    %127 = arith.addf %123, %126 : vector<8x1xf32>
    %128 = math.rsqrt %127 : vector<8x1xf32>
    %129 = vector.broadcast %128 : vector<8x1xf32> to vector<8x32xf32>
    %130 = arith.mulf %125, %129 : vector<8x32xf32>
    %131 = vector.broadcast %111 : vector<1x32xf32> to vector<8x32xf32>
    %132 = arith.mulf %130, %131 : vector<8x32xf32>
    %133 = vector.broadcast %112 : vector<1x32xf32> to vector<8x32xf32>
    %134 = arith.addf %132, %133 : vector<8x32xf32>
    %135 = arith.truncf %134 : vector<8x32xf32> to vector<8x32xbf16>
    %c0_51 = arith.constant 0 : index
    %c0_52 = arith.constant 0 : index
    %136 = vector.load %arg11[%c0_51, %c0_52] : memref<32x32xbf16, #tpu.memory_space<vmem>>, vector<32x32xbf16>
    %cst_53 = arith.constant dense<0.000000e+00> : vector<8x32xf32>
    %137 = tpu.matmul %135, %136, %cst_53 {dimension_numbers = #tpu.dot_dimension_numbers<[1], [0], [0], [1], [0, 0, 1, 1], [], []>} : vector<8x32xbf16>, vector<32x32xbf16>, vector<8x32xf32> -> vector<8x32xf32>
    %c0_54 = arith.constant 0 : index
    %c0_55 = arith.constant 0 : index
    %138 = vector.load %arg12[%c0_54, %c0_55] : memref<32x32xbf16, #tpu.memory_space<vmem>>, vector<32x32xbf16>
    %cst_56 = arith.constant dense<0.000000e+00> : vector<8x32xf32>
    %139 = tpu.matmul %135, %138, %cst_56 {dimension_numbers = #tpu.dot_dimension_numbers<[1], [0], [0], [1], [0, 0, 1, 1], [], []>} : vector<8x32xbf16>, vector<32x32xbf16>, vector<8x32xf32> -> vector<8x32xf32>
    %c0_57 = arith.constant 0 : index
    %c0_58 = arith.constant 0 : index
    %140 = vector.load %arg13[%c0_57, %c0_58] : memref<32x32xbf16, #tpu.memory_space<vmem>>, vector<32x32xbf16>
    %cst_59 = arith.constant dense<0.000000e+00> : vector<8x32xf32>
    %141 = tpu.matmul %135, %140, %cst_59 {dimension_numbers = #tpu.dot_dimension_numbers<[1], [0], [0], [1], [0, 0, 1, 1], [], []>} : vector<8x32xbf16>, vector<32x32xbf16>, vector<8x32xf32> -> vector<8x32xf32>
    %cst_60 = arith.constant 0.176776692 : f32
    %142 = vector.broadcast %cst_60 : f32 to vector<8x32xf32>
    %143 = arith.mulf %137, %142 : vector<8x32xf32>
    %144 = vector.shape_cast %143 : vector<8x32xf32> to vector<1x8x32xf32>
    %145 = arith.truncf %144 : vector<1x8x32xf32> to vector<1x8x32xbf16>
    %146 = vector.shape_cast %139 : vector<8x32xf32> to vector<1x8x32xf32>
    %147 = arith.truncf %146 : vector<1x8x32xf32> to vector<1x8x32xbf16>
    %148 = vector.shape_cast %141 : vector<8x32xf32> to vector<1x8x32xf32>
    %149 = arith.truncf %148 : vector<1x8x32xf32> to vector<1x8x32xbf16>
    "tpu.trace_start"() <{level = 10 : i32, message = "bqd,bkd->bqk"}> : () -> ()
    %cst_61 = arith.constant dense<0.000000e+00> : vector<1x8x8xf32>
    %150 = tpu.matmul %145, %147, %cst_61 {dimension_numbers = #tpu.dot_dimension_numbers<[2], [2], [1], [1], [0, 0, 0, 1, 1, 1], [0], [0]>} : vector<1x8x32xbf16>, vector<1x8x32xbf16>, vector<1x8x8xf32> -> vector<1x8x8xf32>
    "tpu.trace_stop"() : () -> ()
    %151 = vector.broadcast %8 : vector<1x1x8xf32> to vector<1x8x8xf32>
    %152 = arith.addf %150, %151 : vector<1x8x8xf32>
    %cst_62 = arith.constant dense<0xFF800000> : vector<1x8xf32>
    %153 = vector.multi_reduction <maximumf>, %152, %cst_62 [2] : vector<1x8x8xf32> to vector<1x8xf32>
    %154 = vector.shape_cast %153 : vector<1x8xf32> to vector<1x8x1xf32>
    %155 = vector.broadcast %154 : vector<1x8x1xf32> to vector<1x8x8xf32>
    %156 = arith.subf %152, %155 : vector<1x8x8xf32>
    %157 = math.exp %156 : vector<1x8x8xf32>
    %cst_63 = arith.constant dense<0.000000e+00> : vector<1x8xf32>
    %158 = vector.multi_reduction <add>, %157, %cst_63 [2] : vector<1x8x8xf32> to vector<1x8xf32>
    %159 = vector.shape_cast %158 : vector<1x8xf32> to vector<1x8x1xf32>
    %160 = tpu.reciprocal %159 {approx = true} : vector<1x8x1xf32> -> vector<1x8x1xf32>
    %161 = vector.broadcast %160 : vector<1x8x1xf32> to vector<1x8x8xf32>
    %162 = arith.mulf %157, %161 : vector<1x8x8xf32>
    %163 = arith.truncf %162 : vector<1x8x8xf32> to vector<1x8x8xbf16>
    "tpu.trace_start"() <{level = 10 : i32, message = "bqk,bkd->bqd"}> : () -> ()
    %cst_64 = arith.constant dense<0.000000e+00> : vector<1x8x32xf32>
    %164 = tpu.matmul %163, %149, %cst_64 {dimension_numbers = #tpu.dot_dimension_numbers<[2], [1], [1], [2], [0, 0, 0, 1, 1, 2], [0], [0]>} : vector<1x8x8xbf16>, vector<1x8x32xbf16>, vector<1x8x32xf32> -> vector<1x8x32xf32>
    "tpu.trace_stop"() : () -> ()
    %165 = vector.shape_cast %164 : vector<1x8x32xf32> to vector<8x32xf32>
    %166 = arith.truncf %165 : vector<8x32xf32> to vector<8x32xbf16>
    %c0_65 = arith.constant 0 : index
    %c0_66 = arith.constant 0 : index
    %167 = vector.load %arg14[%c0_65, %c0_66] : memref<32x32xbf16, #tpu.memory_space<vmem>>, vector<32x32xbf16>
    %cst_67 = arith.constant dense<0.000000e+00> : vector<8x32xf32>
    %168 = tpu.matmul %166, %167, %cst_67 {dimension_numbers = #tpu.dot_dimension_numbers<[1], [0], [0], [1], [0, 0, 1, 1], [], []>} : vector<8x32xbf16>, vector<32x32xbf16>, vector<8x32xf32> -> vector<8x32xf32>
    %169 = arith.addf %110, %168 : vector<8x32xf32>
    %170 = vector.extract_strided_slice %2 {offsets = [3, 0], sizes = [1, 32], strides = [1, 1]} : vector<4x32xf32> to vector<1x32xf32>
    %171 = vector.extract_strided_slice %3 {offsets = [3, 0], sizes = [1, 32], strides = [1, 1]} : vector<4x32xf32> to vector<1x32xf32>
    %cst_68 = arith.constant dense<0.000000e+00> : vector<8xf32>
    %172 = vector.multi_reduction <add>, %169, %cst_68 [1] : vector<8x32xf32> to vector<8xf32>
    %173 = vector.shape_cast %172 : vector<8xf32> to vector<8x1xf32>
    %cst_69 = arith.constant 3.200000e+01 : f32
    %174 = vector.broadcast %cst_69 : f32 to vector<8x1xf32>
    %175 = arith.divf %173, %174 : vector<8x1xf32>
    %176 = vector.broadcast %175 : vector<8x1xf32> to vector<8x32xf32>
    %177 = arith.subf %169, %176 : vector<8x32xf32>
    %178 = arith.mulf %177, %177 : vector<8x32xf32>
    %cst_70 = arith.constant dense<0.000000e+00> : vector<8xf32>
    %179 = vector.multi_reduction <add>, %178, %cst_70 [1] : vector<8x32xf32> to vector<8xf32>
    %180 = vector.shape_cast %179 : vector<8xf32> to vector<8x1xf32>
    %cst_71 = arith.constant 3.200000e+01 : f32
    %181 = vector.broadcast %cst_71 : f32 to vector<8x1xf32>
    %182 = arith.divf %180, %181 : vector<8x1xf32>
    %183 = vector.broadcast %175 : vector<8x1xf32> to vector<8x32xf32>
    %184 = arith.subf %169, %183 : vector<8x32xf32>
    %cst_72 = arith.constant 9.99999974E-6 : f32
    %185 = vector.broadcast %cst_72 : f32 to vector<8x1xf32>
    %186 = arith.addf %182, %185 : vector<8x1xf32>
    %187 = math.rsqrt %186 : vector<8x1xf32>
    %188 = vector.broadcast %187 : vector<8x1xf32> to vector<8x32xf32>
    %189 = arith.mulf %184, %188 : vector<8x32xf32>
    %190 = vector.broadcast %170 : vector<1x32xf32> to vector<8x32xf32>
    %191 = arith.mulf %189, %190 : vector<8x32xf32>
    %192 = vector.broadcast %171 : vector<1x32xf32> to vector<8x32xf32>
    %193 = arith.addf %191, %192 : vector<8x32xf32>
    %194 = arith.truncf %193 : vector<8x32xf32> to vector<8x32xbf16>
    %c0_73 = arith.constant 0 : index
    %c0_74 = arith.constant 0 : index
    %195 = vector.load %arg15[%c0_73, %c0_74] : memref<32x64xbf16, #tpu.memory_space<vmem>>, vector<32x64xbf16>
    %cst_75 = arith.constant dense<0.000000e+00> : vector<8x64xf32>
    %196 = tpu.matmul %194, %195, %cst_75 {dimension_numbers = #tpu.dot_dimension_numbers<[1], [0], [0], [1], [0, 0, 1, 1], [], []>} : vector<8x32xbf16>, vector<32x64xbf16>, vector<8x64xf32> -> vector<8x64xf32>
    %c0_76 = arith.constant 0 : index
    %c0_77 = arith.constant 0 : index
    %197 = vector.load %arg16[%c0_76, %c0_77] : memref<1x64xf32, #tpu.memory_space<vmem>>, vector<1x64xf32>
    %198 = vector.broadcast %197 : vector<1x64xf32> to vector<8x64xf32>
    %199 = arith.addf %196, %198 : vector<8x64xf32>
    %cst_78 = arith.constant 0.000000e+00 : f32
    %200 = vector.broadcast %cst_78 : f32 to vector<8x64xf32>
    %201 = arith.maximumf %199, %200 : vector<8x64xf32>
    %202 = arith.truncf %201 : vector<8x64xf32> to vector<8x64xbf16>
    %c0_79 = arith.constant 0 : index
    %c0_80 = arith.constant 0 : index
    %203 = vector.load %arg17[%c0_79, %c0_80] : memref<64x32xbf16, #tpu.memory_space<vmem>>, vector<64x32xbf16>
    %cst_81 = arith.constant dense<0.000000e+00> : vector<8x32xf32>
    %204 = tpu.matmul %202, %203, %cst_81 {dimension_numbers = #tpu.dot_dimension_numbers<[1], [0], [0], [1], [0, 0, 1, 1], [], []>} : vector<8x64xbf16>, vector<64x32xbf16>, vector<8x32xf32> -> vector<8x32xf32>
    %c0_82 = arith.constant 0 : index
    %c0_83 = arith.constant 0 : index
    %205 = vector.load %arg18[%c0_82, %c0_83] : memref<1x32xf32, #tpu.memory_space<vmem>>, vector<1x32xf32>
    %206 = vector.broadcast %205 : vector<1x32xf32> to vector<8x32xf32>
    %207 = arith.addf %204, %206 : vector<8x32xf32>
    %208 = arith.addf %169, %207 : vector<8x32xf32>
    %c0_84 = arith.constant 0 : index
    %c0_85 = arith.constant 0 : index
    %209 = vector.load %arg19[%c0_84, %c0_85] : memref<8x32xf32, #tpu.memory_space<vmem>>, vector<8x32xf32>
    tpu.vector_store %arg19[%c0_84, %c0_85], %208 {strides = array<i32>} : memref<8x32xf32, #tpu.memory_space<vmem>>, vector<8x32xf32>,
    return
  }
  func.func @transform_0(%arg0: i32) -> (i32, i32) {
    %c0_i32 = arith.constant 0 : i32
    %c0_i32_0 = arith.constant 0 : i32
    return %arg0, %c0_i32 : i32, i32
  }
  func.func @transform_1(%arg0: i32) -> (i32, i32, i32) {
    %c0_i32 = arith.constant 0 : i32
    %c0_i32_0 = arith.constant 0 : i32
    %c0_i32_1 = arith.constant 0 : i32
    return %arg0, %c0_i32, %c0_i32_0 : i32, i32, i32
  }
  func.func @transform_2(%arg0: i32) -> (i32, i32, i32) {
    %c0_i32 = arith.constant 0 : i32
    %c0_i32_0 = arith.constant 0 : i32
    %c0_i32_1 = arith.constant 0 : i32
    return %arg0, %c0_i32, %c0_i32_0 : i32, i32, i32
  }
  func.func @transform_3(%arg0: i32) -> (i32, i32, i32) {
    %c0_i32 = arith.constant 0 : i32
    %c0_i32_0 = arith.constant 0 : i32
    %c0_i32_1 = arith.constant 0 : i32
    return %arg0, %c0_i32, %c0_i32_0 : i32, i32, i32
  }
  func.func @transform_4(%arg0: i32) -> (i32, i32) {
    %c0_i32 = arith.constant 0 : i32
    %c0_i32_0 = arith.constant 0 : i32
    %c0_i32_1 = arith.constant 0 : i32
    return %c0_i32, %c0_i32_0 : i32, i32
  }
  func.func @transform_5(%arg0: i32) -> (i32, i32) {
    %c0_i32 = arith.constant 0 : i32
    %c0_i32_0 = arith.constant 0 : i32
    %c0_i32_1 = arith.constant 0 : i32
    return %c0_i32, %c0_i32_0 : i32, i32
  }
  func.func @transform_6(%arg0: i32) -> (i32, i32) {
    %c0_i32 = arith.constant 0 : i32
    %c0_i32_0 = arith.constant 0 : i32
    %c0_i32_1 = arith.constant 0 : i32
    return %c0_i32, %c0_i32_0 : i32, i32
  }
  func.func @transform_7(%arg0: i32) -> (i32, i32) {
    %c0_i32 = arith.constant 0 : i32
    %c0_i32_0 = arith.constant 0 : i32
    %c0_i32_1 = arith.constant 0 : i32
    return %c0_i32, %c0_i32_0 : i32, i32
  }
  func.func @transform_8(%arg0: i32) -> (i32, i32) {
    %c0_i32 = arith.constant 0 : i32
    %c0_i32_0 = arith.constant 0 : i32
    %c0_i32_1 = arith.constant 0 : i32
    return %c0_i32, %c0_i32_0 : i32, i32
  }
  func.func @transform_9(%arg0: i32) -> (i32, i32) {
    %c0_i32 = arith.constant 0 : i32
    %c0_i32_0 = arith.constant 0 : i32
    %c0_i32_1 = arith.constant 0 : i32
    return %c0_i32, %c0_i32_0 : i32, i32
  }
  func.func @transform_10(%arg0: i32) -> (i32, i32) {
    %c0_i32 = arith.constant 0 : i32
    %c0_i32_0 = arith.constant 0 : i32
    %c0_i32_1 = arith.constant 0 : i32
    return %c0_i32, %c0_i32_0 : i32, i32
  }
  func.func @transform_11(%arg0: i32) -> (i32, i32) {
    %c0_i32 = arith.constant 0 : i32
    %c0_i32_0 = arith.constant 0 : i32
    %c0_i32_1 = arith.constant 0 : i32
    return %c0_i32, %c0_i32_0 : i32, i32
  }
  func.func @transform_12(%arg0: i32) -> (i32, i32) {
    %c0_i32 = arith.constant 0 : i32
    %c0_i32_0 = arith.constant 0 : i32
    %c0_i32_1 = arith.constant 0 : i32
    return %c0_i32, %c0_i32_0 : i32, i32
  }
  func.func @transform_13(%arg0: i32) -> (i32, i32) {
    %c0_i32 = arith.constant 0 : i32
    %c0_i32_0 = arith.constant 0 : i32
    %c0_i32_1 = arith.constant 0 : i32
    return %c0_i32, %c0_i32_0 : i32, i32
  }
  func.func @transform_14(%arg0: i32) -> (i32, i32) {
    %c0_i32 = arith.constant 0 : i32
    %c0_i32_0 = arith.constant 0 : i32
    %c0_i32_1 = arith.constant 0 : i32
    return %c0_i32, %c0_i32_0 : i32, i32
  }
  func.func @transform_15(%arg0: i32) -> (i32, i32) {
    %c0_i32 = arith.constant 0 : i32
    %c0_i32_0 = arith.constant 0 : i32
    %c0_i32_1 = arith.constant 0 : i32
    return %c0_i32, %c0_i32_0 : i32, i32
  }
  func.func @transform_16(%arg0: i32) -> (i32, i32) {
    %c0_i32 = arith.constant 0 : i32
    %c0_i32_0 = arith.constant 0 : i32
    %c0_i32_1 = arith.constant 0 : i32
    return %c0_i32, %c0_i32_0 : i32, i32
  }
  func.func @transform_17(%arg0: i32) -> (i32, i32) {
    %c0_i32 = arith.constant 0 : i32
    %c0_i32_0 = arith.constant 0 : i32
    %c0_i32_1 = arith.constant 0 : i32
    return %c0_i32, %c0_i32_0 : i32, i32
  }
  func.func @transform_18(%arg0: i32) -> (i32, i32) {
    %c0_i32 = arith.constant 0 : i32
    %c0_i32_0 = arith.constant 0 : i32
    return %arg0, %c0_i32 : i32, i32
  }
}

</mosaic_0001>

<bundles_post_ra>
// kernel: tpu_custom_call.1
= control target key start
LH: loop header
LB: loop body
LE: loop exit
PB: predicated region body
PF: predicated region fallthrough
CT: control target
= control target key end

     0   :  { %s3319_s0 = inlined_call_operand.vmem [shape: f32[16,32], index: 0, kind: input, shape index: {}]   ;;  %s3320_s1 = inlined_call_operand.vmem [shape: f32[2,8,8], index: 1, kind: input, shape index: {}]   ;;  %s3321_s2 = inlined_call_operand.vmem [shape: f32[2,8,8], index: 2, kind: input, shape index: {}]   ;;  %s3322_s3 = inlined_call_operand.hbm [shape: f32[2,1,8], index: 3, kind: input, shape index: {}]   ;;  %s3323_s4 = inlined_call_operand.hbm [shape: f32[4,32], index: 4, kind: input, shape index: {}]   ;;  %s3324_s5 = inlined_call_operand.hbm [shape: f32[4,32], index: 5, kind: input, shape index: {}]   ;;  %s3325_s6 = inlined_call_operand.hbm [shape: bf16[32,32], index: 6, kind: input, shape index: {}]   ;;  %s3326_s7 = inlined_call_operand.hbm [shape: bf16[32,32], index: 7, kind: input, shape index: {}]   ;;  %s3327_s8 = inlined_call_operand.hbm [shape: bf16[32,32], index: 8, kind: input, shape index: {}]   ;;  %s3328_s9 = inlined_call_operand.vmem [shape: bf16[32,32], index: 9, kind: input, shape index: {}]   ;;  %s3329_s10 = inlined_call_operand.hbm [shape: bf16[32,32], index: 10, kind: input, shape index: {}]   ;;  %s3330_s11 = inlined_call_operand.hbm [shape: bf16[32,32], index: 11, kind: input, shape index: {}]   ;;  %s3331_s12 = inlined_call_operand.hbm [shape: bf16[32,32], index: 12, kind: input, shape index: {}]   ;;  %s3332_s13 = inlined_call_operand.hbm [shape: bf16[32,32], index: 13, kind: input, shape index: {}]   ;;  %s3333_s14 = inlined_call_operand.hbm [shape: bf16[32,64], index: 14, kind: input, shape index: {}]   ;;  %s3334_s15 = inlined_call_operand.vmem [shape: f32[1,64], index: 15, kind: input, shape index: {}]   ;;  %s3335_s16 = inlined_call_operand.vmem [shape: bf16[64,32], index: 16, kind: input, shape index: {}]   ;;  %s3336_s17 = inlined_call_operand.vmem [shape: f32[1,32], index: 17, kind: input, shape index: {}]   ;;  %s3337_s18 = inlined_call_operand.hbm [shape: f32[16,32], index: 18, kind: output, shape index: {}]  }
   0x1   :  { %3343 = sst [smem:[#allocation28_spill]] %s3319_s0 }
   0x2   :  { %3344 = sst [smem:[#allocation29_spill]] %s3320_s1 }
   0x3   :  { %3345 = sst [smem:[#allocation30_spill]] %s3321_s2 }
   0x4   :  { %3346 = sst [smem:[#allocation31_spill]] %s3323_s4 }
   0x5   :  { %3347 = sst [smem:[#allocation32_spill]] %s3324_s5 }
   0x6   :  { %3348 = sst [smem:[#allocation33_spill]] %s3325_s6 }
   0x7   :  { %3349 = sst [smem:[#allocation34_spill]] %s3326_s7 }
   0x8   :  { %3350 = sst [smem:[#allocation35_spill]] %s3327_s8 }
   0x9   :  { %3351 = sst [smem:[#allocation36_spill]] %s3329_s10 }
   0xa   :  { %3352 = sst [smem:[#allocation37_spill]] %s3330_s11 }
   0xb   :  { %3353 = sst [smem:[#allocation38_spill]] %s3331_s12 }
   0xc   :  { %3354 = sst [smem:[#allocation39_spill]] %s3332_s13 }
   0xd   :  { %3355 = sst [smem:[#allocation40_spill]] %s3337_s18 }
   0xe   :  { %23 = vsyncpa [#allocation3], 0 }
   0xf   :  { %25 = vsyncpa [#allocation3 + $0x1], 0 }
  0x10   :  { %26 = vsyncpa [#allocation6], 0 }
  0x11   :  { %27 = vsyncpa [#allocation9], 0 }
  0x12   :  { %28 = vsyncpa [#allocation12], 0 }
  0x13   :  { %29 = vsyncpa [#allocation15], 0 }
  0x14   :  { %30 = vsyncpa [#allocation18], 0 }
  0x15   :  { %31 = vsyncpa [#allocation4], 0 }
  0x16   :  { %33 = vsyncpa [#allocation4 + $0x1], 0  ;;  %s2861_s27 = smov 0   ;;  %s2863_s28 = smov 0  }
  0x17   :  { %s2865_s29 = smov 0   ;;  %s2867_s30 = smov 0  }
  0x18 LB: > { %s2749_s0 = smov [#allocation5]   ;;  %s2882_s1 = sadd.s32 4294967295, %s2747_s30   ;;  %s2747_s30 = sphi %s2867_s30, %s3396_s30   ;;  %s2743_s29 = sphi %s2865_s29, %s3395_s29   ;;  %s2739_s28 = sphi %s2863_s28, %s3394_s28   ;;  %s2735_s27 = sphi %s2861_s27, %s3393_s27  }
  0x19   : > { %s481_s19 = sshll.u32 %s2749_s0, 4  ;;  %p1963_p0 = scmp.ge.s32.totalorder %s2747_s30, 1  ;;  %s482_s19 = int_to_ptr.vmem [resolvable:$true] %s481_s19 }
  0x1a   : > { %p3339_p1 = scmp.eq.s32.totalorder %s2882_s1, 0  ;;  %p468_p2 = scmp.lt.s32.totalorder %s2747_s30, 3 }
  0x1b   : > { %s2750_s21 = smov [#allocation8]   ;;  %s2751_s23 = smov [#allocation11]  }
  0x1c   : > { %p2887_p3 = pnand %p1963_p0, %p468_p2  ;;  %s502_s22 = sshll.u32 %s2750_s21, 4  ;;  %s2894_s22 = int_to_ptr.vmem [resolvable:$true] %s502_s22 }
  0x1d   : > { %s528_s24 = sshll.u32 %s2751_s23, 4  ;;  %s2386_s26 = scalar_lea.vmem %s482_s19, 64  ;;  %s2902_s24 = int_to_ptr.vmem [resolvable:$true] %s528_s24 }
  0x1e   : > { %s3356_s20 = scalar_select %p2887_p3, 1, 0 }
  0x1f   : > { %p2225_p5 = pneg %p2887_p3  ;;  %p2387_p8 = scmp.ne.s32.totalorder %s482_s19, %s2386_s26 }
  0x20   : > { %p2394_p11 = scmp.lt.s32.totalorder %s482_s19, %s482_s19  ;;  %p2395_p12 = scmp.lt.s32.totalorder %s2386_s26, %s2386_s26 }
  0x21   : > { %p2898_p6 = pnand %p2225_p5, %p3339_p1 }
  0x22   : > { %p2396_p13 = por %p2395_p12, %p2394_p11 }
  0x23   : > { %p2906_p7 = pneg %p2898_p6 }
  0x25   : > { %p2389_p9 = pnand %p2387_p8, %p2906_p7 }
  0x27   : > { %p2390_p10 = pneg %p2389_p9 }
  0x29   : > { %p2397_p0 = pnand %p2396_p13, %p2390_p10 }
  0x2b   : > { %2400 = shalt.err (!%p2397_p0)
}
  0x2c   : > { %s3359_s4 = sld [smem:[#allocation31_spill]]  ;;  %s2412_s23 = scalar_lea.vmem %s2894_s22, 256 }
  0x2d   : > { %p2413_p2 = scmp.ne.s32.totalorder %s2894_s22, %s2412_s23  ;;  %p2420_p9 = scmp.lt.s32.totalorder %s2894_s22, %s2894_s22 }
  0x2e   : > { %p2421_p11 = scmp.lt.s32.totalorder %s2412_s23, %s2412_s23 }
  0x2f   : > { %p2415_p5 = pnand %p2413_p2, %p2906_p7 }
  0x30   : > { %p2422_p10 = por %p2421_p11, %p2420_p9 }
  0x31   : > { %p2416_p8 = pneg %p2415_p5 }
  0x32   : > { %2228 = dma.hbm_to_vmem [thread:$0]  (!%p2898_p6), %s3359_s4, 64, %s482_s19, [#allocation6]  }
  0x33   : > { %p2423_p12 = pnand %p2422_p10, %p2416_p8 }
  0x35   : > { %2426 = shalt.err (!%p2423_p12)
}
  0x36   : > { %s2752_s26 = smov 64   ;;  %s2753_s0 = smov 4  }
  0x37   : > { %s3360_s6 = sld [smem:[#allocation33_spill]]  ;;  %s2438_s23 = scalar_lea.vmem %s2902_s24, 256 }
  0x38   : > { %p2439_p13 = scmp.ne.s32.totalorder %s2902_s24, %s2438_s23  ;;  %p2446_p5 = scmp.lt.s32.totalorder %s2902_s24, %s2902_s24 }
  0x39   : > { %p2447_p8 = scmp.lt.s32.totalorder %s2438_s23, %s2438_s23 }
  0x3a   : > { %p2441_p0 = pnand %p2439_p13, %p2906_p7 }
  0x3b   : > { %p2448_p9 = por %p2447_p8, %p2446_p5 }
  0x3c   : > { %p2442_p2 = pneg %p2441_p0 }
  0x3d   : > { %2234 = dma.hbm_to_vmem [thread:$0]  (!%p2898_p6), %s3360_s6, 256, %s2894_s22, [#allocation9], %s2752_s26, %s2752_s26, %s2753_s0  }
  0x3e   : > { %p2449_p11 = pnand %p2448_p9, %p2442_p2 }
  0x40   : > { %2452 = shalt.err (!%p2449_p11)
}
  0x41   : > { %s3361_s8 = sld [smem:[#allocation35_spill]]  ;;  %s2754_s22 = smov [#allocation14]  }
  0x42   : > { %s557_s21 = sshll.u32 %s2754_s22, 4  ;;  %s2755_s6 = smov [#allocation17]   ;;  %s558_s21 = int_to_ptr.vmem [resolvable:$true] %s557_s21 }
  0x43   : > { %s583_s18 = sshll.u32 %s2755_s6, 4  ;;  %s2464_s23 = scalar_lea.vmem %s558_s21, 256  ;;  %s584_s18 = int_to_ptr.vmem [resolvable:$true] %s583_s18 }
  0x44   : > { %p2465_p10 = scmp.ne.s32.totalorder %s558_s21, %s2464_s23  ;;  %p2472_p0 = scmp.lt.s32.totalorder %s558_s21, %s558_s21 }
  0x45   : > { %p2473_p2 = scmp.lt.s32.totalorder %s2464_s23, %s2464_s23 }
  0x46   : > { %p2467_p12 = pnand %p2465_p10, %p2906_p7 }
  0x47   : > { %2240 = dma.hbm_to_vmem [thread:$0]  (!%p2898_p6), %s3361_s8, 256, %s2902_s24, [#allocation12], %s2752_s26, %s2752_s26, %s2753_s0  }
  0x48   : > { %p2468_p13 = pneg %p2467_p12  ;;  %p2474_p5 = por %p2473_p2, %p2472_p0 }
  0x4a   : > { %p2475_p8 = pnand %p2474_p5, %p2468_p13 }
  0x4c   : > { %2478 = shalt.err (!%p2475_p8)
}
  0x4d   : > { %s3362_s11 = sld [smem:[#allocation37_spill]]  ;;  %s2490_s6 = scalar_lea.vmem %s584_s18, 256 }
  0x4e   : > { %p2491_p9 = scmp.ne.s32.totalorder %s584_s18, %s2490_s6  ;;  %p2498_p12 = scmp.lt.s32.totalorder %s584_s18, %s584_s18 }
  0x4f   : > { %p2499_p0 = scmp.lt.s32.totalorder %s2490_s6, %s2490_s6 }
  0x50   : > { %p2493_p11 = pnand %p2491_p9, %p2906_p7 }
  0x51   : > { %p2500_p13 = por %p2499_p0, %p2498_p12 }
  0x52   : > { %p2494_p10 = pneg %p2493_p11 }
  0x53   : > { %2246 = dma.hbm_to_vmem [thread:$0]  (!%p2898_p6), %s3362_s11, 256, %s558_s21, [#allocation15], %s2752_s26, %s2752_s26, %s2753_s0  }
  0x54   : > { %p2501_p2 = pnand %p2500_p13, %p2494_p10 }
  0x56   : > { %2504 = shalt.err (!%p2501_p2)
}
  0x57   : > { %s3363_s13 = sld [smem:[#allocation39_spill]]  ;;  %s2756_s21 = smov [#allocation7]  }
  0x58   : > { %s492_s23 = sshll.u32 %s2756_s21, 4  ;;  %s2757_s4 = smov [#allocation10]   ;;  %s493_s23 = int_to_ptr.vmem [resolvable:$true] %s492_s23 }
  0x59   : > { %s515_s24 = sshll.u32 %s2757_s4, 4  ;;  %s2516_s8 = scalar_lea.vmem %s493_s23, 64  ;;  %s516_s24 = int_to_ptr.vmem [resolvable:$true] %s515_s24 }
  0x5a   : > { %p2517_p5 = scmp.ne.s32.totalorder %s493_s23, %s2516_s8  ;;  %p2524_p11 = scmp.lt.s32.totalorder %s493_s23, %s493_s23 }
  0x5b   : > { %p2525_p10 = scmp.lt.s32.totalorder %s2516_s8, %s2516_s8 }
  0x5c   : > { %p2519_p8 = pnand %p2517_p5, %p2906_p7 }
  0x5d   : > { %2252 = dma.hbm_to_vmem [thread:$0]  (!%p2898_p6), %s3363_s13, 256, %s584_s18, [#allocation18], %s2752_s26, %s2752_s26, %s2753_s0  }
  0x5e   : > { %p2520_p9 = pneg %p2519_p8  ;;  %p2526_p12 = por %p2525_p10, %p2524_p11 }
  0x60   : > { %p2527_p0 = pnand %p2526_p12, %p2520_p9 }
  0x62   : > { %2530 = shalt.err (!%p2527_p0)
}
  0x63   : > { %s3364_s5 = sld [smem:[#allocation32_spill]]  ;;  %s2542_s18 = scalar_lea.vmem %s516_s24, 256 }
  0x64   : > { %p2543_p13 = scmp.ne.s32.totalorder %s516_s24, %s2542_s18  ;;  %p2550_p5 = scmp.lt.s32.totalorder %s516_s24, %s516_s24 }
  0x65   : > { %p2551_p8 = scmp.lt.s32.totalorder %s2542_s18, %s2542_s18 }
  0x66   : > { %p2545_p2 = pnand %p2543_p13, %p2906_p7 }
  0x67   : > { %p2552_p1 = por %p2551_p8, %p2550_p5 }
  0x68   : > { %p2546_p4 = pneg %p2545_p2 }
  0x69   : > { %2231 = dma.hbm_to_vmem [thread:$0]  (!%p2898_p6), %s3364_s5, 64, %s493_s23, [#allocation6]  }
  0x6a   : > { %p2553_p3 = pnand %p2552_p1, %p2546_p4 }
  0x6c   : > { %2556 = shalt.err (!%p2553_p3)
}
  0x6d   : > { %s3365_s7 = sld [smem:[#allocation34_spill]]  ;;  %s2758_s21 = smov [#allocation13]  }
  0x6e   : > { %s544_s23 = sshll.u32 %s2758_s21, 4  ;;  %s2759_s4 = smov [#allocation16]   ;;  %s545_s23 = int_to_ptr.vmem [resolvable:$true] %s544_s23 }
  0x6f   : > { %s570_s6 = sshll.u32 %s2759_s4, 4  ;;  %s2568_s19 = scalar_lea.vmem %s545_s23, 256  ;;  %s571_s6 = int_to_ptr.vmem [resolvable:$true] %s570_s6 }
  0x70   : > { %p2569_p9 = scmp.ne.s32.totalorder %s545_s23, %s2568_s19  ;;  %p2576_p4 = scmp.lt.s32.totalorder %s545_s23, %s545_s23 }
  0x71   : > { %p2577_p11 = scmp.lt.s32.totalorder %s2568_s19, %s2568_s19 }
  0x72   : > { %p2571_p1 = pnand %p2569_p9, %p2906_p7 }
  0x73   : > { %2237 = dma.hbm_to_vmem [thread:$0]  (!%p2898_p6), %s3365_s7, 256, %s516_s24, [#allocation9], %s2752_s26, %s2752_s26, %s2753_s0  }
  0x74   : > { %p2572_p3 = pneg %p2571_p1  ;;  %p2578_p10 = por %p2577_p11, %p2576_p4 }
  0x76   : > { %p2579_p12 = pnand %p2578_p10, %p2572_p3 }
  0x78   : > { %2582 = shalt.err (!%p2579_p12)
}
  0x79   : > { %s3366_s10 = sld [smem:[#allocation36_spill]]  ;;  %s2594_s8 = scalar_lea.vmem %s571_s6, 256 }
  0x7a   : > { %p2595_p0 = scmp.ne.s32.totalorder %s571_s6, %s2594_s8  ;;  %p2602_p5 = scmp.lt.s32.totalorder %s571_s6, %s571_s6 }
  0x7b   : > { %p2603_p8 = scmp.lt.s32.totalorder %s2594_s8, %s2594_s8 }
  0x7c   : > { %p2597_p13 = pnand %p2595_p0, %p2906_p7 }
  0x7d   : > { %p2604_p9 = por %p2603_p8, %p2602_p5 }
  0x7e   : > { %p2598_p2 = pneg %p2597_p13 }
  0x7f   : > { %2243 = dma.hbm_to_vmem [thread:$0]  (!%p2898_p6), %s3366_s10, 256, %s545_s23, [#allocation12], %s2752_s26, %s2752_s26, %s2753_s0  }
  0x80   : > { %p2605_p1 = pnand %p2604_p9, %p2598_p2 }
  0x82   : > { %2608 = shalt.err (!%p2605_p1)
}
  0x83   : > { %s3367_s12 = sld [smem:[#allocation38_spill]]  ;;  %s2760_s23 = smov [#allocation19]  }
  0x84   : > { %s596_s4 = sshll.u32 %s2760_s23, 4  ;;  %s597_s4 = int_to_ptr.vmem [resolvable:$true] %s596_s4 }
  0x85   : > { %s2620_s19 = scalar_lea.vmem %s597_s4, 256  ;;  %p2628_p10 = scmp.lt.s32.totalorder %s597_s4, %s597_s4 }
  0x86   : > { %p2621_p3 = scmp.ne.s32.totalorder %s597_s4, %s2620_s19  ;;  %p2629_p12 = scmp.lt.s32.totalorder %s2620_s19, %s2620_s19 }
  0x88   : > { %p2623_p4 = pnand %p2621_p3, %p2906_p7  ;;  %p2630_p0 = por %p2629_p12, %p2628_p10 }
  0x89   : > { %2249 = dma.hbm_to_vmem [thread:$0]  (!%p2898_p6), %s3367_s12, 256, %s571_s6, [#allocation15], %s2752_s26, %s2752_s26, %s2753_s0  }
  0x8a   : > { %p2624_p11 = pneg %p2623_p4 }
  0x8c   : > { %p2631_p13 = pnand %p2630_p0, %p2624_p11 }
  0x8e   : > { %2634 = shalt.err (!%p2631_p13)
}
  0x8f   : > { %2255 = dma.hbm_to_vmem [thread:$0]  (!%p2898_p6), %s3333_s14, 256, %s597_s4, [#allocation18], %s2752_s26, %s2752_s26, %s2753_s0  }
  0x90   : > { %s1962_s2 = sadd.s32 4294967294, %s2747_s30   ;;  %s3016_s25 = sadd.s32 1, %s2747_s30  }
  0x91   : > { %s121_s18 = ssub.s32 %s2747_s30, %s3016_s25  ;;  %s124_s8 = sadd.s32 1, %s2743_s29 }
  0x92   : > { %p122_p7 = scmp.eq.s32.totalorder %s121_s18, 0  ;;  %p131_p2 = scmp.ne.s32.totalorder %s2743_s29, %s2739_s28 }
  0x93   : > { %p132_p5 = scmp.eq.s32.totalorder %s2747_s30, 0  ;;  %p137_p8 = scmp.ne.s32.totalorder %s2739_s28, %s2735_s27 }
  0x94   : > { %s3027_s22 = scalar_select %p122_p7, %s2743_s29, %s124_s8  }
  0x95   : > { %p3029_p9 = por %p132_p5, %p131_p2  ;;  %p3369_p1 = scmp.eq.s32.totalorder %s2882_s1, 0 }
  0x96   : > { %p455_p3 = scmp.eq.s32.totalorder %s2882_s1, 1  ;;  %p461_p4 = scmp.eq.s32.totalorder %s1962_s2, 1 }
  0x97   : > { %p3035_p6 = por %p3369_p1, %p137_p8  ;;  %p2274_p11 = scmp.lt.s32.totalorder %s2747_s30, 2 }
  0x98   : > { %s640_s0 = sand.u32 1, %s2743_s29   ;;  %p3042_p10 = por %p455_p3, %p131_p2 }
  0x99   : > { %s3370_s26 = scalar_select %p3035_p6, 1, 0 }
  0x9a   : > { %s3371_s23 = scalar_select %p3042_p10, 1, 0 }
  0x9b   : > { %p3046_p12 = por %p461_p4, %p137_p8  ;;  %s1975_s19 = sshll.u32 %s2747_s30, 4 }
  0x9c   : > { %s643_s24 = scalar_lea.vmem [#allocation2], %s640_s0  ;;  %s3054_s5 = scalar_lea.hbm %s3322_s3, %s1975_s19 }
  0x9d   : > { %s3372_s4 = scalar_select %p3046_p12, 1, 0 }
  0x9e   : > { %s650_s6 = sshll.u32 %s643_s24, 4  ;;  %p3058_p0 = pnand %p2274_p11, %p3029_p9  ;;  %s651_s6 = int_to_ptr.vmem [resolvable:$true] %s650_s6 }
  0x9f   : > { %s641_s7 = scalar_lea.sflag [#allocation3], %s640_s0  ;;  %s2635_s10 = scalar_lea.hbm %s3054_s5, 16 }
  0xa0   : > { %p2636_p13 = scmp.ne.s32.totalorder %s3054_s5, %s2635_s10  ;;  %p2637_p7 = pneg %p3058_p0 }
  0xa1   : > { %s2640_s18 = scalar_lea.hbm %s3322_s3, 32  ;;  %p2641_p8 = scmp.lt.s32.totalorder %s3054_s5, %s3322_s3 }
  0xa2   : > { %p2638_p2 = pnand %p2637_p7, %p2636_p13  ;;  %p2642_p9 = scmp.lt.s32.totalorder %s2640_s18, %s2635_s10 }
  0xa4   : > { %p2639_p5 = pneg %p2638_p2  ;;  %p2643_p1 = por %p2642_p9, %p2641_p8 }
  0xa6   : > { %p2644_p3 = pnand %p2643_p1, %p2639_p5 }
  0xa8   : > { %2647 = shalt.err (!%p2644_p3)
}
  0xa9   : > { %s2648_s21 = scalar_lea.vmem %s651_s6, 16  ;;  %s2761_s0 = smov [#allocation2]  }
  0xaa   : > { %p2649_p4 = scmp.ne.s32.totalorder %s651_s6, %s2648_s21  ;;  %s2653_s12 = sshll.u32 %s2761_s0, 4  ;;  %s2654_s12 = int_to_ptr.vmem [resolvable:$false] %s2653_s12 }
  0xab   : > { %s2655_s13 = scalar_lea.vmem %s2654_s12, 32  ;;  %p2656_p13 = scmp.lt.s32.totalorder %s651_s6, %s2654_s12 }
  0xac   : > { %p2651_p11 = pnand %p2649_p4, %p2637_p7  ;;  %p2657_p2 = scmp.lt.s32.totalorder %s2655_s13, %s2648_s21 }
  0xae   : > { %p2652_p12 = pneg %p2651_p11  ;;  %p2658_p10 = por %p2657_p2, %p2656_p13 }
  0xb0   : > { %p2659_p6 = pnand %p2658_p10, %p2652_p12 }
  0xb2   : > { %2662 = shalt.err (!%p2659_p6)
}
  0xb3   : > { %2259 = dma.hbm_to_vmem [thread:$0]  (!%p3058_p0), %s3054_s5, 16, %s651_s6, %s641_s7  }
  0xb4   : > { %p3374_p5 = scmp.ne.s32.totalorder %s3356_s20, 0 }
  0xb5   : > { %s3079_s10 = sand.u32 (!%p3374_p5), 1, %s2739_s28   ;;  %p3375_p7 = scmp.ne.s32.totalorder (!%p3374_p5), %s3370_s26, 0 }
  0xb6   : > { %659 = sbr.rel (%p3374_p5) target bundleno = 4142 (0x102e), region = 92  ;;  %s662_s11 = scalar_lea.sflag (!%p3374_p5), [#allocation3], %s3079_s10 }
  0xb7   : > { %s664_s24 = scalar_lea.vmem (!%p3374_p5), [#allocation2], %s3079_s10 }
  0xbb   : > { %2706 = dma.done.wait (%p3375_p7), %s662_s11, 16  }
  0xbc   : > { %2708 = vsyncadd (%p3375_p7), %s662_s11, 4294967280  ;;  %p3376_p6 = scmp.eq.s32.totalorder %s2882_s1, 0 }
  0xbe   : > { %2710 = dma.done.wait (%p3376_p6), [#allocation6], 128   ;;  %p3377_p10 = pmov %p3376_p6 }
  0xbf   : > { %p3378_p12 = pmov %p3376_p6 }
  0xc0   : > { %2712 = vsyncadd (%p3377_p10), [#allocation6], 4294967168 }
  0xc1   : > { %2714 = dma.done.wait (%p3378_p12), [#allocation9], 512   ;;  %p3379_p0 = pmov %p3376_p6 }
  0xc3   : > { %2716 = vsyncadd (%p3379_p0), [#allocation9], 4294966784  ;;  %p3380_p8 = pmov %p3379_p0 }
  0xc4   : > { %p3381_p9 = pmov %p3379_p0 }
  0xc5   : > { %2718 = dma.done.wait (%p3380_p8), [#allocation12], 512  }
  0xc6   : > { %2720 = vsyncadd (%p3381_p9), [#allocation12], 4294966784  ;;  %p3382_p1 = pmov %p3379_p0 }
  0xc7   : > { %p3383_p3 = pmov %p3379_p0 }
  0xc8   : > { %2722 = dma.done.wait (%p3382_p1), [#allocation15], 512  }
  0xc9   : > { %2724 = vsyncadd (%p3383_p3), [#allocation15], 4294966784  ;;  %p3384_p4 = pmov %p3379_p0 }
  0xca   : > { %p3385_p11 = pmov %p3379_p0 }
  0xcb   : > { %2726 = dma.done.wait (%p3384_p4), [#allocation18], 512  }
  0xcc   : > { %2728 = vsyncadd (%p3385_p11), [#allocation18], 4294966784  ;;  %p768_p13 = scmp.lt.s32.totalorder %s2882_s1, 1  ;;  %v798_v0 = vlaneseq  ;;  %s3386_s20 = sld [smem:[#allocation28_spill]]  ;;  %vm816_vm0 = vcmask 261120   ;;  %vm804_vm2 = vcmask 64512  }
  0xcd   : > { %s3387_s19 = sld [smem:[#allocation29_spill]]  ;;  %v782_v4 = vld [vmem:[%s664_s24] sm:$0x1]  ;;  %v2762_v8 = vmov -1e+09   ;;  %v2333_v21 = vld [vmem:[#allocation8 + $0x8] sm:$0xff]  }
  0xce   : > { %s769_s5 = scalar_select %p768_p13, %s2882_s1, 1  ;;  %v3109_v1 = vshrl.u32 %v798_v0, 7  ;;  %vm785_vm1 = vcmp.gt.f32.partialorder %v782_v4, 0.0  ;;  %v2763_v22 = vmov 0.0   ;;  %vm2764_vm3 = vmmov 0   ;;  %v2334_v24 = vld [vmem:[#allocation8] sm:$0xff]  }
  0xcf   : > { %v786_v9 = vsel %vm785_vm1, 0.0, %v2762_v8  ;;  %2073 = vmatprep.subr.bf16.mxu0 %v2763_v22  ;;  %2077 = vmatprep.mubr.msk.bf16.mxu0 %vm2764_vm3, %v2763_v22  ;;  %v3141_v29 = vld [vmem:[#allocation5] sm:$0xf]  ;;  %v3143_v30 = vld [vmem:[#allocation7] sm:$0xf]  ;;  %vm902_vm4 = vcmask 1043456  }
  0xd0   : > { %s3111_s7 = sshll.u32 %s769_s5, 3  ;;  %v800_v2 = vsub.s32 0, %v3109_v1  ;;  %2074 = vmatpush3.bf16.msra.mxu0 %v2333_v21  ;;  %2081 = vmatprep.subr.bf16.mxu1 %v2763_v22  ;;  %v2335_v46 = vld [vmem:[#allocation10 + $0x8] sm:$0xff]   ;;  %v2336_v49 = vld [vmem:[#allocation10] sm:$0xff]   ;;  %s3388_s0 = sld [smem:[#allocation30_spill]]  ;;  %vm1704_vm5 = vcmask 523264  }
  0xd1   : > { %2075 = vmatprep.subr.bf16.mxu0 %v2763_v22  ;;  %2083 = vmatprep.mubr.msk.bf16.mxu1 %vm2764_vm3, %v2763_v22  ;;  %s3389_s6 = sld [smem:[#allocation40_spill]]  ;;  %p3390_p5 = scmp.ne.s32.totalorder %s3371_s23, 0 }
  0xd2   : > { %s771_s26 = scalar_lea.vmem %s3386_s20, %s3111_s7  ;;  %v3126_v10 = vrot.slane %v786_v9, %v800_v2  ;;  %v834_v31 = vrot.slane %v3141_v29, %v800_v2  ;;  %v839_v34 = vrot.slane %v3143_v30, %v800_v2 }
  0xd3   : > { %s775_s18 = scalar_lea.vmem %s3387_s19, %s3111_s7  ;;  %v3122_v3 = vld [vmem:[%s771_s26] sm:$0xff] }
  0xd4   : > { %v787_v5 = vld [vmem:[%s775_s18] sm:$0xff]  ;;  %v817_v6 = vsel %vm816_vm0, %v3122_v3, 0.0  ;;  %2076 = vmatpush3.bf16.msra.mxu0 %v2334_v24  ;;  %s2765_s18 = smov [#allocation20]  }
  0xd5   : > { %v796_v7 = vsub.f32 0.0, %v787_v5  ;;  %818 = vadd.xlane.f32.xlu0 %v817_v6  ;;  %2109 = vmatprep.subr.bf16.mxu0 %v2763_v22  ;;  %s2667_s8 = sshll.u32 %s2765_s18, 4  ;;  %s2668_s8 = int_to_ptr.vmem [resolvable:$false] %s2667_s8 }
  0xd6   : > { %s779_s11 = scalar_lea.vmem %s3388_s0, %s3111_s7  ;;  %s2030_s7 = sshll.u32 %s2882_s1, 7 }
  0xd7   : > { %v803_v11 = vadd.f32 %v3126_v10, %v796_v7  ;;  %v1003_v55 = vld [vmem:[%s779_s11] sm:$0xff]  ;;  %s1987_s11 = sshll.u32 %s3079_s10, 3  ;;  %s3275_s2 = scalar_lea.hbm %s3389_s6, %s2030_s7 }
  0xd8   : > { %v1012_v56 = vsub.f32 0.0, %v1003_v55  ;;  %s767_s12 = scalar_lea.vmem [#allocation20], %s1987_s11  ;;  %s1751_s1 = scalar_lea.sflag [#allocation4], %s3079_s10 }
  0xd9   : > { %v805_v12 = vsel %vm804_vm2, %v803_v11, -inf  ;;  %s1764_s13 = sshll.u32 %s767_s12, 4  ;;  %s2669_s21 = scalar_lea.vmem %s2668_s8, 256  ;;  %s3277_s13 = int_to_ptr.vmem [resolvable:$true] %s1764_s13 }
  0xda   : > { %806 = vmax.xlane.f32.xlu1 %v805_v12  ;;  %v1013_v59 = vadd.f32 %v1012_v56, %v3126_v10  ;;  %s2663_s19 = scalar_lea.vmem %s3277_s13, 128  ;;  %p2670_p10 = scmp.lt.s32.totalorder %s3277_s13, %s2668_s8 }
  0xdb   : > { %p2664_p2 = scmp.ne.s32.totalorder %s3277_s13, %s2663_s19  ;;  %p2671_p12 = scmp.lt.s32.totalorder %s2669_s21, %s2663_s19 }
  0xdc   : > { %v1014_v63 = vsel %vm804_vm2, %v1013_v59, -inf }
  0xdd   : > { %p2665_p7 = pnand %p2664_p2, %p3390_p5  ;;  %p2672_p0 = por %p2671_p12, %p2670_p10 }
  0xdf   : > { %p2666_p6 = pneg %p2665_p7 }
  0xe1   : > { %p2673_p8 = pnand %p2672_p0, %p2666_p6 }
 0x15e   : > { %v819_v13 = vpop.xlane.xlu0 %818 }
 0x15f   : > { %v821_v14 = vmul.f32 0.03125, %v819_v13  ;;  %v2337_v13 = vld [vmem:[#allocation11 + $0x8] sm:$0xff]  }
 0x161   : > { %v822_v15 = vsub.f32 %v3122_v3, %v821_v14  ;;  %v2338_v14 = vld [vmem:[#allocation11] sm:$0xff]  }
 0x163   : > { %v823_v16 = vmul.f32 %v822_v15, %v822_v15  ;;  %v807_v17 = vpop.xlane.xlu1 %806 }
 0x164   : > { %v808_v19 = vsub.f32 %v803_v11, %v807_v17 }
 0x165   : > { %v824_v18 = vsel %vm816_vm0, %v823_v16, 0.0 }
 0x166   : > { %825 = vadd.xlane.f32.xlu0 %v824_v18  ;;  %v809_v20 = vmul.f32 1.442695, %v808_v19  ;;  %v1040_v18 = vsub.s32 1, %v3109_v1 }
 0x168   : > { %2355 = vpow2.f32 %v809_v20  ;;  %v1041_v19 = vrot.slane %v3141_v29, %v1040_v18 }
 0x175   : > { %v2356_v23 = vpop.eup %2355 }
 0x176   : > { %v811_v25 = vsel %vm804_vm2, %v2356_v23, 0.0 }
 0x177   : > { %812 = vadd.xlane.f32.xlu1 %v811_v25 }
 0x1ef   : > { %v826_v26 = vpop.xlane.xlu0 %825 }
 0x1f0   : > { %v827_v27 = vmul.f32 0.03125, %v826_v26 }
 0x1f2   : > { %v828_v28 = vadd.f32 1e-05, %v827_v27  ;;  %v2339_v27 = vld [vmem:[%s3328_s9 + $0x8] sm:$0xff]  }
 0x1f4   : > { %2357 = vrsqrt.f32 %v828_v28 }
 0x200   : > { %v813_v38 = vpop.xlane.xlu1 %812 }
 0x201   : > { %v2358_v32 = vpop.eup %2357  ;;  %2359 = vrcp.f32 %v813_v38 }
 0x202   : > { %v830_v33 = vmul.f32 %v2358_v32, %v822_v15 }
 0x204   : > { %v835_v35 = vmul.f32 %v834_v31, %v830_v33 }
 0x206   : > { %v840_v36 = vadd.f32 %v839_v34, %v835_v35 }
 0x208   : > { %v841_v37 = vpack.c.bf16 %v840_v36, %v840_v36 }
 0x20a   : > { %2078 = vmatmul.mubr.msk.bf16.vlgmr.msra.gmra.mxu0 %vm816_vm0, %v841_v37 }
 0x20b   : > { %2113 = vmatprep.mubr.msk.bf16.mxu0 %vm2764_vm3, %v2763_v22  ;;  %2110 = vmatpush3.bf16.msra.mxu0 %v2339_v27 }
 0x20c   : > { %2111 = vmatprep.subr.bf16.mxu0 %v2763_v22 }
 0x20e   : > { %v2360_v39 = vpop.eup %2359 }
 0x20f   : > { %v815_v42 = vmul.f32 %v2360_v39, %v2356_v23  ;;  %v1046_v23 = vrot.slane %v3143_v30, %v1040_v18 }
 0x211   : > { %v898_v47 = vpack.c.bf16 %v815_v42, %v815_v42 }
 0x2ca   : > { %v891_v40 = vpop.f32.mrf.mxu0 }
 0x2cb   : > { %v897_v41 = vpack.c.bf16 %v891_v40, %v891_v40  ;;  %v2340_v40 = vld [vmem:[%s3328_s9] sm:$0xff]  }
 0x2cc   : > { %v2079_v43 = vpop.f32.mrf.mxu0  ;;  %2112 = vmatpush3.bf16.msra.mxu0 %v2340_v40 }
 0x2cd   : > { %v904_v44 = vsel %vm902_vm4, %v897_v41, 0  ;;  %2125 = vmatprep.subr.bf16.mxu0 %v2763_v22 }
 0x2ce   : > { %v894_v45 = vpop.f32.mrf.mxu0  ;;  %2082 = vmatpush3.bf16.msra.mxu1 %v904_v44 }
 0x2cf   : > { %2087 = vmatprep.subr.bf16.mxu1 %v2763_v22 }
 0x2d0   : > { %v2080_v48 = vpop.f32.mrf.mxu0 }
 0x2d1   : > { %2084 = vmatmul.mubr.msk.bf16.vlgmr.msra.gmra.mxu1 %vm804_vm2, %v898_v47 }
 0x2d2   : > { %2088 = vmatpush3.bf16.msra.mxu1 %v2335_v46  ;;  %2091 = vmatprep.mubr.msk.bf16.mxu1 %vm2764_vm3, %v2763_v22 }
 0x2d3   : > { %2089 = vmatprep.subr.bf16.mxu1 %v2763_v22 }
 0x2d6   : > { %2090 = vmatpush3.bf16.msra.mxu1 %v2336_v49 }
 0x2d7   : > { %2095 = vmatprep.subr.bf16.mxu1 %v2763_v22 }
 0x391   : > { %v940_v50 = vpop.f32.mrf.mxu1 }
 0x392   : > { %v946_v51 = vpack.c.bf16 %v940_v50, %v940_v50 }
 0x393   : > { %v2085_v52 = vpop.f32.mrf.mxu1 }
 0x394   : > { %2092 = vmatmul.mubr.msk.bf16.vlgmr.msra.gmra.mxu1 %vm816_vm0, %v946_v51 }
 0x395   : > { %v943_v53 = vpop.f32.mrf.mxu1  ;;  %2099 = vmatprep.mubr.msk.bf16.mxu1 %vm2764_vm3, %v2763_v22  ;;  %2096 = vmatpush3.bf16.msra.mxu1 %v2337_v13 }
 0x396   : > { %2097 = vmatprep.subr.bf16.mxu1 %v2763_v22 }
 0x397   : > { %v2086_v54 = vpop.f32.mrf.mxu1 }
 0x399   : > { %2098 = vmatpush3.bf16.msra.mxu1 %v2338_v14 }
 0x39a   : > { %2103 = vmatprep.subr.bf16.mxu1 %v2763_v22 }
 0x454   : > { %v996_v57 = vpop.f32.mrf.mxu1 }
 0x455   : > { %v3165_v58 = vadd.f32 %v996_v57, %v3122_v3  ;;  %v2341_v57 = vld [vmem:[#allocation13 + $0x8] sm:$0xff]  }
 0x456   : > { %v2093_v60 = vpop.f32.mrf.mxu1 }
 0x457   : > { %v1025_v61 = vsel %vm816_vm0, %v3165_v58, 0.0  ;;  %v2344_v60 = vld [vmem:[#allocation14] sm:$0xff]  }
 0x458   : > { %1026 = vadd.xlane.f32.xlu0 %v1025_v61  ;;  %v999_v62 = vpop.f32.mrf.mxu1 }
 0x45a   : > { %v2094_v0 = vpop.f32.mrf.mxu1 }
 0x45b   : > { %v1224_v0 = vsub.s32 2, %v3109_v1 }
 0x45c   : > { %1015 = vmax.xlane.f32.xlu0 %v1014_v63 }
 0x4e1   : > { %v1027_v2 = vpop.xlane.xlu0 %1026 }
 0x4e2   : > { %v1028_v4 = vmul.f32 0.03125, %v1027_v2  ;;  %v1225_v2 = vrot.slane %v3141_v29, %v1224_v0 }
 0x4e4   : > { %v1029_v5 = vsub.f32 %v3165_v58, %v1028_v4 }
 0x4e5   : > { %v1016_v6 = vpop.xlane.xlu0 %1015 }
 0x4e6   : > { %v1030_v7 = vmul.f32 %v1029_v5, %v1029_v5  ;;  %v1017_v3 = vsub.f32 %v1013_v59, %v1016_v6  ;;  %v2342_v59 = vld [vmem:[#allocation14 + $0x8] sm:$0xff]   ;;  %v1230_v6 = vrot.slane %v3143_v30, %v1224_v0 }
 0x4e8   : > { %v1031_v8 = vsel %vm816_vm0, %v1030_v7, 0.0  ;;  %v1018_v9 = vmul.f32 1.442695, %v1017_v3 }
 0x4e9   : > { %1032 = vadd.xlane.f32.xlu1 %v1031_v8  ;;  %v2345_v8 = vld [vmem:[#allocation16 + $0x8] sm:$0xff]  }
 0x4ea   : > { %2361 = vpow2.f32 %v1018_v9 }
 0x4f7   : > { %v2362_v11 = vpop.eup %2361 }
 0x4f8   : > { %v1020_v12 = vsel %vm804_vm2, %v2362_v11, 0.0 }
 0x4f9   : > { %1021 = vadd.xlane.f32.xlu1 %v1020_v12 }
 0x572   : > { %v1033_v15 = vpop.xlane.xlu1 %1032 }
 0x573   : > { %v1034_v16 = vmul.f32 0.03125, %v1033_v15 }
 0x575   : > { %v1035_v17 = vadd.f32 1e-05, %v1034_v16 }
 0x577   : > { %2363 = vrsqrt.f32 %v1035_v17 }
 0x582   : > { %v1022_v28 = vpop.xlane.xlu1 %1021 }
 0x583   : > { %2365 = vrcp.f32 %v1022_v28 }
 0x584   : > { %v2364_v20 = vpop.eup %2363 }
 0x585   : > { %v1037_v21 = vmul.f32 %v2364_v20, %v1029_v5 }
 0x587   : > { %v1042_v24 = vmul.f32 %v1041_v19, %v1037_v21 }
 0x589   : > { %v1047_v25 = vadd.f32 %v1046_v23, %v1042_v24 }
 0x58b   : > { %v1048_v26 = vpack.c.bf16 %v1047_v25, %v1047_v25 }
 0x58d   : > { %2100 = vmatmul.mubr.msk.bf16.vlgmr.msra.gmra.mxu1 %vm816_vm0, %v1048_v26 }
 0x58e   : > { %2105 = vmatprep.mubr.msk.bf16.mxu1 %vm2764_vm3, %v2763_v22 }
 0x590   : > { %v2366_v31 = vpop.eup %2365 }
 0x591   : > { %v1024_v34 = vmul.f32 %v2366_v31, %v2362_v11  ;;  %v2346_v11 = vld [vmem:[#allocation16] sm:$0xff]  }
 0x593   : > { %v1105_v38 = vpack.c.bf16 %v1024_v34, %v1024_v34 }
 0x64d   : > { %v1098_v32 = vpop.f32.mrf.mxu1 }
 0x64e   : > { %v1104_v33 = vpack.c.bf16 %v1098_v32, %v1098_v32 }
 0x64f   : > { %v2101_v35 = vpop.f32.mrf.mxu1 }
 0x650   : > { %v1110_v36 = vsel %vm902_vm4, %v1104_v33, 0 }
 0x651   : > { %v1101_v37 = vpop.f32.mrf.mxu1  ;;  %2104 = vmatpush3.bf16.msra.mxu1 %v1110_v36 }
 0x652   : > { %2117 = vmatprep.subr.bf16.mxu1 %v2763_v22 }
 0x653   : > { %v2102_v39 = vpop.f32.mrf.mxu1 }
 0x654   : > { %2106 = vmatmul.mubr.msk.bf16.vlgmr.msra.gmra.mxu1 %vm804_vm2, %v1105_v38 }
 0x655   : > { %2121 = vmatprep.mubr.msk.bf16.mxu1 %vm2764_vm3, %v2763_v22  ;;  %2118 = vmatpush3.bf16.msra.mxu1 %v2341_v57 }
 0x656   : > { %2119 = vmatprep.subr.bf16.mxu1 %v2763_v22 }
 0x714   : > { %v1146_v41 = vpop.f32.mrf.mxu1 }
 0x715   : > { %v1152_v42 = vpack.c.bf16 %v1146_v41, %v1146_v41 }
 0x716   : > { %v2107_v43 = vpop.f32.mrf.mxu1 }
 0x717   : > { %2114 = vmatmul.mubr.msk.bf16.vlgmr.msra.gmra.mxu0 %vm816_vm0, %v1152_v42 }
 0x718   : > { %v1149_v44 = vpop.f32.mrf.mxu1  ;;  %2129 = vmatprep.mubr.msk.bf16.mxu0 %vm2764_vm3, %v2763_v22  ;;  %2126 = vmatpush3.bf16.msra.mxu0 %v2342_v59 }
 0x719   : > { %2127 = vmatprep.subr.bf16.mxu0 %v2763_v22  ;;  %v2347_v44 = vld [vmem:[#allocation17 + $0x8] sm:$0xff]  }
 0x71a   : > { %v2108_v45 = vpop.f32.mrf.mxu1 }
 0x71c   : > { %2128 = vmatpush3.bf16.msra.mxu0 %v2344_v60 }
 0x71d   : > { %2141 = vmatprep.subr.bf16.mxu0 %v2763_v22 }
 0x7d7   : > { %v1202_v46 = vpop.f32.mrf.mxu0 }
 0x7d8   : > { %v3199_v47 = vadd.f32 %v1202_v46, %v3165_v58  ;;  %v2343_v58 = vld [vmem:[#allocation13] sm:$0xff]  }
 0x7d9   : > { %v2115_v48 = vpop.f32.mrf.mxu0  ;;  %2120 = vmatpush3.bf16.msra.mxu1 %v2343_v58 }
 0x7da   : > { %v1209_v49 = vsel %vm816_vm0, %v3199_v47, 0.0  ;;  %2133 = vmatprep.subr.bf16.mxu1 %v2763_v22 }
 0x7db   : > { %1210 = vadd.xlane.f32.xlu0 %v1209_v49  ;;  %v1205_v50 = vpop.f32.mrf.mxu0  ;;  %v2348_v49 = vld [vmem:[#allocation17] sm:$0xff]  }
 0x7dd   : > { %v2116_v51 = vpop.f32.mrf.mxu0 }
 0x864   : > { %v1211_v52 = vpop.xlane.xlu0 %1210 }
 0x865   : > { %v1212_v53 = vmul.f32 0.03125, %v1211_v52 }
 0x867   : > { %v1213_v54 = vsub.f32 %v3199_v47, %v1212_v53 }
 0x869   : > { %v1214_v55 = vmul.f32 %v1213_v54, %v1213_v54 }
 0x86b   : > { %v1215_v56 = vsel %vm816_vm0, %v1214_v55, 0.0 }
 0x86c   : > { %1216 = vadd.xlane.f32.xlu1 %v1215_v56 }
 0x8f5   : > { %v1217_v61 = vpop.xlane.xlu1 %1216 }
 0x8f6   : > { %v1218_v62 = vmul.f32 0.03125, %v1217_v61 }
 0x8f8   : > { %v1219_v63 = vadd.f32 1e-05, %v1218_v62 }
 0x8fa   : > { %2367 = vrsqrt.f32 %v1219_v63 }
 0x907   : > { %v2368_v4 = vpop.eup %2367 }
 0x908   : > { %v1221_v5 = vmul.f32 %v2368_v4, %v1213_v54  ;;  %v2349_v4 = vld [vmem:[#allocation19 + $0x8] sm:$0xff]  }
 0x90a   : > { %v1226_v7 = vmul.f32 %v1225_v2, %v1221_v5  ;;  %v2350_v5 = vld [vmem:[#allocation19] sm:$0xff]  }
 0x90c   : > { %v1231_v3 = vadd.f32 %v1230_v6, %v1226_v7  ;;  %v2352_v6 = vld [vmem:[%s3335_s16 + $0x10] sm:$0xff]  }
 0x90e   : > { %v1232_v9 = vpack.c.bf16 %v1231_v3, %v1231_v3 }
 0x910   : > { %2122 = vmatmul.mubr.msk.bf16.vlgmr.msra.gmra.mxu1 %vm816_vm0, %v1232_v9  ;;  %2130 = vmatmul.mubr.msk.bf16.vlgmr.msra.gmra.mxu0 %vm816_vm0, %v1232_v9 }
 0x911   : > { %2134 = vmatpush3.bf16.msra.mxu1 %v2345_v8  ;;  %2137 = vmatprep.mubr.msk.bf16.mxu1 %vm2764_vm3, %v2763_v22 }
 0x912   : > { %2135 = vmatprep.subr.bf16.mxu1 %v2763_v22  ;;  %2143 = vmatprep.mubr.msk.bf16.mxu0 %vm2764_vm3, %v2763_v22 }
 0x915   : > { %2136 = vmatpush3.bf16.msra.mxu1 %v2346_v11 }
 0x916   : > { %2147 = vmatprep.subr.bf16.mxu1 %v2763_v22 }
 0x918   : > { %2138 = vmatmul.mubr.msk.bf16.vlgmr.msra.gmra.mxu1 %vm816_vm0, %v1232_v9  ;;  %v1588_v9 = vsub.s32 3, %v3109_v1  ;;  %v2354_v1 = vld [vmem:[%s3335_s16] sm:$0xff]  }
 0x919   : > { %2149 = vmatprep.mubr.msk.bf16.mxu1 %vm2764_vm3, %v2763_v22 }
 0x91a   : > { %v1589_v11 = vrot.slane %v3141_v29, %v1588_v9  ;;  %v2019_v29 = vld [vmem:[%s3334_s15] ss:$0 sm:$0xff] }
 0x9d0   : > { %v1286_v12 = vpop.f32.mrf.mxu1  ;;  %v1342_v13 = vpop.f32.mrf.mxu0 }
 0x9d1   : > { %v1406_v14 = vpack.c.bf16 %v1342_v13, %v1342_v13  ;;  %v1404_v20 = vmul.f32 0.17677669, %v1286_v12 }
 0x9d2   : > { %v2123_v15 = vpop.f32.mrf.mxu1  ;;  %v2131_v16 = vpop.f32.mrf.mxu0 }
 0x9d3   : > { %v1412_v17 = vsel %vm816_vm0, %v1406_v14, 0  ;;  %v1405_v25 = vpack.c.bf16 %v1404_v20, %v1404_v20  ;;  %v1594_v14 = vrot.slane %v3143_v30, %v1588_v9 }
 0x9d4   : > { %v1289_v18 = vpop.f32.mrf.mxu1  ;;  %v1345_v19 = vpop.f32.mrf.mxu0  ;;  %2142 = vmatpush3.bf16.xpose.msra.mxu0 %v1412_v17 }
 0x9d5   : > { %2153 = vmatprep.subr.bf16.mxu0 %v2763_v22  ;;  %v2353_v18 = vld [vmem:[%s3335_s16 + $0x8] sm:$0xff]  }
 0x9d6   : > { %v2124_v21 = vpop.f32.mrf.mxu1  ;;  %v2132_v23 = vpop.f32.mrf.mxu0 }
 0x9d8   : > { %v1398_v24 = vpop.f32.mrf.mxu1 }
 0x9d9   : > { %v1407_v26 = vpack.c.bf16 %v1398_v24, %v1398_v24 }
 0x9da   : > { %v2139_v27 = vpop.f32.mrf.mxu1 }
 0x9db   : > { %v1470_v28 = vsel %vm902_vm4, %v1407_v26, 0  ;;  %2144 = vmatmul.mubr.msk.bf16.vlgmr.msra.gmra.mxu0 %vm816_vm0, %v1405_v25 }
 0x9dc   : > { %v1401_v31 = vpop.f32.mrf.mxu1  ;;  %2148 = vmatpush3.bf16.msra.mxu1 %v1470_v28  ;;  %2157 = vmatprep.mubr.msk.bf16.mxu0 %vm2764_vm3, %v2763_v22 }
 0x9dd   : > { %2161 = vmatprep.subr.bf16.mxu1 %v2763_v22  ;;  %2154 = vmatpush3.bf16.msra.mxu0 %v2347_v44 }
 0x9de   : > { %v2140_v32 = vpop.f32.mrf.mxu1  ;;  %2155 = vmatprep.subr.bf16.mxu0 %v2763_v22 }
 0x9e1   : > { %2156 = vmatpush3.bf16.msra.mxu0 %v2348_v49 }
 0x9e2   : > { %2169 = vmatprep.subr.bf16.mxu0 %v2763_v22 }
 0xa9b   : > { %v1448_v33 = vpop.f32.mrf.mxu0 }
 0xa9c   : > { %v1449_v34 = vadd.f32 %v1448_v33, %v3126_v10 }
 0xa9d   : > { %v2145_v35 = vpop.f32.mrf.mxu0 }
 0xa9e   : > { %v1454_v36 = vsel %vm804_vm2, %v1449_v34, -inf }
 0xa9f   : > { %1455 = vmax.xlane.f32.xlu0 %v1454_v36  ;;  %v1451_v37 = vpop.f32.mrf.mxu0 }
 0xaa1   : > { %v2146_v38 = vpop.f32.mrf.mxu0 }
 0xb28   : > { %v1456_v39 = vpop.xlane.xlu0 %1455 }
 0xb29   : > { %v1457_v40 = vsub.f32 %v1449_v34, %v1456_v39 }
 0xb2b   : > { %v1458_v41 = vmul.f32 1.442695, %v1457_v40 }
 0xb2d   : > { %2369 = vpow2.f32 %v1458_v41 }
 0xb3a   : > { %v2370_v42 = vpop.eup %2369 }
 0xb3b   : > { %v1460_v43 = vsel %vm804_vm2, %v2370_v42, 0.0 }
 0xb3c   : > { %1461 = vadd.xlane.f32.xlu1 %v1460_v43 }
 0xbc5   : > { %v1462_v45 = vpop.xlane.xlu1 %1461 }
 0xbc6   : > { %2371 = vrcp.f32 %v1462_v45 }
 0xbd3   : > { %v2372_v10 = vpop.eup %2371 }
 0xbd4   : > { %v1464_v46 = vmul.f32 %v2372_v10, %v2370_v42 }
 0xbd6   : > { %v1465_v48 = vpack.c.bf16 %v1464_v46, %v1464_v46 }
 0xbd8   : > { %2150 = vmatmul.mubr.msk.bf16.vlgmr.msra.gmra.mxu1 %vm804_vm2, %v1465_v48 }
 0xbd9   : > { %2165 = vmatprep.mubr.msk.bf16.mxu1 %vm2764_vm3, %v2763_v22  ;;  %2162 = vmatpush3.bf16.msra.mxu1 %v2349_v4 }
 0xbda   : > { %2163 = vmatprep.subr.bf16.mxu1 %v2763_v22 }
 0xbdd   : > { %2164 = vmatpush3.bf16.msra.mxu1 %v2350_v5 }
 0xc98   : > { %v1506_v50 = vpop.f32.mrf.mxu1 }
 0xc99   : > { %v1512_v51 = vpack.c.bf16 %v1506_v50, %v1506_v50 }
 0xc9a   : > { %v2151_v52 = vpop.f32.mrf.mxu1 }
 0xc9b   : > { %2158 = vmatmul.mubr.msk.bf16.vlgmr.msra.gmra.mxu0 %vm816_vm0, %v1512_v51 }
 0xc9c   : > { %v1509_v53 = vpop.f32.mrf.mxu1  ;;  %2177 = vmatprep.mubr.msk.bf16.mxu0 %vm2764_vm3, %v2763_v22 }
 0xc9e   : > { %v2152_v54 = vpop.f32.mrf.mxu1 }
 0xd5b   : > { %v1566_v55 = vpop.f32.mrf.mxu0 }
 0xd5c   : > { %v1572_v56 = vadd.f32 %v1566_v55, %v3199_v47  ;;  %v2351_v47 = vld [vmem:[%s3335_s16 + $0x18] sm:$0xff]  }
 0xd5d   : > { %v2159_v57 = vpop.f32.mrf.mxu0  ;;  %2170 = vmatpush3.bf16.msra.mxu0 %v2351_v47 }
 0xd5e   : > { %v1573_v59 = vsel %vm816_vm0, %v1572_v56, 0.0  ;;  %2171 = vmatprep.subr.bf16.mxu0 %v2763_v22 }
 0xd5f   : > { %1574 = vadd.xlane.f32.xlu0 %v1573_v59  ;;  %v1569_v58 = vpop.f32.mrf.mxu0 }
 0xd61   : > { %v2160_v60 = vpop.f32.mrf.mxu0  ;;  %2172 = vmatpush3.bf16.msra.mxu0 %v2352_v6 }
 0xd62   : > { %2173 = vmatprep.subr.bf16.mxu0 %v2763_v22 }
 0xd65   : > { %2174 = vmatpush3.bf16.msra.mxu0 %v2353_v18 }
 0xd66   : > { %2175 = vmatprep.subr.bf16.mxu0 %v2763_v22  ;;  %v2023_v22 = vld [vmem:[%s3336_s17] ss:$0 sm:$0xff] }
 0xd69   : > { %2176 = vmatpush3.bf16.msra.mxu0 %v2354_v1 }
 0xde8   : > { %v1575_v61 = vpop.xlane.xlu0 %1574 }
 0xde9   : > { %v1576_v62 = vmul.f32 0.03125, %v1575_v61 }
 0xdeb   : > { %v1577_v63 = vsub.f32 %v1572_v56, %v1576_v62 }
 0xded   : > { %v1578_v0 = vmul.f32 %v1577_v63, %v1577_v63 }
 0xdef   : > { %v1579_v2 = vsel %vm816_vm0, %v1578_v0, 0.0 }
 0xdf0   : > { %1580 = vadd.xlane.f32.xlu1 %v1579_v2 }
 0xe79   : > { %v1581_v7 = vpop.xlane.xlu1 %1580 }
 0xe7a   : > { %v1582_v3 = vmul.f32 0.03125, %v1581_v7 }
 0xe7c   : > { %v1583_v8 = vadd.f32 1e-05, %v1582_v3 }
 0xe7e   : > { %2373 = vrsqrt.f32 %v1583_v8 }
 0xe8b   : > { %v2374_v12 = vpop.eup %2373 }
 0xe8c   : > { %v1585_v13 = vmul.f32 %v2374_v12, %v1577_v63 }
 0xe8e   : > { %v1590_v15 = vmul.f32 %v1589_v11, %v1585_v13 }
 0xe90   : > { %v1595_v16 = vadd.f32 %v1594_v14, %v1590_v15 }
 0xe92   : > { %v1596_v17 = vpack.c.bf16 %v1595_v16, %v1595_v16 }
 0xe94   : > { %2166 = vmatmul.mubr.msk.bf16.vlgmr.msra.gmra.mxu1 %vm816_vm0, %v1596_v17 }
 0xf54   : > { %v1657_v30 = vpop.f32.mrf.mxu1 }
 0xf55   : > { %v1658_v19 = vadd.f32 %v2019_v29, %v1657_v30 }
 0xf56   : > { %v2167_v20 = vpop.f32.mrf.mxu1 }
 0xf57   : > { %v1663_v21 = vmax.f32 %v1658_v19, 0.0 }
 0xf58   : > { %v1660_v23 = vpop.f32.mrf.mxu1 }
 0xf59   : > { %v1664_v24 = vpack.c.bf16 %v1663_v21, %v1663_v21 }
 0xf5a   : > { %v2168_v25 = vpop.f32.mrf.mxu1 }
 0xf5b   : > { %2178 = vmatmul.mubr.msk.bf16.vlgmr.msra.gmra.mxu0 %vm1704_vm5, %v1664_v24 }
0x101b   : > { %v1742_v26 = vpop.f32.mrf.mxu0 }
0x101c   : > { %v1743_v27 = vadd.f32 %v2023_v22, %v1742_v26 }
0x101d   : > { %v2179_v28 = vpop.f32.mrf.mxu0 }
0x101e   : > { %v1748_v31 = vadd.f32 %v1743_v27, %v1572_v56 }
0x101f   : > { %v1745_v32 = vpop.f32.mrf.mxu0 }
0x1020   : > { %1749 = vst.msk [vmem:[%s767_s12] sm:$0xff] %vm816_vm0, %v1748_v31 }
0x1021   : > { %v2180_v33 = vpop.f32.mrf.mxu0 }
0x1022   : > { %2676 = shalt.err (!%p2673_p8)
}
0x1023   : > { %s2677_s0 = scalar_lea.hbm %s3275_s2, 128  ;;  %s2681_s24 = scalar_lea.hbm %s3389_s6, 256 }
0x1024   : > { %p2678_p9 = scmp.ne.s32.totalorder %s3275_s2, %s2677_s0  ;;  %p2682_p4 = scmp.lt.s32.totalorder %s3275_s2, %s3389_s6 }
0x1025   : > { %p2683_p11 = scmp.lt.s32.totalorder %s2681_s24, %s2677_s0 }
0x1026   : > { %p2679_p1 = pnand %p2678_p9, %p3390_p5 }
0x1027   : > { %p2684_p13 = por %p2683_p11, %p2682_p4 }
0x1028   : > { %p2680_p3 = pneg %p2679_p1 }
0x102a   : > { %p2685_p2 = pnand %p2684_p13, %p2680_p3 }
0x102c   : > { %2688 = shalt.err (!%p2685_p2)
}
0x102d   : > { %2223 = dma.vmem_to_hbm [thread:$0]  (%p3390_p5), %s3277_s13, 128, %s3275_s2, %s1751_s1  }
0x102e PF: > { %s1776_s12 = sand.u32 1, %s2735_s27   ;;  %p3391_p7 = scmp.ne.s32.totalorder %s3372_s4, 0 }
0x102f   : > { %p3392_p6 = scmp.ge.s32.totalorder %s2747_s30, 2  ;;  %s1777_s20 = scalar_lea.sflag [#allocation4], %s1776_s12 }
0x1031   : > { %p2261_p10 = pnand %p3392_p6, %p3391_p7 }
0x1033   : > { %p2262_p12 = pneg %p2261_p10 }
0x1035   : > { %2730 = dma.done.wait (%p2262_p12), %s1777_s20, 128  }
0x1036   : > { %2732 = vsyncadd (%p2262_p12), %s1777_s20, 4294967168  ;;  %p36_p0 = scmp.ge.s32.totalorder %s3016_s25, 4   ;;  %s3393_s27 = smov %s2739_s28 }
0x1037   : > { %s3394_s28 = smov %s2743_s29  ;;  %s3395_s29 = smov %s3027_s22 }
0x1038   : > { %s3396_s30 = smov %s3016_s25  ;;  %38 = sbr.rel (!%p36_p0) target bundleno = 24 (0x18), region = 186 }
0x103d   :  { %1782 = vsyncpa [#allocation3], 1 }
0x103e   :  { %1784 = vsyncpa [#allocation3 + $0x1], 1 }
0x103f   :  { %1785 = vsyncpa [#allocation6], 1 }
0x1040   :  { %1786 = vsyncpa [#allocation9], 1 }
0x1041   :  { %1787 = vsyncpa [#allocation12], 1 }
0x1042   :  { %1788 = vsyncpa [#allocation15], 1 }
0x1043   :  { %1789 = vsyncpa [#allocation18], 1 }
0x1044   :  { %1790 = vsyncpa [#allocation4], 1 }
0x1045   :  { %1792 = vsyncpa [#allocation4 + $0x1], 1 }

// kernel: tpu_custom_call.1
= control target key start
LH: loop header
LB: loop body
LE: loop exit
PB: predicated region body
PF: predicated region fallthrough
CT: control target
= control target key end

     0   :  { %s3319_s0 = inlined_call_operand.vmem [shape: f32[16,32], index: 0, kind: input, shape index: {}]   ;;  %s3320_s1 = inlined_call_operand.vmem [shape: f32[2,8,8], index: 1, kind: input, shape index: {}]   ;;  %s3321_s2 = inlined_call_operand.vmem [shape: f32[2,8,8], index: 2, kind: input, shape index: {}]   ;;  %s3322_s3 = inlined_call_operand.hbm [shape: f32[2,1,8], index: 3, kind: input, shape index: {}]   ;;  %s3323_s4 = inlined_call_operand.hbm [shape: f32[4,32], index: 4, kind: input, shape index: {}]   ;;  %s3324_s5 = inlined_call_operand.hbm [shape: f32[4,32], index: 5, kind: input, shape index: {}]   ;;  %s3325_s6 = inlined_call_operand.hbm [shape: bf16[32,32], index: 6, kind: input, shape index: {}]   ;;  %s3326_s7 = inlined_call_operand.hbm [shape: bf16[32,32], index: 7, kind: input, shape index: {}]   ;;  %s3327_s8 = inlined_call_operand.hbm [shape: bf16[32,32], index: 8, kind: input, shape index: {}]   ;;  %s3328_s9 = inlined_call_operand.vmem [shape: bf16[32,32], index: 9, kind: input, shape index: {}]   ;;  %s3329_s10 = inlined_call_operand.hbm [shape: bf16[32,32], index: 10, kind: input, shape index: {}]   ;;  %s3330_s11 = inlined_call_operand.hbm [shape: bf16[32,32], index: 11, kind: input, shape index: {}]   ;;  %s3331_s12 = inlined_call_operand.hbm [shape: bf16[32,32], index: 12, kind: input, shape index: {}]   ;;  %s3332_s13 = inlined_call_operand.hbm [shape: bf16[32,32], index: 13, kind: input, shape index: {}]   ;;  %s3333_s14 = inlined_call_operand.hbm [shape: bf16[32,64], index: 14, kind: input, shape index: {}]   ;;  %s3334_s15 = inlined_call_operand.vmem [shape: f32[1,64], index: 15, kind: input, shape index: {}]   ;;  %s3335_s16 = inlined_call_operand.vmem [shape: bf16[64,32], index: 16, kind: input, shape index: {}]   ;;  %s3336_s17 = inlined_call_operand.vmem [shape: f32[1,32], index: 17, kind: input, shape index: {}]   ;;  %s3337_s18 = inlined_call_operand.hbm [shape: f32[16,32], index: 18, kind: output, shape index: {}]  }
   0x1   :  { %3343 = sst [smem:[#allocation28_spill]] %s3319_s0 }
   0x2   :  { %3344 = sst [smem:[#allocation29_spill]] %s3320_s1 }
   0x3   :  { %3345 = sst [smem:[#allocation30_spill]] %s3321_s2 }
   0x4   :  { %3346 = sst [smem:[#allocation31_spill]] %s3323_s4 }
   0x5   :  { %3347 = sst [smem:[#allocation32_spill]] %s3324_s5 }
   0x6   :  { %3348 = sst [smem:[#allocation33_spill]] %s3325_s6 }
   0x7   :  { %3349 = sst [smem:[#allocation34_spill]] %s3326_s7 }
   0x8   :  { %3350 = sst [smem:[#allocation35_spill]] %s3327_s8 }
   0x9   :  { %3351 = sst [smem:[#allocation36_spill]] %s3329_s10 }
   0xa   :  { %3352 = sst [smem:[#allocation37_spill]] %s3330_s11 }
   0xb   :  { %3353 = sst [smem:[#allocation38_spill]] %s3331_s12 }
   0xc   :  { %3354 = sst [smem:[#allocation39_spill]] %s3332_s13 }
   0xd   :  { %3355 = sst [smem:[#allocation40_spill]] %s3337_s18 }
   0xe   :  { %23 = vsyncpa [#allocation3], 0 }
   0xf   :  { %25 = vsyncpa [#allocation3 + $0x1], 0 }
  0x10   :  { %26 = vsyncpa [#allocation6], 0 }
  0x11   :  { %27 = vsyncpa [#allocation9], 0 }
  0x12   :  { %28 = vsyncpa [#allocation12], 0 }
  0x13   :  { %29 = vsyncpa [#allocation15], 0 }
  0x14   :  { %30 = vsyncpa [#allocation18], 0 }
  0x15   :  { %31 = vsyncpa [#allocation4], 0 }
  0x16   :  { %33 = vsyncpa [#allocation4 + $0x1], 0  ;;  %s2861_s27 = smov 0   ;;  %s2863_s28 = smov 0  }
  0x17   :  { %s2865_s29 = smov 0   ;;  %s2867_s30 = smov 0  }
  0x18 LB: > { %s2749_s0 = smov [#allocation5]   ;;  %s2882_s1 = sadd.s32 4294967295, %s2747_s30   ;;  %s2747_s30 = sphi %s2867_s30, %s3396_s30   ;;  %s2743_s29 = sphi %s2865_s29, %s3395_s29   ;;  %s2739_s28 = sphi %s2863_s28, %s3394_s28   ;;  %s2735_s27 = sphi %s2861_s27, %s3393_s27  }
  0x19   : > { %s481_s19 = sshll.u32 %s2749_s0, 4  ;;  %p1963_p0 = scmp.ge.s32.totalorder %s2747_s30, 1  ;;  %s482_s19 = int_to_ptr.vmem [resolvable:$true] %s481_s19 }
  0x1a   : > { %p3339_p1 = scmp.eq.s32.totalorder %s2882_s1, 0  ;;  %p468_p2 = scmp.lt.s32.totalorder %s2747_s30, 3 }
  0x1b   : > { %s2750_s21 = smov [#allocation8]   ;;  %s2751_s23 = smov [#allocation11]  }
  0x1c   : > { %p2887_p3 = pnand %p1963_p0, %p468_p2  ;;  %s502_s22 = sshll.u32 %s2750_s21, 4  ;;  %s2894_s22 = int_to_ptr.vmem [resolvable:$true] %s502_s22 }
  0x1d   : > { %s528_s24 = sshll.u32 %s2751_s23, 4  ;;  %s2386_s26 = scalar_lea.vmem %s482_s19, 64  ;;  %s2902_s24 = int_to_ptr.vmem [resolvable:$true] %s528_s24 }
  0x1e   : > { %s3356_s20 = scalar_select %p2887_p3, 1, 0 }
  0x1f   : > { %p2225_p5 = pneg %p2887_p3  ;;  %p2387_p8 = scmp.ne.s32.totalorder %s482_s19, %s2386_s26 }
  0x20   : > { %p2394_p11 = scmp.lt.s32.totalorder %s482_s19, %s482_s19  ;;  %p2395_p12 = scmp.lt.s32.totalorder %s2386_s26, %s2386_s26 }
  0x21   : > { %p2898_p6 = pnand %p2225_p5, %p3339_p1 }
  0x22   : > { %p2396_p13 = por %p2395_p12, %p2394_p11 }
  0x23   : > { %p2906_p7 = pneg %p2898_p6 }
  0x25   : > { %p2389_p9 = pnand %p2387_p8, %p2906_p7 }
  0x27   : > { %p2390_p10 = pneg %p2389_p9 }
  0x29   : > { %p2397_p0 = pnand %p2396_p13, %p2390_p10 }
  0x2b   : > { %2400 = shalt.err (!%p2397_p0)
}
  0x2c   : > { %s3359_s4 = sld [smem:[#allocation31_spill]]  ;;  %s2412_s23 = scalar_lea.vmem %s2894_s22, 256 }
  0x2d   : > { %p2413_p2 = scmp.ne.s32.totalorder %s2894_s22, %s2412_s23  ;;  %p2420_p9 = scmp.lt.s32.totalorder %s2894_s22, %s2894_s22 }
  0x2e   : > { %p2421_p11 = scmp.lt.s32.totalorder %s2412_s23, %s2412_s23 }
  0x2f   : > { %p2415_p5 = pnand %p2413_p2, %p2906_p7 }
  0x30   : > { %p2422_p10 = por %p2421_p11, %p2420_p9 }
  0x31   : > { %p2416_p8 = pneg %p2415_p5 }
  0x32   : > { %2228 = dma.hbm_to_vmem [thread:$0]  (!%p2898_p6), %s3359_s4, 64, %s482_s19, [#allocation6]  }
  0x33   : > { %p2423_p12 = pnand %p2422_p10, %p2416_p8 }
  0x35   : > { %2426 = shalt.err (!%p2423_p12)
}
  0x36   : > { %s2752_s26 = smov 64   ;;  %s2753_s0 = smov 4  }
  0x37   : > { %s3360_s6 = sld [smem:[#allocation33_spill]]  ;;  %s2438_s23 = scalar_lea.vmem %s2902_s24, 256 }
  0x38   : > { %p2439_p13 = scmp.ne.s32.totalorder %s2902_s24, %s2438_s23  ;;  %p2446_p5 = scmp.lt.s32.totalorder %s2902_s24, %s2902_s24 }
  0x39   : > { %p2447_p8 = scmp.lt.s32.totalorder %s2438_s23, %s2438_s23 }
  0x3a   : > { %p2441_p0 = pnand %p2439_p13, %p2906_p7 }
  0x3b   : > { %p2448_p9 = por %p2447_p8, %p2446_p5 }
  0x3c   : > { %p2442_p2 = pneg %p2441_p0 }
  0x3d   : > { %2234 = dma.hbm_to_vmem [thread:$0]  (!%p2898_p6), %s3360_s6, 256, %s2894_s22, [#allocation9], %s2752_s26, %s2752_s26, %s2753_s0  }
  0x3e   : > { %p2449_p11 = pnand %p2448_p9, %p2442_p2 }
  0x40   : > { %2452 = shalt.err (!%p2449_p11)
}
  0x41   : > { %s3361_s8 = sld [smem:[#allocation35_spill]]  ;;  %s2754_s22 = smov [#allocation14]  }
  0x42   : > { %s557_s21 = sshll.u32 %s2754_s22, 4  ;;  %s2755_s6 = smov [#allocation17]   ;;  %s558_s21 = int_to_ptr.vmem [resolvable:$true] %s557_s21 }
  0x43   : > { %s583_s18 = sshll.u32 %s2755_s6, 4  ;;  %s2464_s23 = scalar_lea.vmem %s558_s21, 256  ;;  %s584_s18 = int_to_ptr.vmem [resolvable:$true] %s583_s18 }
  0x44   : > { %p2465_p10 = scmp.ne.s32.totalorder %s558_s21, %s2464_s23  ;;  %p2472_p0 = scmp.lt.s32.totalorder %s558_s21, %s558_s21 }
  0x45   : > { %p2473_p2 = scmp.lt.s32.totalorder %s2464_s23, %s2464_s23 }
  0x46   : > { %p2467_p12 = pnand %p2465_p10, %p2906_p7 }
  0x47   : > { %2240 = dma.hbm_to_vmem [thread:$0]  (!%p2898_p6), %s3361_s8, 256, %s2902_s24, [#allocation12], %s2752_s26, %s2752_s26, %s2753_s0  }
  0x48   : > { %p2468_p13 = pneg %p2467_p12  ;;  %p2474_p5 = por %p2473_p2, %p2472_p0 }
  0x4a   : > { %p2475_p8 = pnand %p2474_p5, %p2468_p13 }
  0x4c   : > { %2478 = shalt.err (!%p2475_p8)
}
  0x4d   : > { %s3362_s11 = sld [smem:[#allocation37_spill]]  ;;  %s2490_s6 = scalar_lea.vmem %s584_s18, 256 }
  0x4e   : > { %p2491_p9 = scmp.ne.s32.totalorder %s584_s18, %s2490_s6  ;;  %p2498_p12 = scmp.lt.s32.totalorder %s584_s18, %s584_s18 }
  0x4f   : > { %p2499_p0 = scmp.lt.s32.totalorder %s2490_s6, %s2490_s6 }
  0x50   : > { %p2493_p11 = pnand %p2491_p9, %p2906_p7 }
  0x51   : > { %p2500_p13 = por %p2499_p0, %p2498_p12 }
  0x52   : > { %p2494_p10 = pneg %p2493_p11 }
  0x53   : > { %2246 = dma.hbm_to_vmem [thread:$0]  (!%p2898_p6), %s3362_s11, 256, %s558_s21, [#allocation15], %s2752_s26, %s2752_s26, %s2753_s0  }
  0x54   : > { %p2501_p2 = pnand %p2500_p13, %p2494_p10 }
  0x56   : > { %2504 = shalt.err (!%p2501_p2)
}
  0x57   : > { %s3363_s13 = sld [smem:[#allocation39_spill]]  ;;  %s2756_s21 = smov [#allocation7]  }
  0x58   : > { %s492_s23 = sshll.u32 %s2756_s21, 4  ;;  %s2757_s4 = smov [#allocation10]   ;;  %s493_s23 = int_to_ptr.vmem [resolvable:$true] %s492_s23 }
  0x59   : > { %s515_s24 = sshll.u32 %s2757_s4, 4  ;;  %s2516_s8 = scalar_lea.vmem %s493_s23, 64  ;;  %s516_s24 = int_to_ptr.vmem [resolvable:$true] %s515_s24 }
  0x5a   : > { %p2517_p5 = scmp.ne.s32.totalorder %s493_s23, %s2516_s8  ;;  %p2524_p11 = scmp.lt.s32.totalorder %s493_s23, %s493_s23 }
  0x5b   : > { %p2525_p10 = scmp.lt.s32.totalorder %s2516_s8, %s2516_s8 }
  0x5c   : > { %p2519_p8 = pnand %p2517_p5, %p2906_p7 }
  0x5d   : > { %2252 = dma.hbm_to_vmem [thread:$0]  (!%p2898_p6), %s3363_s13, 256, %s584_s18, [#allocation18], %s2752_s26, %s2752_s26, %s2753_s0  }
  0x5e   : > { %p2520_p9 = pneg %p2519_p8  ;;  %p2526_p12 = por %p2525_p10, %p2524_p11 }
  0x60   : > { %p2527_p0 = pnand %p2526_p12, %p2520_p9 }
  0x62   : > { %2530 = shalt.err (!%p2527_p0)
}
  0x63   : > { %s3364_s5 = sld [smem:[#allocation32_spill]]  ;;  %s2542_s18 = scalar_lea.vmem %s516_s24, 256 }
  0x64   : > { %p2543_p13 = scmp.ne.s32.totalorder %s516_s24, %s2542_s18  ;;  %p2550_p5 = scmp.lt.s32.totalorder %s516_s24, %s516_s24 }
  0x65   : > { %p2551_p8 = scmp.lt.s32.totalorder %s2542_s18, %s2542_s18 }
  0x66   : > { %p2545_p2 = pnand %p2543_p13, %p2906_p7 }
  0x67   : > { %p2552_p1 = por %p2551_p8, %p2550_p5 }
  0x68   : > { %p2546_p4 = pneg %p2545_p2 }
  0x69   : > { %2231 = dma.hbm_to_vmem [thread:$0]  (!%p2898_p6), %s3364_s5, 64, %s493_s23, [#allocation6]  }
  0x6a   : > { %p2553_p3 = pnand %p2552_p1, %p2546_p4 }
  0x6c   : > { %2556 = shalt.err (!%p2553_p3)
}
  0x6d   : > { %s3365_s7 = sld [smem:[#allocation34_spill]]  ;;  %s2758_s21 = smov [#allocation13]  }
  0x6e   : > { %s544_s23 = sshll.u32 %s2758_s21, 4  ;;  %s2759_s4 = smov [#allocation16]   ;;  %s545_s23 = int_to_ptr.vmem [resolvable:$true] %s544_s23 }
  0x6f   : > { %s570_s6 = sshll.u32 %s2759_s4, 4  ;;  %s2568_s19 = scalar_lea.vmem %s545_s23, 256  ;;  %s571_s6 = int_to_ptr.vmem [resolvable:$true] %s570_s6 }
  0x70   : > { %p2569_p9 = scmp.ne.s32.totalorder %s545_s23, %s2568_s19  ;;  %p2576_p4 = scmp.lt.s32.totalorder %s545_s23, %s545_s23 }
  0x71   : > { %p2577_p11 = scmp.lt.s32.totalorder %s2568_s19, %s2568_s19 }
  0x72   : > { %p2571_p1 = pnand %p2569_p9, %p2906_p7 }
  0x73   : > { %2237 = dma.hbm_to_vmem [thread:$0]  (!%p2898_p6), %s3365_s7, 256, %s516_s24, [#allocation9], %s2752_s26, %s2752_s26, %s2753_s0  }
  0x74   : > { %p2572_p3 = pneg %p2571_p1  ;;  %p2578_p10 = por %p2577_p11, %p2576_p4 }
  0x76   : > { %p2579_p12 = pnand %p2578_p10, %p2572_p3 }
  0x78   : > { %2582 = shalt.err (!%p2579_p12)
}
  0x79   : > { %s3366_s10 = sld [smem:[#allocation36_spill]]  ;;  %s2594_s8 = scalar_lea.vmem %s571_s6, 256 }
  0x7a   : > { %p2595_p0 = scmp.ne.s32.totalorder %s571_s6, %s2594_s8  ;;  %p2602_p5 = scmp.lt.s32.totalorder %s571_s6, %s571_s6 }
  0x7b   : > { %p2603_p8 = scmp.lt.s32.totalorder %s2594_s8, %s2594_s8 }
  0x7c   : > { %p2597_p13 = pnand %p2595_p0, %p2906_p7 }
  0x7d   : > { %p2604_p9 = por %p2603_p8, %p2602_p5 }
  0x7e   : > { %p2598_p2 = pneg %p2597_p13 }
  0x7f   : > { %2243 = dma.hbm_to_vmem [thread:$0]  (!%p2898_p6), %s3366_s10, 256, %s545_s23, [#allocation12], %s2752_s26, %s2752_s26, %s2753_s0  }
  0x80   : > { %p2605_p1 = pnand %p2604_p9, %p2598_p2 }
  0x82   : > { %2608 = shalt.err (!%p2605_p1)
}
  0x83   : > { %s3367_s12 = sld [smem:[#allocation38_spill]]  ;;  %s2760_s23 = smov [#allocation19]  }
  0x84   : > { %s596_s4 = sshll.u32 %s2760_s23, 4  ;;  %s597_s4 = int_to_ptr.vmem [resolvable:$true] %s596_s4 }
  0x85   : > { %s2620_s19 = scalar_lea.vmem %s597_s4, 256  ;;  %p2628_p10 = scmp.lt.s32.totalorder %s597_s4, %s597_s4 }
  0x86   : > { %p2621_p3 = scmp.ne.s32.totalorder %s597_s4, %s2620_s19  ;;  %p2629_p12 = scmp.lt.s32.totalorder %s2620_s19, %s2620_s19 }
  0x88   : > { %p2623_p4 = pnand %p2621_p3, %p2906_p7  ;;  %p2630_p0 = por %p2629_p12, %p2628_p10 }
  0x89   : > { %2249 = dma.hbm_to_vmem [thread:$0]  (!%p2898_p6), %s3367_s12, 256, %s571_s6, [#allocation15], %s2752_s26, %s2752_s26, %s2753_s0  }
  0x8a   : > { %p2624_p11 = pneg %p2623_p4 }
  0x8c   : > { %p2631_p13 = pnand %p2630_p0, %p2624_p11 }
  0x8e   : > { %2634 = shalt.err (!%p2631_p13)
}
  0x8f   : > { %2255 = dma.hbm_to_vmem [thread:$0]  (!%p2898_p6), %s3333_s14, 256, %s597_s4, [#allocation18], %s2752_s26, %s2752_s26, %s2753_s0  }
  0x90   : > { %s1962_s2 = sadd.s32 4294967294, %s2747_s30   ;;  %s3016_s25 = sadd.s32 1, %s2747_s30  }
  0x91   : > { %s121_s18 = ssub.s32 %s2747_s30, %s3016_s25  ;;  %s124_s8 = sadd.s32 1, %s2743_s29 }
  0x92   : > { %p122_p7 = scmp.eq.s32.totalorder %s121_s18, 0  ;;  %p131_p2 = scmp.ne.s32.totalorder %s2743_s29, %s2739_s28 }
  0x93   : > { %p132_p5 = scmp.eq.s32.totalorder %s2747_s30, 0  ;;  %p137_p8 = scmp.ne.s32.totalorder %s2739_s28, %s2735_s27 }
  0x94   : > { %s3027_s22 = scalar_select %p122_p7, %s2743_s29, %s124_s8  }
  0x95   : > { %p3029_p9 = por %p132_p5, %p131_p2  ;;  %p3369_p1 = scmp.eq.s32.totalorder %s2882_s1, 0 }
  0x96   : > { %p455_p3 = scmp.eq.s32.totalorder %s2882_s1, 1  ;;  %p461_p4 = scmp.eq.s32.totalorder %s1962_s2, 1 }
  0x97   : > { %p3035_p6 = por %p3369_p1, %p137_p8  ;;  %p2274_p11 = scmp.lt.s32.totalorder %s2747_s30, 2 }
  0x98   : > { %s640_s0 = sand.u32 1, %s2743_s29   ;;  %p3042_p10 = por %p455_p3, %p131_p2 }
  0x99   : > { %s3370_s26 = scalar_select %p3035_p6, 1, 0 }
  0x9a   : > { %s3371_s23 = scalar_select %p3042_p10, 1, 0 }
  0x9b   : > { %p3046_p12 = por %p461_p4, %p137_p8  ;;  %s1975_s19 = sshll.u32 %s2747_s30, 4 }
  0x9c   : > { %s643_s24 = scalar_lea.vmem [#allocation2], %s640_s0  ;;  %s3054_s5 = scalar_lea.hbm %s3322_s3, %s1975_s19 }
  0x9d   : > { %s3372_s4 = scalar_select %p3046_p12, 1, 0 }
  0x9e   : > { %s650_s6 = sshll.u32 %s643_s24, 4  ;;  %p3058_p0 = pnand %p2274_p11, %p3029_p9  ;;  %s651_s6 = int_to_ptr.vmem [resolvable:$true] %s650_s6 }
  0x9f   : > { %s641_s7 = scalar_lea.sflag [#allocation3], %s640_s0  ;;  %s2635_s10 = scalar_lea.hbm %s3054_s5, 16 }
  0xa0   : > { %p2636_p13 = scmp.ne.s32.totalorder %s3054_s5, %s2635_s10  ;;  %p2637_p7 = pneg %p3058_p0 }
  0xa1   : > { %s2640_s18 = scalar_lea.hbm %s3322_s3, 32  ;;  %p2641_p8 = scmp.lt.s32.totalorder %s3054_s5, %s3322_s3 }
  0xa2   : > { %p2638_p2 = pnand %p2637_p7, %p2636_p13  ;;  %p2642_p9 = scmp.lt.s32.totalorder %s2640_s18, %s2635_s10 }
  0xa4   : > { %p2639_p5 = pneg %p2638_p2  ;;  %p2643_p1 = por %p2642_p9, %p2641_p8 }
  0xa6   : > { %p2644_p3 = pnand %p2643_p1, %p2639_p5 }
  0xa8   : > { %2647 = shalt.err (!%p2644_p3)
}
  0xa9   : > { %s2648_s21 = scalar_lea.vmem %s651_s6, 16  ;;  %s2761_s0 = smov [#allocation2]  }
  0xaa   : > { %p2649_p4 = scmp.ne.s32.totalorder %s651_s6, %s2648_s21  ;;  %s2653_s12 = sshll.u32 %s2761_s0, 4  ;;  %s2654_s12 = int_to_ptr.vmem [resolvable:$false] %s2653_s12 }
  0xab   : > { %s2655_s13 = scalar_lea.vmem %s2654_s12, 32  ;;  %p2656_p13 = scmp.lt.s32.totalorder %s651_s6, %s2654_s12 }
  0xac   : > { %p2651_p11 = pnand %p2649_p4, %p2637_p7  ;;  %p2657_p2 = scmp.lt.s32.totalorder %s2655_s13, %s2648_s21 }
  0xae   : > { %p2652_p12 = pneg %p2651_p11  ;;  %p2658_p10 = por %p2657_p2, %p2656_p13 }
  0xb0   : > { %p2659_p6 = pnand %p2658_p10, %p2652_p12 }
  0xb2   : > { %2662 = shalt.err (!%p2659_p6)
}
  0xb3   : > { %2259 = dma.hbm_to_vmem [thread:$0]  (!%p3058_p0), %s3054_s5, 16, %s651_s6, %s641_s7  }
  0xb4   : > { %p3374_p5 = scmp.ne.s32.totalorder %s3356_s20, 0 }
  0xb5   : > { %s3079_s10 = sand.u32 (!%p3374_p5), 1, %s2739_s28   ;;  %p3375_p7 = scmp.ne.s32.totalorder (!%p3374_p5), %s3370_s26, 0 }
  0xb6   : > { %659 = sbr.rel (%p3374_p5) target bundleno = 4142 (0x102e), region = 92  ;;  %s662_s11 = scalar_lea.sflag (!%p3374_p5), [#allocation3], %s3079_s10 }
  0xb7   : > { %s664_s24 = scalar_lea.vmem (!%p3374_p5), [#allocation2], %s3079_s10 }
  0xbb   : > { %2706 = dma.done.wait (%p3375_p7), %s662_s11, 16  }
  0xbc   : > { %2708 = vsyncadd (%p3375_p7), %s662_s11, 4294967280  ;;  %p3376_p6 = scmp.eq.s32.totalorder %s2882_s1, 0 }
  0xbe   : > { %2710 = dma.done.wait (%p3376_p6), [#allocation6], 128   ;;  %p3377_p10 = pmov %p3376_p6 }
  0xbf   : > { %p3378_p12 = pmov %p3376_p6 }
  0xc0   : > { %2712 = vsyncadd (%p3377_p10), [#allocation6], 4294967168 }
  0xc1   : > { %2714 = dma.done.wait (%p3378_p12), [#allocation9], 512   ;;  %p3379_p0 = pmov %p3376_p6 }
  0xc3   : > { %2716 = vsyncadd (%p3379_p0), [#allocation9], 4294966784  ;;  %p3380_p8 = pmov %p3379_p0 }
  0xc4   : > { %p3381_p9 = pmov %p3379_p0 }
  0xc5   : > { %2718 = dma.done.wait (%p3380_p8), [#allocation12], 512  }
  0xc6   : > { %2720 = vsyncadd (%p3381_p9), [#allocation12], 4294966784  ;;  %p3382_p1 = pmov %p3379_p0 }
  0xc7   : > { %p3383_p3 = pmov %p3379_p0 }
  0xc8   : > { %2722 = dma.done.wait (%p3382_p1), [#allocation15], 512  }
  0xc9   : > { %2724 = vsyncadd (%p3383_p3), [#allocation15], 4294966784  ;;  %p3384_p4 = pmov %p3379_p0 }
  0xca   : > { %p3385_p11 = pmov %p3379_p0 }
  0xcb   : > { %2726 = dma.done.wait (%p3384_p4), [#allocation18], 512  }
  0xcc   : > { %2728 = vsyncadd (%p3385_p11), [#allocation18], 4294966784  ;;  %p768_p13 = scmp.lt.s32.totalorder %s2882_s1, 1  ;;  %v798_v0 = vlaneseq  ;;  %s3386_s20 = sld [smem:[#allocation28_spill]]  ;;  %vm816_vm0 = vcmask 261120   ;;  %vm804_vm2 = vcmask 64512  }
  0xcd   : > { %s3387_s19 = sld [smem:[#allocation29_spill]]  ;;  %v782_v4 = vld [vmem:[%s664_s24] sm:$0x1]  ;;  %v2762_v8 = vmov -1e+09   ;;  %v2333_v21 = vld [vmem:[#allocation8 + $0x8] sm:$0xff]  }
  0xce   : > { %s769_s5 = scalar_select %p768_p13, %s2882_s1, 1  ;;  %v3109_v1 = vshrl.u32 %v798_v0, 7  ;;  %vm785_vm1 = vcmp.gt.f32.partialorder %v782_v4, 0.0  ;;  %v2763_v22 = vmov 0.0   ;;  %vm2764_vm3 = vmmov 0   ;;  %v2334_v24 = vld [vmem:[#allocation8] sm:$0xff]  }
  0xcf   : > { %v786_v9 = vsel %vm785_vm1, 0.0, %v2762_v8  ;;  %2073 = vmatprep.subr.bf16.mxu0 %v2763_v22  ;;  %2077 = vmatprep.mubr.msk.bf16.mxu0 %vm2764_vm3, %v2763_v22  ;;  %v3141_v29 = vld [vmem:[#allocation5] sm:$0xf]  ;;  %v3143_v30 = vld [vmem:[#allocation7] sm:$0xf]  ;;  %vm902_vm4 = vcmask 1043456  }
  0xd0   : > { %s3111_s7 = sshll.u32 %s769_s5, 3  ;;  %v800_v2 = vsub.s32 0, %v3109_v1  ;;  %2074 = vmatpush3.bf16.msra.mxu0 %v2333_v21  ;;  %2081 = vmatprep.subr.bf16.mxu1 %v2763_v22  ;;  %v2335_v46 = vld [vmem:[#allocation10 + $0x8] sm:$0xff]   ;;  %v2336_v49 = vld [vmem:[#allocation10] sm:$0xff]   ;;  %s3388_s0 = sld [smem:[#allocation30_spill]]  ;;  %vm1704_vm5 = vcmask 523264  }
  0xd1   : > { %2075 = vmatprep.subr.bf16.mxu0 %v2763_v22  ;;  %2083 = vmatprep.mubr.msk.bf16.mxu1 %vm2764_vm3, %v2763_v22  ;;  %s3389_s6 = sld [smem:[#allocation40_spill]]  ;;  %p3390_p5 = scmp.ne.s32.totalorder %s3371_s23, 0 }
  0xd2   : > { %s771_s26 = scalar_lea.vmem %s3386_s20, %s3111_s7  ;;  %v3126_v10 = vrot.slane %v786_v9, %v800_v2  ;;  %v834_v31 = vrot.slane %v3141_v29, %v800_v2  ;;  %v839_v34 = vrot.slane %v3143_v30, %v800_v2 }
  0xd3   : > { %s775_s18 = scalar_lea.vmem %s3387_s19, %s3111_s7  ;;  %v3122_v3 = vld [vmem:[%s771_s26] sm:$0xff] }
  0xd4   : > { %v787_v5 = vld [vmem:[%s775_s18] sm:$0xff]  ;;  %v817_v6 = vsel %vm816_vm0, %v3122_v3, 0.0  ;;  %2076 = vmatpush3.bf16.msra.mxu0 %v2334_v24  ;;  %s2765_s18 = smov [#allocation20]  }
  0xd5   : > { %v796_v7 = vsub.f32 0.0, %v787_v5  ;;  %818 = vadd.xlane.f32.xlu0 %v817_v6  ;;  %2109 = vmatprep.subr.bf16.mxu0 %v2763_v22  ;;  %s2667_s8 = sshll.u32 %s2765_s18, 4  ;;  %s2668_s8 = int_to_ptr.vmem [resolvable:$false] %s2667_s8 }
  0xd6   : > { %s779_s11 = scalar_lea.vmem %s3388_s0, %s3111_s7  ;;  %s2030_s7 = sshll.u32 %s2882_s1, 7 }
  0xd7   : > { %v803_v11 = vadd.f32 %v3126_v10, %v796_v7  ;;  %v1003_v55 = vld [vmem:[%s779_s11] sm:$0xff]  ;;  %s1987_s11 = sshll.u32 %s3079_s10, 3  ;;  %s3275_s2 = scalar_lea.hbm %s3389_s6, %s2030_s7 }
  0xd8   : > { %v1012_v56 = vsub.f32 0.0, %v1003_v55  ;;  %s767_s12 = scalar_lea.vmem [#allocation20], %s1987_s11  ;;  %s1751_s1 = scalar_lea.sflag [#allocation4], %s3079_s10 }
  0xd9   : > { %v805_v12 = vsel %vm804_vm2, %v803_v11, -inf  ;;  %s1764_s13 = sshll.u32 %s767_s12, 4  ;;  %s2669_s21 = scalar_lea.vmem %s2668_s8, 256  ;;  %s3277_s13 = int_to_ptr.vmem [resolvable:$true] %s1764_s13 }
  0xda   : > { %806 = vmax.xlane.f32.xlu1 %v805_v12  ;;  %v1013_v59 = vadd.f32 %v1012_v56, %v3126_v10  ;;  %s2663_s19 = scalar_lea.vmem %s3277_s13, 128  ;;  %p2670_p10 = scmp.lt.s32.totalorder %s3277_s13, %s2668_s8 }
  0xdb   : > { %p2664_p2 = scmp.ne.s32.totalorder %s3277_s13, %s2663_s19  ;;  %p2671_p12 = scmp.lt.s32.totalorder %s2669_s21, %s2663_s19 }
  0xdc   : > { %v1014_v63 = vsel %vm804_vm2, %v1013_v59, -inf }
  0xdd   : > { %p2665_p7 = pnand %p2664_p2, %p3390_p5  ;;  %p2672_p0 = por %p2671_p12, %p2670_p10 }
  0xdf   : > { %p2666_p6 = pneg %p2665_p7 }
  0xe1   : > { %p2673_p8 = pnand %p2672_p0, %p2666_p6 }
 0x15e   : > { %v819_v13 = vpop.xlane.xlu0 %818 }
 0x15f   : > { %v821_v14 = vmul.f32 0.03125, %v819_v13  ;;  %v2337_v13 = vld [vmem:[#allocation11 + $0x8] sm:$0xff]  }
 0x161   : > { %v822_v15 = vsub.f32 %v3122_v3, %v821_v14  ;;  %v2338_v14 = vld [vmem:[#allocation11] sm:$0xff]  }
 0x163   : > { %v823_v16 = vmul.f32 %v822_v15, %v822_v15  ;;  %v807_v17 = vpop.xlane.xlu1 %806 }
 0x164   : > { %v808_v19 = vsub.f32 %v803_v11, %v807_v17 }
 0x165   : > { %v824_v18 = vsel %vm816_vm0, %v823_v16, 0.0 }
 0x166   : > { %825 = vadd.xlane.f32.xlu0 %v824_v18  ;;  %v809_v20 = vmul.f32 1.442695, %v808_v19  ;;  %v1040_v18 = vsub.s32 1, %v3109_v1 }
 0x168   : > { %2355 = vpow2.f32 %v809_v20  ;;  %v1041_v19 = vrot.slane %v3141_v29, %v1040_v18 }
 0x175   : > { %v2356_v23 = vpop.eup %2355 }
 0x176   : > { %v811_v25 = vsel %vm804_vm2, %v2356_v23, 0.0 }
 0x177   : > { %812 = vadd.xlane.f32.xlu1 %v811_v25 }
 0x1ef   : > { %v826_v26 = vpop.xlane.xlu0 %825 }
 0x1f0   : > { %v827_v27 = vmul.f32 0.03125, %v826_v26 }
 0x1f2   : > { %v828_v28 = vadd.f32 1e-05, %v827_v27  ;;  %v2339_v27 = vld [vmem:[%s3328_s9 + $0x8] sm:$0xff]  }
 0x1f4   : > { %2357 = vrsqrt.f32 %v828_v28 }
 0x200   : > { %v813_v38 = vpop.xlane.xlu1 %812 }
 0x201   : > { %v2358_v32 = vpop.eup %2357  ;;  %2359 = vrcp.f32 %v813_v38 }
 0x202   : > { %v830_v33 = vmul.f32 %v2358_v32, %v822_v15 }
 0x204   : > { %v835_v35 = vmul.f32 %v834_v31, %v830_v33 }
 0x206   : > { %v840_v36 = vadd.f32 %v839_v34, %v835_v35 }
 0x208   : > { %v841_v37 = vpack.c.bf16 %v840_v36, %v840_v36 }
 0x20a   : > { %2078 = vmatmul.mubr.msk.bf16.vlgmr.msra.gmra.mxu0 %vm816_vm0, %v841_v37 }
 0x20b   : > { %2113 = vmatprep.mubr.msk.bf16.mxu0 %vm2764_vm3, %v2763_v22  ;;  %2110 = vmatpush3.bf16.msra.mxu0 %v2339_v27 }
 0x20c   : > { %2111 = vmatprep.subr.bf16.mxu0 %v2763_v22 }
 0x20e   : > { %v2360_v39 = vpop.eup %2359 }
 0x20f   : > { %v815_v42 = vmul.f32 %v2360_v39, %v2356_v23  ;;  %v1046_v23 = vrot.slane %v3143_v30, %v1040_v18 }
 0x211   : > { %v898_v47 = vpack.c.bf16 %v815_v42, %v815_v42 }
 0x2ca   : > { %v891_v40 = vpop.f32.mrf.mxu0 }
 0x2cb   : > { %v897_v41 = vpack.c.bf16 %v891_v40, %v891_v40  ;;  %v2340_v40 = vld [vmem:[%s3328_s9] sm:$0xff]  }
 0x2cc   : > { %v2079_v43 = vpop.f32.mrf.mxu0  ;;  %2112 = vmatpush3.bf16.msra.mxu0 %v2340_v40 }
 0x2cd   : > { %v904_v44 = vsel %vm902_vm4, %v897_v41, 0  ;;  %2125 = vmatprep.subr.bf16.mxu0 %v2763_v22 }
 0x2ce   : > { %v894_v45 = vpop.f32.mrf.mxu0  ;;  %2082 = vmatpush3.bf16.msra.mxu1 %v904_v44 }
 0x2cf   : > { %2087 = vmatprep.subr.bf16.mxu1 %v2763_v22 }
 0x2d0   : > { %v2080_v48 = vpop.f32.mrf.mxu0 }
 0x2d1   : > { %2084 = vmatmul.mubr.msk.bf16.vlgmr.msra.gmra.mxu1 %vm804_vm2, %v898_v47 }
 0x2d2   : > { %2088 = vmatpush3.bf16.msra.mxu1 %v2335_v46  ;;  %2091 = vmatprep.mubr.msk.bf16.mxu1 %vm2764_vm3, %v2763_v22 }
 0x2d3   : > { %2089 = vmatprep.subr.bf16.mxu1 %v2763_v22 }
 0x2d6   : > { %2090 = vmatpush3.bf16.msra.mxu1 %v2336_v49 }
 0x2d7   : > { %2095 = vmatprep.subr.bf16.mxu1 %v2763_v22 }
 0x391   : > { %v940_v50 = vpop.f32.mrf.mxu1 }
 0x392   : > { %v946_v51 = vpack.c.bf16 %v940_v50, %v940_v50 }
 0x393   : > { %v2085_v52 = vpop.f32.mrf.mxu1 }
 0x394   : > { %2092 = vmatmul.mubr.msk.bf16.vlgmr.msra.gmra.mxu1 %vm816_vm0, %v946_v51 }
 0x395   : > { %v943_v53 = vpop.f32.mrf.mxu1  ;;  %2099 = vmatprep.mubr.msk.bf16.mxu1 %vm2764_vm3, %v2763_v22  ;;  %2096 = vmatpush3.bf16.msra.mxu1 %v2337_v13 }
 0x396   : > { %2097 = vmatprep.subr.bf16.mxu1 %v2763_v22 }
 0x397   : > { %v2086_v54 = vpop.f32.mrf.mxu1 }
 0x399   : > { %2098 = vmatpush3.bf16.msra.mxu1 %v2338_v14 }
 0x39a   : > { %2103 = vmatprep.subr.bf16.mxu1 %v2763_v22 }
 0x454   : > { %v996_v57 = vpop.f32.mrf.mxu1 }
 0x455   : > { %v3165_v58 = vadd.f32 %v996_v57, %v3122_v3  ;;  %v2341_v57 = vld [vmem:[#allocation13 + $0x8] sm:$0xff]  }
 0x456   : > { %v2093_v60 = vpop.f32.mrf.mxu1 }
 0x457   : > { %v1025_v61 = vsel %vm816_vm0, %v3165_v58, 0.0  ;;  %v2344_v60 = vld [vmem:[#allocation14] sm:$0xff]  }
 0x458   : > { %1026 = vadd.xlane.f32.xlu0 %v1025_v61  ;;  %v999_v62 = vpop.f32.mrf.mxu1 }
 0x45a   : > { %v2094_v0 = vpop.f32.mrf.mxu1 }
 0x45b   : > { %v1224_v0 = vsub.s32 2, %v3109_v1 }
 0x45c   : > { %1015 = vmax.xlane.f32.xlu0 %v1014_v63 }
 0x4e1   : > { %v1027_v2 = vpop.xlane.xlu0 %1026 }
 0x4e2   : > { %v1028_v4 = vmul.f32 0.03125, %v1027_v2  ;;  %v1225_v2 = vrot.slane %v3141_v29, %v1224_v0 }
 0x4e4   : > { %v1029_v5 = vsub.f32 %v3165_v58, %v1028_v4 }
 0x4e5   : > { %v1016_v6 = vpop.xlane.xlu0 %1015 }
 0x4e6   : > { %v1030_v7 = vmul.f32 %v1029_v5, %v1029_v5  ;;  %v1017_v3 = vsub.f32 %v1013_v59, %v1016_v6  ;;  %v2342_v59 = vld [vmem:[#allocation14 + $0x8] sm:$0xff]   ;;  %v1230_v6 = vrot.slane %v3143_v30, %v1224_v0 }
 0x4e8   : > { %v1031_v8 = vsel %vm816_vm0, %v1030_v7, 0.0  ;;  %v1018_v9 = vmul.f32 1.442695, %v1017_v3 }
 0x4e9   : > { %1032 = vadd.xlane.f32.xlu1 %v1031_v8  ;;  %v2345_v8 = vld [vmem:[#allocation16 + $0x8] sm:$0xff]  }
 0x4ea   : > { %2361 = vpow2.f32 %v1018_v9 }
 0x4f7   : > { %v2362_v11 = vpop.eup %2361 }
 0x4f8   : > { %v1020_v12 = vsel %vm804_vm2, %v2362_v11, 0.0 }
 0x4f9   : > { %1021 = vadd.xlane.f32.xlu1 %v1020_v12 }
 0x572   : > { %v1033_v15 = vpop.xlane.xlu1 %1032 }
 0x573   : > { %v1034_v16 = vmul.f32 0.03125, %v1033_v15 }
 0x575   : > { %v1035_v17 = vadd.f32 1e-05, %v1034_v16 }
 0x577   : > { %2363 = vrsqrt.f32 %v1035_v17 }
 0x582   : > { %v1022_v28 = vpop.xlane.xlu1 %1021 }
 0x583   : > { %2365 = vrcp.f32 %v1022_v28 }
 0x584   : > { %v2364_v20 = vpop.eup %2363 }
 0x585   : > { %v1037_v21 = vmul.f32 %v2364_v20, %v1029_v5 }
 0x587   : > { %v1042_v24 = vmul.f32 %v1041_v19, %v1037_v21 }
 0x589   : > { %v1047_v25 = vadd.f32 %v1046_v23, %v1042_v24 }
 0x58b   : > { %v1048_v26 = vpack.c.bf16 %v1047_v25, %v1047_v25 }
 0x58d   : > { %2100 = vmatmul.mubr.msk.bf16.vlgmr.msra.gmra.mxu1 %vm816_vm0, %v1048_v26 }
 0x58e   : > { %2105 = vmatprep.mubr.msk.bf16.mxu1 %vm2764_vm3, %v2763_v22 }
 0x590   : > { %v2366_v31 = vpop.eup %2365 }
 0x591   : > { %v1024_v34 = vmul.f32 %v2366_v31, %v2362_v11  ;;  %v2346_v11 = vld [vmem:[#allocation16] sm:$0xff]  }
 0x593   : > { %v1105_v38 = vpack.c.bf16 %v1024_v34, %v1024_v34 }
 0x64d   : > { %v1098_v32 = vpop.f32.mrf.mxu1 }
 0x64e   : > { %v1104_v33 = vpack.c.bf16 %v1098_v32, %v1098_v32 }
 0x64f   : > { %v2101_v35 = vpop.f32.mrf.mxu1 }
 0x650   : > { %v1110_v36 = vsel %vm902_vm4, %v1104_v33, 0 }
 0x651   : > { %v1101_v37 = vpop.f32.mrf.mxu1  ;;  %2104 = vmatpush3.bf16.msra.mxu1 %v1110_v36 }
 0x652   : > { %2117 = vmatprep.subr.bf16.mxu1 %v2763_v22 }
 0x653   : > { %v2102_v39 = vpop.f32.mrf.mxu1 }
 0x654   : > { %2106 = vmatmul.mubr.msk.bf16.vlgmr.msra.gmra.mxu1 %vm804_vm2, %v1105_v38 }
 0x655   : > { %2121 = vmatprep.mubr.msk.bf16.mxu1 %vm2764_vm3, %v2763_v22  ;;  %2118 = vmatpush3.bf16.msra.mxu1 %v2341_v57 }
 0x656   : > { %2119 = vmatprep.subr.bf16.mxu1 %v2763_v22 }
 0x714   : > { %v1146_v41 = vpop.f32.mrf.mxu1 }
 0x715   : > { %v1152_v42 = vpack.c.bf16 %v1146_v41, %v1146_v41 }
 0x716   : > { %v2107_v43 = vpop.f32.mrf.mxu1 }
 0x717   : > { %2114 = vmatmul.mubr.msk.bf16.vlgmr.msra.gmra.mxu0 %vm816_vm0, %v1152_v42 }
 0x718   : > { %v1149_v44 = vpop.f32.mrf.mxu1  ;;  %2129 = vmatprep.mubr.msk.bf16.mxu0 %vm2764_vm3, %v2763_v22  ;;  %2126 = vmatpush3.bf16.msra.mxu0 %v2342_v59 }
 0x719   : > { %2127 = vmatprep.subr.bf16.mxu0 %v2763_v22  ;;  %v2347_v44 = vld [vmem:[#allocation17 + $0x8] sm:$0xff]  }
 0x71a   : > { %v2108_v45 = vpop.f32.mrf.mxu1 }
 0x71c   : > { %2128 = vmatpush3.bf16.msra.mxu0 %v2344_v60 }
 0x71d   : > { %2141 = vmatprep.subr.bf16.mxu0 %v2763_v22 }
 0x7d7   : > { %v1202_v46 = vpop.f32.mrf.mxu0 }
 0x7d8   : > { %v3199_v47 = vadd.f32 %v1202_v46, %v3165_v58  ;;  %v2343_v58 = vld [vmem:[#allocation13] sm:$0xff]  }
 0x7d9   : > { %v2115_v48 = vpop.f32.mrf.mxu0  ;;  %2120 = vmatpush3.bf16.msra.mxu1 %v2343_v58 }
 0x7da   : > { %v1209_v49 = vsel %vm816_vm0, %v3199_v47, 0.0  ;;  %2133 = vmatprep.subr.bf16.mxu1 %v2763_v22 }
 0x7db   : > { %1210 = vadd.xlane.f32.xlu0 %v1209_v49  ;;  %v1205_v50 = vpop.f32.mrf.mxu0  ;;  %v2348_v49 = vld [vmem:[#allocation17] sm:$0xff]  }
 0x7dd   : > { %v2116_v51 = vpop.f32.mrf.mxu0 }
 0x864   : > { %v1211_v52 = vpop.xlane.xlu0 %1210 }
 0x865   : > { %v1212_v53 = vmul.f32 0.03125, %v1211_v52 }
 0x867   : > { %v1213_v54 = vsub.f32 %v3199_v47, %v1212_v53 }
 0x869   : > { %v1214_v55 = vmul.f32 %v1213_v54, %v1213_v54 }
 0x86b   : > { %v1215_v56 = vsel %vm816_vm0, %v1214_v55, 0.0 }
 0x86c   : > { %1216 = vadd.xlane.f32.xlu1 %v1215_v56 }
 0x8f5   : > { %v1217_v61 = vpop.xlane.xlu1 %1216 }
 0x8f6   : > { %v1218_v62 = vmul.f32 0.03125, %v1217_v61 }
 0x8f8   : > { %v1219_v63 = vadd.f32 1e-05, %v1218_v62 }
 0x8fa   : > { %2367 = vrsqrt.f32 %v1219_v63 }
 0x907   : > { %v2368_v4 = vpop.eup %2367 }
 0x908   : > { %v1221_v5 = vmul.f32 %v2368_v4, %v1213_v54  ;;  %v2349_v4 = vld [vmem:[#allocation19 + $0x8] sm:$0xff]  }
 0x90a   : > { %v1226_v7 = vmul.f32 %v1225_v2, %v1221_v5  ;;  %v2350_v5 = vld [vmem:[#allocation19] sm:$0xff]  }
 0x90c   : > { %v1231_v3 = vadd.f32 %v1230_v6, %v1226_v7  ;;  %v2352_v6 = vld [vmem:[%s3335_s16 + $0x10] sm:$0xff]  }
 0x90e   : > { %v1232_v9 = vpack.c.bf16 %v1231_v3, %v1231_v3 }
 0x910   : > { %2122 = vmatmul.mubr.msk.bf16.vlgmr.msra.gmra.mxu1 %vm816_vm0, %v1232_v9  ;;  %2130 = vmatmul.mubr.msk.bf16.vlgmr.msra.gmra.mxu0 %vm816_vm0, %v1232_v9 }
 0x911   : > { %2134 = vmatpush3.bf16.msra.mxu1 %v2345_v8  ;;  %2137 = vmatprep.mubr.msk.bf16.mxu1 %vm2764_vm3, %v2763_v22 }
 0x912   : > { %2135 = vmatprep.subr.bf16.mxu1 %v2763_v22  ;;  %2143 = vmatprep.mubr.msk.bf16.mxu0 %vm2764_vm3, %v2763_v22 }
 0x915   : > { %2136 = vmatpush3.bf16.msra.mxu1 %v2346_v11 }
 0x916   : > { %2147 = vmatprep.subr.bf16.mxu1 %v2763_v22 }
 0x918   : > { %2138 = vmatmul.mubr.msk.bf16.vlgmr.msra.gmra.mxu1 %vm816_vm0, %v1232_v9  ;;  %v1588_v9 = vsub.s32 3, %v3109_v1  ;;  %v2354_v1 = vld [vmem:[%s3335_s16] sm:$0xff]  }
 0x919   : > { %2149 = vmatprep.mubr.msk.bf16.mxu1 %vm2764_vm3, %v2763_v22 }
 0x91a   : > { %v1589_v11 = vrot.slane %v3141_v29, %v1588_v9  ;;  %v2019_v29 = vld [vmem:[%s3334_s15] ss:$0 sm:$0xff] }
 0x9d0   : > { %v1286_v12 = vpop.f32.mrf.mxu1  ;;  %v1342_v13 = vpop.f32.mrf.mxu0 }
 0x9d1   : > { %v1406_v14 = vpack.c.bf16 %v1342_v13, %v1342_v13  ;;  %v1404_v20 = vmul.f32 0.17677669, %v1286_v12 }
 0x9d2   : > { %v2123_v15 = vpop.f32.mrf.mxu1  ;;  %v2131_v16 = vpop.f32.mrf.mxu0 }
 0x9d3   : > { %v1412_v17 = vsel %vm816_vm0, %v1406_v14, 0  ;;  %v1405_v25 = vpack.c.bf16 %v1404_v20, %v1404_v20  ;;  %v1594_v14 = vrot.slane %v3143_v30, %v1588_v9 }
 0x9d4   : > { %v1289_v18 = vpop.f32.mrf.mxu1  ;;  %v1345_v19 = vpop.f32.mrf.mxu0  ;;  %2142 = vmatpush3.bf16.xpose.msra.mxu0 %v1412_v17 }
 0x9d5   : > { %2153 = vmatprep.subr.bf16.mxu0 %v2763_v22  ;;  %v2353_v18 = vld [vmem:[%s3335_s16 + $0x8] sm:$0xff]  }
 0x9d6   : > { %v2124_v21 = vpop.f32.mrf.mxu1  ;;  %v2132_v23 = vpop.f32.mrf.mxu0 }
 0x9d8   : > { %v1398_v24 = vpop.f32.mrf.mxu1 }
 0x9d9   : > { %v1407_v26 = vpack.c.bf16 %v1398_v24, %v1398_v24 }
 0x9da   : > { %v2139_v27 = vpop.f32.mrf.mxu1 }
 0x9db   : > { %v1470_v28 = vsel %vm902_vm4, %v1407_v26, 0  ;;  %2144 = vmatmul.mubr.msk.bf16.vlgmr.msra.gmra.mxu0 %vm816_vm0, %v1405_v25 }
 0x9dc   : > { %v1401_v31 = vpop.f32.mrf.mxu1  ;;  %2148 = vmatpush3.bf16.msra.mxu1 %v1470_v28  ;;  %2157 = vmatprep.mubr.msk.bf16.mxu0 %vm2764_vm3, %v2763_v22 }
 0x9dd   : > { %2161 = vmatprep.subr.bf16.mxu1 %v2763_v22  ;;  %2154 = vmatpush3.bf16.msra.mxu0 %v2347_v44 }
 0x9de   : > { %v2140_v32 = vpop.f32.mrf.mxu1  ;;  %2155 = vmatprep.subr.bf16.mxu0 %v2763_v22 }
 0x9e1   : > { %2156 = vmatpush3.bf16.msra.mxu0 %v2348_v49 }
 0x9e2   : > { %2169 = vmatprep.subr.bf16.mxu0 %v2763_v22 }
 0xa9b   : > { %v1448_v33 = vpop.f32.mrf.mxu0 }
 0xa9c   : > { %v1449_v34 = vadd.f32 %v1448_v33, %v3126_v10 }
 0xa9d   : > { %v2145_v35 = vpop.f32.mrf.mxu0 }
 0xa9e   : > { %v1454_v36 = vsel %vm804_vm2, %v1449_v34, -inf }
 0xa9f   : > { %1455 = vmax.xlane.f32.xlu0 %v1454_v36  ;;  %v1451_v37 = vpop.f32.mrf.mxu0 }
 0xaa1   : > { %v2146_v38 = vpop.f32.mrf.mxu0 }
 0xb28   : > { %v1456_v39 = vpop.xlane.xlu0 %1455 }
 0xb29   : > { %v1457_v40 = vsub.f32 %v1449_v34, %v1456_v39 }
 0xb2b   : > { %v1458_v41 = vmul.f32 1.442695, %v1457_v40 }
 0xb2d   : > { %2369 = vpow2.f32 %v1458_v41 }
 0xb3a   : > { %v2370_v42 = vpop.eup %2369 }
 0xb3b   : > { %v1460_v43 = vsel %vm804_vm2, %v2370_v42, 0.0 }
 0xb3c   : > { %1461 = vadd.xlane.f32.xlu1 %v1460_v43 }
 0xbc5   : > { %v1462_v45 = vpop.xlane.xlu1 %1461 }
 0xbc6   : > { %2371 = vrcp.f32 %v1462_v45 }
 0xbd3   : > { %v2372_v10 = vpop.eup %2371 }
 0xbd4   : > { %v1464_v46 = vmul.f32 %v2372_v10, %v2370_v42 }
 0xbd6   : > { %v1465_v48 = vpack.c.bf16 %v1464_v46, %v1464_v46 }
 0xbd8   : > { %2150 = vmatmul.mubr.msk.bf16.vlgmr.msra.gmra.mxu1 %vm804_vm2, %v1465_v48 }
 0xbd9   : > { %2165 = vmatprep.mubr.msk.bf16.mxu1 %vm2764_vm3, %v2763_v22  ;;  %2162 = vmatpush3.bf16.msra.mxu1 %v2349_v4 }
 0xbda   : > { %2163 = vmatprep.subr.bf16.mxu1 %v2763_v22 }
 0xbdd   : > { %2164 = vmatpush3.bf16.msra.mxu1 %v2350_v5 }
 0xc98   : > { %v1506_v50 = vpop.f32.mrf.mxu1 }
 0xc99   : > { %v1512_v51 = vpack.c.bf16 %v1506_v50, %v1506_v50 }
 0xc9a   : > { %v2151_v52 = vpop.f32.mrf.mxu1 }
 0xc9b   : > { %2158 = vmatmul.mubr.msk.bf16.vlgmr.msra.gmra.mxu0 %vm816_vm0, %v1512_v51 }
 0xc9c   : > { %v1509_v53 = vpop.f32.mrf.mxu1  ;;  %2177 = vmatprep.mubr.msk.bf16.mxu0 %vm2764_vm3, %v2763_v22 }
 0xc9e   : > { %v2152_v54 = vpop.f32.mrf.mxu1 }
 0xd5b   : > { %v1566_v55 = vpop.f32.mrf.mxu0 }
 0xd5c   : > { %v1572_v56 = vadd.f32 %v1566_v55, %v3199_v47  ;;  %v2351_v47 = vld [vmem:[%s3335_s16 + $0x18] sm:$0xff]  }
 0xd5d   : > { %v2159_v57 = vpop.f32.mrf.mxu0  ;;  %2170 = vmatpush3.bf16.msra.mxu0 %v2351_v47 }
 0xd5e   : > { %v1573_v59 = vsel %vm816_vm0, %v1572_v56, 0.0  ;;  %2171 = vmatprep.subr.bf16.mxu0 %v2763_v22 }
 0xd5f   : > { %1574 = vadd.xlane.f32.xlu0 %v1573_v59  ;;  %v1569_v58 = vpop.f32.mrf.mxu0 }
 0xd61   : > { %v2160_v60 = vpop.f32.mrf.mxu0  ;;  %2172 = vmatpush3.bf16.msra.mxu0 %v2352_v6 }
 0xd62   : > { %2173 = vmatprep.subr.bf16.mxu0 %v2763_v22 }
 0xd65   : > { %2174 = vmatpush3.bf16.msra.mxu0 %v2353_v18 }
 0xd66   : > { %2175 = vmatprep.subr.bf16.mxu0 %v2763_v22  ;;  %v2023_v22 = vld [vmem:[%s3336_s17] ss:$0 sm:$0xff] }
 0xd69   : > { %2176 = vmatpush3.bf16.msra.mxu0 %v2354_v1 }
 0xde8   : > { %v1575_v61 = vpop.xlane.xlu0 %1574 }
 0xde9   : > { %v1576_v62 = vmul.f32 0.03125, %v1575_v61 }
 0xdeb   : > { %v1577_v63 = vsub.f32 %v1572_v56, %v1576_v62 }
 0xded   : > { %v1578_v0 = vmul.f32 %v1577_v63, %v1577_v63 }
 0xdef   : > { %v1579_v2 = vsel %vm816_vm0, %v1578_v0, 0.0 }
 0xdf0   : > { %1580 = vadd.xlane.f32.xlu1 %v1579_v2 }
 0xe79   : > { %v1581_v7 = vpop.xlane.xlu1 %1580 }
 0xe7a   : > { %v1582_v3 = vmul.f32 0.03125, %v1581_v7 }
 0xe7c   : > { %v1583_v8 = vadd.f32 1e-05, %v1582_v3 }
 0xe7e   : > { %2373 = vrsqrt.f32 %v1583_v8 }
 0xe8b   : > { %v2374_v12 = vpop.eup %2373 }
 0xe8c   : > { %v1585_v13 = vmul.f32 %v2374_v12, %v1577_v63 }
 0xe8e   : > { %v1590_v15 = vmul.f32 %v1589_v11, %v1585_v13 }
 0xe90   : > { %v1595_v16 = vadd.f32 %v1594_v14, %v1590_v15 }
 0xe92   : > { %v1596_v17 = vpack.c.bf16 %v1595_v16, %v1595_v16 }
 0xe94   : > { %2166 = vmatmul.mubr.msk.bf16.vlgmr.msra.gmra.mxu1 %vm816_vm0, %v1596_v17 }
 0xf54   : > { %v1657_v30 = vpop.f32.mrf.mxu1 }
 0xf55   : > { %v1658_v19 = vadd.f32 %v2019_v29, %v1657_v30 }
 0xf56   : > { %v2167_v20 = vpop.f32.mrf.mxu1 }
 0xf57   : > { %v1663_v21 = vmax.f32 %v1658_v19, 0.0 }
 0xf58   : > { %v1660_v23 = vpop.f32.mrf.mxu1 }
 0xf59   : > { %v1664_v24 = vpack.c.bf16 %v1663_v21, %v1663_v21 }
 0xf5a   : > { %v2168_v25 = vpop.f32.mrf.mxu1 }
 0xf5b   : > { %2178 = vmatmul.mubr.msk.bf16.vlgmr.msra.gmra.mxu0 %vm1704_vm5, %v1664_v24 }
0x101b   : > { %v1742_v26 = vpop.f32.mrf.mxu0 }
0x101c   : > { %v1743_v27 = vadd.f32 %v2023_v22, %v1742_v26 }
0x101d   : > { %v2179_v28 = vpop.f32.mrf.mxu0 }
0x101e   : > { %v1748_v31 = vadd.f32 %v1743_v27, %v1572_v56 }
0x101f   : > { %v1745_v32 = vpop.f32.mrf.mxu0 }
0x1020   : > { %1749 = vst.msk [vmem:[%s767_s12] sm:$0xff] %vm816_vm0, %v1748_v31 }
0x1021   : > { %v2180_v33 = vpop.f32.mrf.mxu0 }
0x1022   : > { %2676 = shalt.err (!%p2673_p8)
}
0x1023   : > { %s2677_s0 = scalar_lea.hbm %s3275_s2, 128  ;;  %s2681_s24 = scalar_lea.hbm %s3389_s6, 256 }
0x1024   : > { %p2678_p9 = scmp.ne.s32.totalorder %s3275_s2, %s2677_s0  ;;  %p2682_p4 = scmp.lt.s32.totalorder %s3275_s2, %s3389_s6 }
0x1025   : > { %p2683_p11 = scmp.lt.s32.totalorder %s2681_s24, %s2677_s0 }
0x1026   : > { %p2679_p1 = pnand %p2678_p9, %p3390_p5 }
0x1027   : > { %p2684_p13 = por %p2683_p11, %p2682_p4 }
0x1028   : > { %p2680_p3 = pneg %p2679_p1 }
0x102a   : > { %p2685_p2 = pnand %p2684_p13, %p2680_p3 }
0x102c   : > { %2688 = shalt.err (!%p2685_p2)
}
0x102d   : > { %2223 = dma.vmem_to_hbm [thread:$0]  (%p3390_p5), %s3277_s13, 128, %s3275_s2, %s1751_s1  }
0x102e PF: > { %s1776_s12 = sand.u32 1, %s2735_s27   ;;  %p3391_p7 = scmp.ne.s32.totalorder %s3372_s4, 0 }
0x102f   : > { %p3392_p6 = scmp.ge.s32.totalorder %s2747_s30, 2  ;;  %s1777_s20 = scalar_lea.sflag [#allocation4], %s1776_s12 }
0x1031   : > { %p2261_p10 = pnand %p3392_p6, %p3391_p7 }
0x1033   : > { %p2262_p12 = pneg %p2261_p10 }
0x1035   : > { %2730 = dma.done.wait (%p2262_p12), %s1777_s20, 128  }
0x1036   : > { %2732 = vsyncadd (%p2262_p12), %s1777_s20, 4294967168  ;;  %p36_p0 = scmp.ge.s32.totalorder %s3016_s25, 4   ;;  %s3393_s27 = smov %s2739_s28 }
0x1037   : > { %s3394_s28 = smov %s2743_s29  ;;  %s3395_s29 = smov %s3027_s22 }
0x1038   : > { %s3396_s30 = smov %s3016_s25  ;;  %38 = sbr.rel (!%p36_p0) target bundleno = 24 (0x18), region = 186 }
0x103d   :  { %1782 = vsyncpa [#allocation3], 1 }
0x103e   :  { %1784 = vsyncpa [#allocation3 + $0x1], 1 }
0x103f   :  { %1785 = vsyncpa [#allocation6], 1 }
0x1040   :  { %1786 = vsyncpa [#allocation9], 1 }
0x1041   :  { %1787 = vsyncpa [#allocation12], 1 }
0x1042   :  { %1788 = vsyncpa [#allocation15], 1 }
0x1043   :  { %1789 = vsyncpa [#allocation18], 1 }
0x1044   :  { %1790 = vsyncpa [#allocation4], 1 }
0x1045   :  { %1792 = vsyncpa [#allocation4 + $0x1], 1 }

</bundles_post_ra>
